<compile_context>
chip_gen: v7x
topology: tpu7x:2x2x1
jax: 0.10.0
libtpu: 0.0.40
codegen_flags: <defaults>
</compile_context>

<pallas_src>
import functools

import jax
import jax.numpy as jnp
from jax.experimental import pallas as pl
from jax.experimental.pallas import tpu as pltpu


def _vmem_limit_bytes():
    """~100 MiB on 128 MiB parts (v5e/v6e), ~51 MiB on 64 MiB parts (v7x)."""
    cap = 64 * 1024 * 1024
    try:
        cap = int(pltpu.get_tpu_info().vmem_capacity_bytes)
    except Exception:
        pass
    return max(32 * 1024 * 1024, min((cap * 4) // 5, 100 * 1024 * 1024))


def _pick_time_block(t, target):
    """Prefer an exact divisor of T close to `target` (no padding); otherwise
    pad T up to a multiple of `target` and guard the tail steps in-kernel."""
    target = max(1, min(int(target), t))
    if t % target == 0:
        return target, t
    for cand in range(target, max(target // 2, 1) - 1, -1):
        if t % cand == 0:
            return cand, t
    return target, pl.cdiv(t, target) * target


# ----------------------------------------------------------------------------
# Fused kernel: per (direction, batch-block, time-block) grid step, hoist the
# input projection for the whole block into VMEM, then run tt recurrent steps
# with h/c carried in VMEM scratch across time blocks.
# ----------------------------------------------------------------------------
def _fused_lstm_kernel(x_ref, w_ih_ref, w_hh_ref, b_ref, out_ref,
                       h_scr, c_scr, pre_scr, *,
                       hidden, batch, tt, nt, t_real, t_pad,
                       num_directions, merged_out):
    # x_ref   : (1, tt*Bb, I)  raw-dtype input rows for this block (t-major)
    # w_ih_ref: (1, I, 4H)     compute-dtype, single-buffered
    # w_hh_ref: (1, H, 4H)     compute-dtype, dropout already applied
    # b_ref   : (1, 1, 4H)     f32 fused bias (b_ih + b_hh)
    # out_ref : (tt, Bb, H)    [merged]  or  (1, tt, Bb, H)  [separate]
    # h_scr/c_scr: (Bb, H) f32 carried state; pre_scr: (tt*Bb, 4H) f32
    d = pl.program_id(0)
    tb = pl.program_id(2)
    H = hidden
    Bb = batch
    cdt = w_hh_ref.dtype

    @pl.when(tb == 0)
    def _():
        h_scr[...] = jnp.zeros_like(h_scr)
        c_scr[...] = jnp.zeros_like(c_scr)

    # Hoisted input projection: one big MXU matmul per time block, f32
    # accumulate, bias folded in.  Never touches HBM.
    pre_scr[...] = (
        jnp.dot(x_ref[0].astype(cdt), w_ih_ref[0],
                preferred_element_type=jnp.float32)
        + b_ref[0]
    )

    w_hh = w_hh_ref[0]                      # (H, 4H) compute dtype
    guard = t_pad != t_real                 # static; only when T was padded

    def step(idx):                          # idx is a Python int -> static slices
        h = h_scr[...]
        c = c_scr[...]
        # TODO(synk): weight-stationary MXU driving (pltpu.matmul_push_rhs) for
        # tiny-batch cases is not implemented; jnp.dot re-streams W_hh per step.
        pre = pre_scr[idx * Bb:(idx + 1) * Bb, :] + jnp.dot(
            h.astype(cdt), w_hh, preferred_element_type=jnp.float32)
        gates = jax.nn.sigmoid(pre[:, :3 * H])   # i, f, o in one f32 slab
        g_t = jnp.tanh(pre[:, 3 * H:])
        i_t = gates[:, :H]
        f_t = gates[:, H:2 * H]
        o_t = gates[:, 2 * H:3 * H]
        c_new = f_t * c + i_t * g_t
        h_new = o_t * jnp.tanh(c_new)
        h_scr[...] = h_new
        c_scr[...] = c_new
        if merged_out:
            out_ref[idx] = h_new.astype(out_ref.dtype)
        else:
            out_ref[0, idx] = h_new.astype(out_ref.dtype)

    def run_direction(reverse):
        # Static in-block time order per direction (no program_id-dependent
        # index), so the unrolled loop's loads schedule around the serial
        # h @ W_hh chain.
        for i in range(tt):
            idx = (tt - 1 - i) if reverse else i
            if guard:
                t0 = ((nt - 1 - tb) if reverse else tb) * tt
                pl.when(t0 + idx < t_real)(functools.partial(step, idx))
            else:
                step(idx)

    if num_directions == 1:
        run_direction(False)
    else:
        @pl.when(d == 0)
        def _():
            run_direction(False)

        @pl.when(d == 1)
        def _():
            run_direction(True)


def _recurrence(x_rows, w_ih_s, w_hh_s, bias_s, *, hidden, bb, tt, nt, t_real,
                t_pad, out_dtype, merged_out, single_buffer_weights):
    nb_blocks, _, in_dim = x_rows.shape
    D, _, H4 = w_ih_s.shape
    H = hidden
    total_batch = bb * nb_blocks

    def tmap(d, tb):
        # forward walks time blocks 0..nt-1, reverse walks nt-1..0
        return tb + d * (nt - 1 - 2 * tb)

    # Direction-constant operands: single-buffer them -- their block index only
    # changes with the outer "d" axis, so double buffering just wastes VMEM.
    wkw = {"pipeline_mode": pl.Buffered(1)} if single_buffer_weights else {}

    in_specs = [
        pl.BlockSpec((1, tt * bb, in_dim), lambda d, nb, tb: (nb, tmap(d, tb), 0)),
        pl.BlockSpec((1, in_dim, H4), lambda d, nb, tb: (d, 0, 0), **wkw),
        pl.BlockSpec((1, H, H4), lambda d, nb, tb: (d, 0, 0), **wkw),
        pl.BlockSpec((1, 1, H4), lambda d, nb, tb: (d, 0, 0), **wkw),
    ]
    if merged_out:
        # Write straight into the final (T, B, D*H) result (no concat pass).
        out_shape = jax.ShapeDtypeStruct((t_pad, total_batch, D * H), out_dtype)
        out_specs = pl.BlockSpec((tt, bb, H),
                                 lambda d, nb, tb: (tmap(d, tb), nb, d))
    else:
        out_shape = jax.ShapeDtypeStruct((D, t_pad, total_batch, H), out_dtype)
        out_specs = pl.BlockSpec((1, tt, bb, H),
                                 lambda d, nb, tb: (d, tmap(d, tb), nb, 0))

    kernel = functools.partial(
        _fused_lstm_kernel, hidden=H, batch=bb, tt=tt, nt=nt, t_real=t_real,
        t_pad=t_pad, num_directions=D, merged_out=merged_out)

    return pl.pallas_call(
        kernel,
        out_shape=out_shape,
        grid=(D, nb_blocks, nt),
        in_specs=in_specs,
        out_specs=out_specs,
        scratch_shapes=[
            pltpu.VMEM((bb, H), jnp.float32),          # h carry
            pltpu.VMEM((bb, H), jnp.float32),          # c carry
            pltpu.VMEM((tt * bb, H4), jnp.float32),    # hoisted i2h preact (VMEM only)
        ],
        compiler_params=pltpu.CompilerParams(
            dimension_semantics=("parallel", "parallel", "arbitrary"),
            vmem_limit_bytes=_vmem_limit_bytes()),
    )(x_rows, w_ih_s, w_hh_s, bias_s)


# ----------------------------------------------------------------------------
# WeightDrop.forward equivalent
# ----------------------------------------------------------------------------
def weight_drop_lstm_forward(x, params, *, weight_p, bidirectional, training,
                             dropout_key=None, compute_dtype=jnp.bfloat16,
                             time_block=16):
    """x: (T, B, input_size) time-major.  Returns (T, B, H) or (T, B, 2H)."""
    T, B, in_dim = x.shape
    H4 = params["weight_raw"].shape[0]
    H = H4 // 4
    D = 2 if bidirectional else 1

    # ---- _setweights(): F.dropout on the raw f32 h2h weight, in the wrapper.
    w_hh_list = [params["weight_raw"]]
    w_ih_list = [params["w_ih"]]
    bias_list = [params["b_ih"] + params["b_hh"]]
    if bidirectional:
        w_hh_list.append(params["weight_raw_rev"])
        w_ih_list.append(params["w_ih_rev"])
        bias_list.append(params["b_ih_rev"] + params["b_hh_rev"])

    w_hh_f32 = jnp.stack([jnp.transpose(w) for w in w_hh_list]).astype(jnp.float32)
    if training and weight_p > 0.0:
        if weight_p >= 1.0:
            w_hh_f32 = jnp.zeros_like(w_hh_f32)
        else:
            if dropout_key is None:
                raise ValueError("dropout_key is required when training with weight_p > 0")
            keep = jax.random.bernoulli(dropout_key, 1.0 - weight_p, w_hh_f32.shape)
            w_hh_f32 = w_hh_f32 * keep.astype(jnp.float32) / jnp.float32(1.0 - weight_p)

    w_hh_s = w_hh_f32.astype(compute_dtype)                                        # (D, H, 4H)
    w_ih_s = jnp.stack([jnp.transpose(w) for w in w_ih_list]).astype(compute_dtype)  # (D, I, 4H)
    bias_s = jnp.stack(bias_list).reshape(D, 1, H4).astype(jnp.float32)             # (D, 1, 4H)

    # ---- tiling: exact divisor of T if possible, else pad + in-kernel guard.
    tt, t_pad = _pick_time_block(T, time_block)
    batch_blocks = 2 if (D == 1 and B % 16 == 0) else 1   # fill 2nd TC (v7x) when unidir
    bb = B // batch_blocks
    if t_pad // tt > 1 and (tt * bb) % 8 != 0:
        # row blocks of the flattened (time*batch, I) input must be sublane
        # aligned unless they span the whole axis; fall back to a single block.
        tt, t_pad = T, T
        batch_blocks, bb = 1, B
    nt = t_pad // tt

    x_pad = x if t_pad == T else jnp.pad(x, ((0, t_pad - T), (0, 0), (0, 0)))
    if batch_blocks == 1:
        x_rows = x_pad.reshape(1, t_pad * B, in_dim)            # free reshape
    else:
        # one-time relayout so each batch half is a contiguous row block
        x_rows = (x_pad.reshape(t_pad, batch_blocks, bb, in_dim)
                  .swapaxes(0, 1).reshape(batch_blocks, t_pad * bb, in_dim))

    merged_out = (D == 1) or (H % 128 == 0)   # lane-aligned in-place (T,B,D*H) store

    kwargs = dict(hidden=H, bb=bb, tt=tt, nt=nt, t_real=T, t_pad=t_pad,
                  out_dtype=x.dtype, merged_out=merged_out)
    try:
        out = _recurrence(x_rows, w_ih_s, w_hh_s, bias_s,
                          single_buffer_weights=True, **kwargs)
    except Exception:
        # pipeline_mode=pl.Buffered(1) unsupported on this jax version.
        out = _recurrence(x_rows, w_ih_s, w_hh_s, bias_s,
                          single_buffer_weights=False, **kwargs)

    if merged_out:
        return out[:T] if t_pad != T else out
    out = out[:, :T] if t_pad != T else out
    return jnp.concatenate([out[0], out[1]], axis=-1) if D == 2 else out[0]


# ----------------------------------------------------------------------------
# Parameter init + pure-JAX reference (for correctness check in eval mode)
# ----------------------------------------------------------------------------
def init_params(key, input_size, hidden_size, bidirectional):
    bound = 1.0 / (hidden_size ** 0.5)
    names_shapes = [
        ("w_ih", (4 * hidden_size, input_size)),
        ("b_ih", (4 * hidden_size,)),
        ("weight_raw", (4 * hidden_size, hidden_size)),   # h2h.weight (raw)
        ("b_hh", (4 * hidden_size,)),
    ]
    if bidirectional:
        names_shapes += [
            ("w_ih_rev", (4 * hidden_size, input_size)),
            ("b_ih_rev", (4 * hidden_size,)),
            ("weight_raw_rev", (4 * hidden_size, hidden_size)),
            ("b_hh_rev", (4 * hidden_size,)),
        ]
    params = {}
    for name, shape in names_shapes:
        key, sub = jax.random.split(key)
        params[name] = jax.random.uniform(sub, shape, jnp.float32,
                                          minval=-bound, maxval=bound)
    return params


def _reference_forward(x, params, *, bidirectional):
    """Pure-JAX f32 reference of the custom LSTM cell (eval mode, no dropout)."""
    def cell(x_seq, w_ih, b_ih, w_hh, b_hh):
        B = x_seq.shape[1]
        H = w_hh.shape[1]

        def step(carry, x_t):
            h, c = carry
            pre = x_t @ w_ih.T + b_ih + h @ w_hh.T + b_hh
            gates = jax.nn.sigmoid(pre[:, :3 * H])
            g = jnp.tanh(pre[:, 3 * H:])
            i, f, o = gates[:, :H], gates[:, H:2 * H], gates[:, 2 * H:3 * H]
            c = f * c + i * g
            h = o * jnp.tanh(c)
            return (h, c), h

        h0 = jnp.zeros((B, H), jnp.float32)
        _, hs = jax.lax.scan(step, (h0, h0), x_seq)
        return hs

    fwd = cell(x, params["w_ih"], params["b_ih"],
               params["weight_raw"], params["b_hh"])
    if not bidirectional:
        return fwd
    bwd = cell(x[::-1], params["w_ih_rev"], params["b_ih_rev"],
               params["weight_raw_rev"], params["b_hh_rev"])[::-1]
    return jnp.concatenate([fwd, bwd], axis=-1)


if __name__ == "__main__":
    root = jax.random.PRNGKey(0)

    def run_check(key, T, B, I, H, bidirectional, time_block=16):
        kx, kp = jax.random.split(key)
        x = jax.random.normal(kx, (T, B, I), jnp.float32)
        params = init_params(kp, I, H, bidirectional)
        out = weight_drop_lstm_forward(
            x, params, weight_p=0.5, bidirectional=bidirectional,
            training=False, compute_dtype=jnp.float32, time_block=time_block)
        out = jax.block_until_ready(out)
        ref = _reference_forward(x, params, bidirectional=bidirectional)
        assert out.shape == ref.shape, (out.shape, ref.shape)
        err = float(jnp.max(jnp.abs(out - ref)))
        assert bool(jnp.allclose(out, ref, rtol=2e-4, atol=2e-4)), err
        return x, params

    k1, k2, k3, k4, k5 = jax.random.split(root, 5)

    # 1) bidirectional, small H  -> separate-layout output (+concat) path
    x, params = run_check(k1, T=8, B=2, I=16, H=32, bidirectional=True)
    # 2) bidirectional, H % 128 == 0 -> merged lane-aligned (T, B, 2H) output
    run_check(k2, T=8, B=2, I=16, H=128, bidirectional=True)
    # 3) unidirectional, B % 16 == 0 -> batch-split "parallel" grid axis
    run_check(k3, T=8, B=16, I=16, H=32, bidirectional=False)
    # 4) ragged T -> padding + in-kernel validity guard, both directions
    run_check(k4, T=7, B=2, I=16, H=32, bidirectional=True, time_block=4)

    # 5) training mode: weight dropout active, bf16 matmuls / f32 gates+state
    out_train = weight_drop_lstm_forward(
        x, params, weight_p=0.5, bidirectional=True, training=True,
        dropout_key=k5)
    out_train = jax.block_until_ready(out_train)
    assert out_train.shape == (8, 2, 64)
    assert bool(jnp.all(jnp.isfinite(out_train)))

    print("KERNEL_OK")
</pallas_src>

<mosaic_0001>
module attributes {stable_mosaic.version = 11 : i64} {
  func.func @_fused_lstm_kernel(%arg0: i32, %arg1: i32, %arg2: i32, %arg3: memref<1x16x16xf32, #tpu.memory_space<vmem>>, %arg4: memref<1x16x128xf32, #tpu.memory_space<vmem>>, %arg5: memref<1x32x128xf32, #tpu.memory_space<vmem>>, %arg6: memref<1x1x128xf32, #tpu.memory_space<vmem>>, %arg7: memref<1x8x2x32xf32, #tpu.memory_space<vmem>>, %arg8: memref<2x32xf32, #tpu.memory_space<vmem>>, %arg9: memref<2x32xf32, #tpu.memory_space<vmem>>, %arg10: memref<16x128xf32, #tpu.memory_space<vmem>>) attributes {dimension_semantics = [#tpu.dimension_semantics<parallel>, #tpu.dimension_semantics<parallel>, #tpu.dimension_semantics<arbitrary>], iteration_bounds = array<i64: 2, 1, 1>, scalar_prefetch = 0 : i64, scratch_operands = 3 : i64, tpu.core_type = #tpu.core_type<tc>, window_params = [{transform_indices = @transform_0, window_bounds = array<i64: 1, 16, 16>}, {pipeline_mode = #tpu.pipeline_mode<synchronous>, transform_indices = @transform_1, window_bounds = array<i64: 1, 16, 128>}, {pipeline_mode = #tpu.pipeline_mode<synchronous>, transform_indices = @transform_2, window_bounds = array<i64: 1, 32, 128>}, {pipeline_mode = #tpu.pipeline_mode<synchronous>, transform_indices = @transform_3, window_bounds = array<i64: 1, 1, 128>}, {transform_indices = @transform_4, window_bounds = array<i64: 1, 8, 2, 32>}]} {
    %c0_i32 = arith.constant 0 : i32
    %0 = arith.cmpi eq, %arg2, %c0_i32 : i32
    %1 = arith.extui %0 : i1 to i32
    %c0_i32_0 = arith.constant 0 : i32
    %2 = arith.cmpi ne, %1, %c0_i32_0 : i32
    scf.if %2 {
      %cst_17 = arith.constant 0.000000e+00 : f32
      %21 = vector.broadcast %cst_17 : f32 to vector<2x32xf32>
      %c0_18 = arith.constant 0 : index
      %c0_19 = arith.constant 0 : index
      %22 = vector.load %arg8[%c0_18, %c0_19] : memref<2x32xf32, #tpu.memory_space<vmem>>, vector<2x32xf32>
      tpu.vector_store %arg8[%c0_18, %c0_19], %21 {strides = array<i32>} : memref<2x32xf32, #tpu.memory_space<vmem>>, vector<2x32xf32>,
      %cst_20 = arith.constant 0.000000e+00 : f32
      %23 = vector.broadcast %cst_20 : f32 to vector<2x32xf32>
      %c0_21 = arith.constant 0 : index
      %c0_22 = arith.constant 0 : index
      %24 = vector.load %arg9[%c0_21, %c0_22] : memref<2x32xf32, #tpu.memory_space<vmem>>, vector<2x32xf32>
      tpu.vector_store %arg9[%c0_21, %c0_22], %23 {strides = array<i32>} : memref<2x32xf32, #tpu.memory_space<vmem>>, vector<2x32xf32>,
    } else {
    }
    %c0 = arith.constant 0 : index
    %c0_1 = arith.constant 0 : index
    %c0_2 = arith.constant 0 : index
    %3 = vector.load %arg3[%c0, %c0_1, %c0_2] : memref<1x16x16xf32, #tpu.memory_space<vmem>>, vector<1x16x16xf32>
    %4 = vector.shape_cast %3 : vector<1x16x16xf32> to vector<16x16xf32>
    %c0_3 = arith.constant 0 : index
    %c0_4 = arith.constant 0 : index
    %c0_5 = arith.constant 0 : index
    %5 = vector.load %arg4[%c0_3, %c0_4, %c0_5] : memref<1x16x128xf32, #tpu.memory_space<vmem>>, vector<1x16x128xf32>
    %6 = vector.shape_cast %5 : vector<1x16x128xf32> to vector<16x128xf32>
    %cst = arith.constant dense<0.000000e+00> : vector<16x128xf32>
    %7 = tpu.matmul %4, %6, %cst {dimension_numbers = #tpu.dot_dimension_numbers<[1], [0], [0], [1], [0, 0, 1, 1], [], []>} : vector<16x16xf32>, vector<16x128xf32>, vector<16x128xf32> -> vector<16x128xf32>
    %c0_6 = arith.constant 0 : index
    %c0_7 = arith.constant 0 : index
    %c0_8 = arith.constant 0 : index
    %8 = vector.load %arg6[%c0_6, %c0_7, %c0_8] : memref<1x1x128xf32, #tpu.memory_space<vmem>>, vector<1x1x128xf32>
    %9 = vector.shape_cast %8 : vector<1x1x128xf32> to vector<1x128xf32>
    %10 = vector.broadcast %9 : vector<1x128xf32> to vector<16x128xf32>
    %11 = arith.addf %7, %10 : vector<16x128xf32>
    %c0_9 = arith.constant 0 : index
    %c0_10 = arith.constant 0 : index
    %12 = vector.load %arg10[%c0_9, %c0_10] : memref<16x128xf32, #tpu.memory_space<vmem>>, vector<16x128xf32>
    tpu.vector_store %arg10[%c0_9, %c0_10], %11 {strides = array<i32>} : memref<16x128xf32, #tpu.memory_space<vmem>>, vector<16x128xf32>,
    %c0_11 = arith.constant 0 : index
    %c0_12 = arith.constant 0 : index
    %c0_13 = arith.constant 0 : index
    %13 = vector.load %arg5[%c0_11, %c0_12, %c0_13] : memref<1x32x128xf32, #tpu.memory_space<vmem>>, vector<1x32x128xf32>
    %14 = vector.shape_cast %13 : vector<1x32x128xf32> to vector<32x128xf32>
    %c0_i32_14 = arith.constant 0 : i32
    %15 = arith.cmpi eq, %arg0, %c0_i32_14 : i32
    %16 = arith.extui %15 : i1 to i32
    %c0_i32_15 = arith.constant 0 : i32
    %17 = arith.cmpi ne, %16, %c0_i32_15 : i32
    scf.if %17 {
      %c0_17 = arith.constant 0 : index
      %c0_18 = arith.constant 0 : index
      %21 = vector.load %arg8[%c0_17, %c0_18] : memref<2x32xf32, #tpu.memory_space<vmem>>, vector<2x32xf32>
      %c0_19 = arith.constant 0 : index
      %c0_20 = arith.constant 0 : index
      %22 = vector.load %arg9[%c0_19, %c0_20] : memref<2x32xf32, #tpu.memory_space<vmem>>, vector<2x32xf32>
      %c0_21 = arith.constant 0 : index
      %c0_22 = arith.constant 0 : index
      %23 = vector.load %arg10[%c0_21, %c0_22] : memref<16x128xf32, #tpu.memory_space<vmem>>, vector<2x128xf32>
      %cst_23 = arith.constant dense<0.000000e+00> : vector<2x128xf32>
      %24 = tpu.matmul %21, %14, %cst_23 {dimension_numbers = #tpu.dot_dimension_numbers<[1], [0], [0], [1], [0, 0, 1, 1], [], []>} : vector<2x32xf32>, vector<32x128xf32>, vector<2x128xf32> -> vector<2x128xf32>
      %25 = arith.addf %23, %24 : vector<2x128xf32>
      %26 = vector.extract_strided_slice %25 {offsets = [0, 0], sizes = [2, 96], strides = [1, 1]} : vector<2x128xf32> to vector<2x96xf32>
      %27 = arith.negf %26 : vector<2x96xf32>
      %28 = math.exp %27 : vector<2x96xf32>
      %cst_24 = arith.constant 1.000000e+00 : f32
      %29 = vector.broadcast %cst_24 : f32 to vector<2x96xf32>
      %30 = arith.addf %29, %28 : vector<2x96xf32>
      %31 = arith.divf %29, %30 : vector<2x96xf32>
      %32 = vector.extract_strided_slice %25 {offsets = [0, 96], sizes = [2, 32], strides = [1, 1]} : vector<2x128xf32> to vector<2x32xf32>
      %33 = math.tanh %32 : vector<2x32xf32>
      %34 = vector.extract_strided_slice %31 {offsets = [0, 0], sizes = [2, 32], strides = [1, 1]} : vector<2x96xf32> to vector<2x32xf32>
      %35 = vector.extract_strided_slice %31 {offsets = [0, 32], sizes = [2, 32], strides = [1, 1]} : vector<2x96xf32> to vector<2x32xf32>
      %36 = vector.extract_strided_slice %31 {offsets = [0, 64], sizes = [2, 32], strides = [1, 1]} : vector<2x96xf32> to vector<2x32xf32>
      %37 = arith.mulf %35, %22 : vector<2x32xf32>
      %38 = arith.mulf %34, %33 : vector<2x32xf32>
      %39 = arith.addf %37, %38 : vector<2x32xf32>
      %40 = math.tanh %39 : vector<2x32xf32>
      %41 = arith.mulf %36, %40 : vector<2x32xf32>
      %c0_25 = arith.constant 0 : index
      %c0_26 = arith.constant 0 : index
      %42 = vector.load %arg8[%c0_25, %c0_26] : memref<2x32xf32, #tpu.memory_space<vmem>>, vector<2x32xf32>
      tpu.vector_store %arg8[%c0_25, %c0_26], %41 {strides = array<i32>} : memref<2x32xf32, #tpu.memory_space<vmem>>, vector<2x32xf32>,
      %c0_27 = arith.constant 0 : index
      %c0_28 = arith.constant 0 : index
      %43 = vector.load %arg9[%c0_27, %c0_28] : memref<2x32xf32, #tpu.memory_space<vmem>>, vector<2x32xf32>
      tpu.vector_store %arg9[%c0_27, %c0_28], %39 {strides = array<i32>} : memref<2x32xf32, #tpu.memory_space<vmem>>, vector<2x32xf32>,
      %c0_29 = arith.constant 0 : index
      %c0_30 = arith.constant 0 : index
      %c0_31 = arith.constant 0 : index
      %c0_32 = arith.constant 0 : index
      %44 = vector.load %arg7[%c0_29, %c0_30, %c0_31, %c0_32] : memref<1x8x2x32xf32, #tpu.memory_space<vmem>>, vector<1x1x2x32xf32>
      %45 = vector.shape_cast %44 : vector<1x1x2x32xf32> to vector<2x32xf32>
      %46 = vector.shape_cast %41 : vector<2x32xf32> to vector<1x1x2x32xf32>
      tpu.vector_store %arg7[%c0_29, %c0_30, %c0_31, %c0_32], %46 {strides = array<i32>} : memref<1x8x2x32xf32, #tpu.memory_space<vmem>>, vector<1x1x2x32xf32>,
      %c0_33 = arith.constant 0 : index
      %c0_34 = arith.constant 0 : index
      %47 = vector.load %arg8[%c0_33, %c0_34] : memref<2x32xf32, #tpu.memory_space<vmem>>, vector<2x32xf32>
      %c0_35 = arith.constant 0 : index
      %c0_36 = arith.constant 0 : index
      %48 = vector.load %arg9[%c0_35, %c0_36] : memref<2x32xf32, #tpu.memory_space<vmem>>, vector<2x32xf32>
      %c2 = arith.constant 2 : index
      %c0_37 = arith.constant 0 : index
      %49 = vector.load %arg10[%c2, %c0_37] : memref<16x128xf32, #tpu.memory_space<vmem>>, vector<2x128xf32>
      %cst_38 = arith.constant dense<0.000000e+00> : vector<2x128xf32>
      %50 = tpu.matmul %47, %14, %cst_38 {dimension_numbers = #tpu.dot_dimension_numbers<[1], [0], [0], [1], [0, 0, 1, 1], [], []>} : vector<2x32xf32>, vector<32x128xf32>, vector<2x128xf32> -> vector<2x128xf32>
      %51 = arith.addf %49, %50 : vector<2x128xf32>
      %52 = vector.extract_strided_slice %51 {offsets = [0, 0], sizes = [2, 96], strides = [1, 1]} : vector<2x128xf32> to vector<2x96xf32>
      %53 = arith.negf %52 : vector<2x96xf32>
      %54 = math.exp %53 : vector<2x96xf32>
      %cst_39 = arith.constant 1.000000e+00 : f32
      %55 = vector.broadcast %cst_39 : f32 to vector<2x96xf32>
      %56 = arith.addf %55, %54 : vector<2x96xf32>
      %57 = arith.divf %55, %56 : vector<2x96xf32>
      %58 = vector.extract_strided_slice %51 {offsets = [0, 96], sizes = [2, 32], strides = [1, 1]} : vector<2x128xf32> to vector<2x32xf32>
      %59 = math.tanh %58 : vector<2x32xf32>
      %60 = vector.extract_strided_slice %57 {offsets = [0, 0], sizes = [2, 32], strides = [1, 1]} : vector<2x96xf32> to vector<2x32xf32>
      %61 = vector.extract_strided_slice %57 {offsets = [0, 32], sizes = [2, 32], strides = [1, 1]} : vector<2x96xf32> to vector<2x32xf32>
      %62 = vector.extract_strided_slice %57 {offsets = [0, 64], sizes = [2, 32], strides = [1, 1]} : vector<2x96xf32> to vector<2x32xf32>
      %63 = arith.mulf %61, %48 : vector<2x32xf32>
      %64 = arith.mulf %60, %59 : vector<2x32xf32>
      %65 = arith.addf %63, %64 : vector<2x32xf32>
      %66 = math.tanh %65 : vector<2x32xf32>
      %67 = arith.mulf %62, %66 : vector<2x32xf32>
      %c0_40 = arith.constant 0 : index
      %c0_41 = arith.constant 0 : index
      %68 = vector.load %arg8[%c0_40, %c0_41] : memref<2x32xf32, #tpu.memory_space<vmem>>, vector<2x32xf32>
      tpu.vector_store %arg8[%c0_40, %c0_41], %67 {strides = array<i32>} : memref<2x32xf32, #tpu.memory_space<vmem>>, vector<2x32xf32>,
      %c0_42 = arith.constant 0 : index
      %c0_43 = arith.constant 0 : index
      %69 = vector.load %arg9[%c0_42, %c0_43] : memref<2x32xf32, #tpu.memory_space<vmem>>, vector<2x32xf32>
      tpu.vector_store %arg9[%c0_42, %c0_43], %65 {strides = array<i32>} : memref<2x32xf32, #tpu.memory_space<vmem>>, vector<2x32xf32>,
      %c0_44 = arith.constant 0 : index
      %c1 = arith.constant 1 : index
      %c0_45 = arith.constant 0 : index
      %c0_46 = arith.constant 0 : index
      %70 = vector.load %arg7[%c0_44, %c1, %c0_45, %c0_46] : memref<1x8x2x32xf32, #tpu.memory_space<vmem>>, vector<1x1x2x32xf32>
      %71 = vector.shape_cast %70 : vector<1x1x2x32xf32> to vector<2x32xf32>
      %72 = vector.shape_cast %67 : vector<2x32xf32> to vector<1x1x2x32xf32>
      tpu.vector_store %arg7[%c0_44, %c1, %c0_45, %c0_46], %72 {strides = array<i32>} : memref<1x8x2x32xf32, #tpu.memory_space<vmem>>, vector<1x1x2x32xf32>,
      %c0_47 = arith.constant 0 : index
      %c0_48 = arith.constant 0 : index
      %73 = vector.load %arg8[%c0_47, %c0_48] : memref<2x32xf32, #tpu.memory_space<vmem>>, vector<2x32xf32>
      %c0_49 = arith.constant 0 : index
      %c0_50 = arith.constant 0 : index
      %74 = vector.load %arg9[%c0_49, %c0_50] : memref<2x32xf32, #tpu.memory_space<vmem>>, vector<2x32xf32>
      %c4 = arith.constant 4 : index
      %c0_51 = arith.constant 0 : index
      %75 = vector.load %arg10[%c4, %c0_51] : memref<16x128xf32, #tpu.memory_space<vmem>>, vector<2x128xf32>
      %cst_52 = arith.constant dense<0.000000e+00> : vector<2x128xf32>
      %76 = tpu.matmul %73, %14, %cst_52 {dimension_numbers = #tpu.dot_dimension_numbers<[1], [0], [0], [1], [0, 0, 1, 1], [], []>} : vector<2x32xf32>, vector<32x128xf32>, vector<2x128xf32> -> vector<2x128xf32>
      %77 = arith.addf %75, %76 : vector<2x128xf32>
      %78 = vector.extract_strided_slice %77 {offsets = [0, 0], sizes = [2, 96], strides = [1, 1]} : vector<2x128xf32> to vector<2x96xf32>
      %79 = arith.negf %78 : vector<2x96xf32>
      %80 = math.exp %79 : vector<2x96xf32>
      %cst_53 = arith.constant 1.000000e+00 : f32
      %81 = vector.broadcast %cst_53 : f32 to vector<2x96xf32>
      %82 = arith.addf %81, %80 : vector<2x96xf32>
      %83 = arith.divf %81, %82 : vector<2x96xf32>
      %84 = vector.extract_strided_slice %77 {offsets = [0, 96], sizes = [2, 32], strides = [1, 1]} : vector<2x128xf32> to vector<2x32xf32>
      %85 = math.tanh %84 : vector<2x32xf32>
      %86 = vector.extract_strided_slice %83 {offsets = [0, 0], sizes = [2, 32], strides = [1, 1]} : vector<2x96xf32> to vector<2x32xf32>
      %87 = vector.extract_strided_slice %83 {offsets = [0, 32], sizes = [2, 32], strides = [1, 1]} : vector<2x96xf32> to vector<2x32xf32>
      %88 = vector.extract_strided_slice %83 {offsets = [0, 64], sizes = [2, 32], strides = [1, 1]} : vector<2x96xf32> to vector<2x32xf32>
      %89 = arith.mulf %87, %74 : vector<2x32xf32>
      %90 = arith.mulf %86, %85 : vector<2x32xf32>
      %91 = arith.addf %89, %90 : vector<2x32xf32>
      %92 = math.tanh %91 : vector<2x32xf32>
      %93 = arith.mulf %88, %92 : vector<2x32xf32>
      %c0_54 = arith.constant 0 : index
      %c0_55 = arith.constant 0 : index
      %94 = vector.load %arg8[%c0_54, %c0_55] : memref<2x32xf32, #tpu.memory_space<vmem>>, vector<2x32xf32>
      tpu.vector_store %arg8[%c0_54, %c0_55], %93 {strides = array<i32>} : memref<2x32xf32, #tpu.memory_space<vmem>>, vector<2x32xf32>,
      %c0_56 = arith.constant 0 : index
      %c0_57 = arith.constant 0 : index
      %95 = vector.load %arg9[%c0_56, %c0_57] : memref<2x32xf32, #tpu.memory_space<vmem>>, vector<2x32xf32>
      tpu.vector_store %arg9[%c0_56, %c0_57], %91 {strides = array<i32>} : memref<2x32xf32, #tpu.memory_space<vmem>>, vector<2x32xf32>,
      %c0_58 = arith.constant 0 : index
      %c2_59 = arith.constant 2 : index
      %c0_60 = arith.constant 0 : index
      %c0_61 = arith.constant 0 : index
      %96 = vector.load %arg7[%c0_58, %c2_59, %c0_60, %c0_61] : memref<1x8x2x32xf32, #tpu.memory_space<vmem>>, vector<1x1x2x32xf32>
      %97 = vector.shape_cast %96 : vector<1x1x2x32xf32> to vector<2x32xf32>
      %98 = vector.shape_cast %93 : vector<2x32xf32> to vector<1x1x2x32xf32>
      tpu.vector_store %arg7[%c0_58, %c2_59, %c0_60, %c0_61], %98 {strides = array<i32>} : memref<1x8x2x32xf32, #tpu.memory_space<vmem>>, vector<1x1x2x32xf32>,
      %c0_62 = arith.constant 0 : index
      %c0_63 = arith.constant 0 : index
      %99 = vector.load %arg8[%c0_62, %c0_63] : memref<2x32xf32, #tpu.memory_space<vmem>>, vector<2x32xf32>
      %c0_64 = arith.constant 0 : index
      %c0_65 = arith.constant 0 : index
      %100 = vector.load %arg9[%c0_64, %c0_65] : memref<2x32xf32, #tpu.memory_space<vmem>>, vector<2x32xf32>
      %c6 = arith.constant 6 : index
      %c0_66 = arith.constant 0 : index
      %101 = vector.load %arg10[%c6, %c0_66] : memref<16x128xf32, #tpu.memory_space<vmem>>, vector<2x128xf32>
      %cst_67 = arith.constant dense<0.000000e+00> : vector<2x128xf32>
      %102 = tpu.matmul %99, %14, %cst_67 {dimension_numbers = #tpu.dot_dimension_numbers<[1], [0], [0], [1], [0, 0, 1, 1], [], []>} : vector<2x32xf32>, vector<32x128xf32>, vector<2x128xf32> -> vector<2x128xf32>
      %103 = arith.addf %101, %102 : vector<2x128xf32>
      %104 = vector.extract_strided_slice %103 {offsets = [0, 0], sizes = [2, 96], strides = [1, 1]} : vector<2x128xf32> to vector<2x96xf32>
      %105 = arith.negf %104 : vector<2x96xf32>
      %106 = math.exp %105 : vector<2x96xf32>
      %cst_68 = arith.constant 1.000000e+00 : f32
      %107 = vector.broadcast %cst_68 : f32 to vector<2x96xf32>
      %108 = arith.addf %107, %106 : vector<2x96xf32>
      %109 = arith.divf %107, %108 : vector<2x96xf32>
      %110 = vector.extract_strided_slice %103 {offsets = [0, 96], sizes = [2, 32], strides = [1, 1]} : vector<2x128xf32> to vector<2x32xf32>
      %111 = math.tanh %110 : vector<2x32xf32>
      %112 = vector.extract_strided_slice %109 {offsets = [0, 0], sizes = [2, 32], strides = [1, 1]} : vector<2x96xf32> to vector<2x32xf32>
      %113 = vector.extract_strided_slice %109 {offsets = [0, 32], sizes = [2, 32], strides = [1, 1]} : vector<2x96xf32> to vector<2x32xf32>
      %114 = vector.extract_strided_slice %109 {offsets = [0, 64], sizes = [2, 32], strides = [1, 1]} : vector<2x96xf32> to vector<2x32xf32>
      %115 = arith.mulf %113, %100 : vector<2x32xf32>
      %116 = arith.mulf %112, %111 : vector<2x32xf32>
      %117 = arith.addf %115, %116 : vector<2x32xf32>
      %118 = math.tanh %117 : vector<2x32xf32>
      %119 = arith.mulf %114, %118 : vector<2x32xf32>
      %c0_69 = arith.constant 0 : index
      %c0_70 = arith.constant 0 : index
      %120 = vector.load %arg8[%c0_69, %c0_70] : memref<2x32xf32, #tpu.memory_space<vmem>>, vector<2x32xf32>
      tpu.vector_store %arg8[%c0_69, %c0_70], %119 {strides = array<i32>} : memref<2x32xf32, #tpu.memory_space<vmem>>, vector<2x32xf32>,
      %c0_71 = arith.constant 0 : index
      %c0_72 = arith.constant 0 : index
      %121 = vector.load %arg9[%c0_71, %c0_72] : memref<2x32xf32, #tpu.memory_space<vmem>>, vector<2x32xf32>
      tpu.vector_store %arg9[%c0_71, %c0_72], %117 {strides = array<i32>} : memref<2x32xf32, #tpu.memory_space<vmem>>, vector<2x32xf32>,
      %c0_73 = arith.constant 0 : index
      %c3 = arith.constant 3 : index
      %c0_74 = arith.constant 0 : index
      %c0_75 = arith.constant 0 : index
      %122 = vector.load %arg7[%c0_73, %c3, %c0_74, %c0_75] : memref<1x8x2x32xf32, #tpu.memory_space<vmem>>, vector<1x1x2x32xf32>
      %123 = vector.shape_cast %122 : vector<1x1x2x32xf32> to vector<2x32xf32>
      %124 = vector.shape_cast %119 : vector<2x32xf32> to vector<1x1x2x32xf32>
      tpu.vector_store %arg7[%c0_73, %c3, %c0_74, %c0_75], %124 {strides = array<i32>} : memref<1x8x2x32xf32, #tpu.memory_space<vmem>>, vector<1x1x2x32xf32>,
      %c0_76 = arith.constant 0 : index
      %c0_77 = arith.constant 0 : index
      %125 = vector.load %arg8[%c0_76, %c0_77] : memref<2x32xf32, #tpu.memory_space<vmem>>, vector<2x32xf32>
      %c0_78 = arith.constant 0 : index
      %c0_79 = arith.constant 0 : index
      %126 = vector.load %arg9[%c0_78, %c0_79] : memref<2x32xf32, #tpu.memory_space<vmem>>, vector<2x32xf32>
      %c8 = arith.constant 8 : index
      %c0_80 = arith.constant 0 : index
      %127 = vector.load %arg10[%c8, %c0_80] : memref<16x128xf32, #tpu.memory_space<vmem>>, vector<2x128xf32>
      %cst_81 = arith.constant dense<0.000000e+00> : vector<2x128xf32>
      %128 = tpu.matmul %125, %14, %cst_81 {dimension_numbers = #tpu.dot_dimension_numbers<[1], [0], [0], [1], [0, 0, 1, 1], [], []>} : vector<2x32xf32>, vector<32x128xf32>, vector<2x128xf32> -> vector<2x128xf32>
      %129 = arith.addf %127, %128 : vector<2x128xf32>
      %130 = vector.extract_strided_slice %129 {offsets = [0, 0], sizes = [2, 96], strides = [1, 1]} : vector<2x128xf32> to vector<2x96xf32>
      %131 = arith.negf %130 : vector<2x96xf32>
      %132 = math.exp %131 : vector<2x96xf32>
      %cst_82 = arith.constant 1.000000e+00 : f32
      %133 = vector.broadcast %cst_82 : f32 to vector<2x96xf32>
      %134 = arith.addf %133, %132 : vector<2x96xf32>
      %135 = arith.divf %133, %134 : vector<2x96xf32>
      %136 = vector.extract_strided_slice %129 {offsets = [0, 96], sizes = [2, 32], strides = [1, 1]} : vector<2x128xf32> to vector<2x32xf32>
      %137 = math.tanh %136 : vector<2x32xf32>
      %138 = vector.extract_strided_slice %135 {offsets = [0, 0], sizes = [2, 32], strides = [1, 1]} : vector<2x96xf32> to vector<2x32xf32>
      %139 = vector.extract_strided_slice %135 {offsets = [0, 32], sizes = [2, 32], strides = [1, 1]} : vector<2x96xf32> to vector<2x32xf32>
      %140 = vector.extract_strided_slice %135 {offsets = [0, 64], sizes = [2, 32], strides = [1, 1]} : vector<2x96xf32> to vector<2x32xf32>
      %141 = arith.mulf %139, %126 : vector<2x32xf32>
      %142 = arith.mulf %138, %137 : vector<2x32xf32>
      %143 = arith.addf %141, %142 : vector<2x32xf32>
      %144 = math.tanh %143 : vector<2x32xf32>
      %145 = arith.mulf %140, %144 : vector<2x32xf32>
      %c0_83 = arith.constant 0 : index
      %c0_84 = arith.constant 0 : index
      %146 = vector.load %arg8[%c0_83, %c0_84] : memref<2x32xf32, #tpu.memory_space<vmem>>, vector<2x32xf32>
      tpu.vector_store %arg8[%c0_83, %c0_84], %145 {strides = array<i32>} : memref<2x32xf32, #tpu.memory_space<vmem>>, vector<2x32xf32>,
      %c0_85 = arith.constant 0 : index
      %c0_86 = arith.constant 0 : index
      %147 = vector.load %arg9[%c0_85, %c0_86] : memref<2x32xf32, #tpu.memory_space<vmem>>, vector<2x32xf32>
      tpu.vector_store %arg9[%c0_85, %c0_86], %143 {strides = array<i32>} : memref<2x32xf32, #tpu.memory_space<vmem>>, vector<2x32xf32>,
      %c0_87 = arith.constant 0 : index
      %c4_88 = arith.constant 4 : index
      %c0_89 = arith.constant 0 : index
      %c0_90 = arith.constant 0 : index
      %148 = vector.load %arg7[%c0_87, %c4_88, %c0_89, %c0_90] : memref<1x8x2x32xf32, #tpu.memory_space<vmem>>, vector<1x1x2x32xf32>
      %149 = vector.shape_cast %148 : vector<1x1x2x32xf32> to vector<2x32xf32>
      %150 = vector.shape_cast %145 : vector<2x32xf32> to vector<1x1x2x32xf32>
      tpu.vector_store %arg7[%c0_87, %c4_88, %c0_89, %c0_90], %150 {strides = array<i32>} : memref<1x8x2x32xf32, #tpu.memory_space<vmem>>, vector<1x1x2x32xf32>,
      %c0_91 = arith.constant 0 : index
      %c0_92 = arith.constant 0 : index
      %151 = vector.load %arg8[%c0_91, %c0_92] : memref<2x32xf32, #tpu.memory_space<vmem>>, vector<2x32xf32>
      %c0_93 = arith.constant 0 : index
      %c0_94 = arith.constant 0 : index
      %152 = vector.load %arg9[%c0_93, %c0_94] : memref<2x32xf32, #tpu.memory_space<vmem>>, vector<2x32xf32>
      %c10 = arith.constant 10 : index
      %c0_95 = arith.constant 0 : index
      %153 = vector.load %arg10[%c10, %c0_95] : memref<16x128xf32, #tpu.memory_space<vmem>>, vector<2x128xf32>
      %cst_96 = arith.constant dense<0.000000e+00> : vector<2x128xf32>
      %154 = tpu.matmul %151, %14, %cst_96 {dimension_numbers = #tpu.dot_dimension_numbers<[1], [0], [0], [1], [0, 0, 1, 1], [], []>} : vector<2x32xf32>, vector<32x128xf32>, vector<2x128xf32> -> vector<2x128xf32>
      %155 = arith.addf %153, %154 : vector<2x128xf32>
      %156 = vector.extract_strided_slice %155 {offsets = [0, 0], sizes = [2, 96], strides = [1, 1]} : vector<2x128xf32> to vector<2x96xf32>
      %157 = arith.negf %156 : vector<2x96xf32>
      %158 = math.exp %157 : vector<2x96xf32>
      %cst_97 = arith.constant 1.000000e+00 : f32
      %159 = vector.broadcast %cst_97 : f32 to vector<2x96xf32>
      %160 = arith.addf %159, %158 : vector<2x96xf32>
      %161 = arith.divf %159, %160 : vector<2x96xf32>
      %162 = vector.extract_strided_slice %155 {offsets = [0, 96], sizes = [2, 32], strides = [1, 1]} : vector<2x128xf32> to vector<2x32xf32>
      %163 = math.tanh %162 : vector<2x32xf32>
      %164 = vector.extract_strided_slice %161 {offsets = [0, 0], sizes = [2, 32], strides = [1, 1]} : vector<2x96xf32> to vector<2x32xf32>
      %165 = vector.extract_strided_slice %161 {offsets = [0, 32], sizes = [2, 32], strides = [1, 1]} : vector<2x96xf32> to vector<2x32xf32>
      %166 = vector.extract_strided_slice %161 {offsets = [0, 64], sizes = [2, 32], strides = [1, 1]} : vector<2x96xf32> to vector<2x32xf32>
      %167 = arith.mulf %165, %152 : vector<2x32xf32>
      %168 = arith.mulf %164, %163 : vector<2x32xf32>
      %169 = arith.addf %167, %168 : vector<2x32xf32>
      %170 = math.tanh %169 : vector<2x32xf32>
      %171 = arith.mulf %166, %170 : vector<2x32xf32>
      %c0_98 = arith.constant 0 : index
      %c0_99 = arith.constant 0 : index
      %172 = vector.load %arg8[%c0_98, %c0_99] : memref<2x32xf32, #tpu.memory_space<vmem>>, vector<2x32xf32>
      tpu.vector_store %arg8[%c0_98, %c0_99], %171 {strides = array<i32>} : memref<2x32xf32, #tpu.memory_space<vmem>>, vector<2x32xf32>,
      %c0_100 = arith.constant 0 : index
      %c0_101 = arith.constant 0 : index
      %173 = vector.load %arg9[%c0_100, %c0_101] : memref<2x32xf32, #tpu.memory_space<vmem>>, vector<2x32xf32>
      tpu.vector_store %arg9[%c0_100, %c0_101], %169 {strides = array<i32>} : memref<2x32xf32, #tpu.memory_space<vmem>>, vector<2x32xf32>,
      %c0_102 = arith.constant 0 : index
      %c5 = arith.constant 5 : index
      %c0_103 = arith.constant 0 : index
      %c0_104 = arith.constant 0 : index
      %174 = vector.load %arg7[%c0_102, %c5, %c0_103, %c0_104] : memref<1x8x2x32xf32, #tpu.memory_space<vmem>>, vector<1x1x2x32xf32>
      %175 = vector.shape_cast %174 : vector<1x1x2x32xf32> to vector<2x32xf32>
      %176 = vector.shape_cast %171 : vector<2x32xf32> to vector<1x1x2x32xf32>
      tpu.vector_store %arg7[%c0_102, %c5, %c0_103, %c0_104], %176 {strides = array<i32>} : memref<1x8x2x32xf32, #tpu.memory_space<vmem>>, vector<1x1x2x32xf32>,
      %c0_105 = arith.constant 0 : index
      %c0_106 = arith.constant 0 : index
      %177 = vector.load %arg8[%c0_105, %c0_106] : memref<2x32xf32, #tpu.memory_space<vmem>>, vector<2x32xf32>
      %c0_107 = arith.constant 0 : index
      %c0_108 = arith.constant 0 : index
      %178 = vector.load %arg9[%c0_107, %c0_108] : memref<2x32xf32, #tpu.memory_space<vmem>>, vector<2x32xf32>
      %c12 = arith.constant 12 : index
      %c0_109 = arith.constant 0 : index
      %179 = vector.load %arg10[%c12, %c0_109] : memref<16x128xf32, #tpu.memory_space<vmem>>, vector<2x128xf32>
      %cst_110 = arith.constant dense<0.000000e+00> : vector<2x128xf32>
      %180 = tpu.matmul %177, %14, %cst_110 {dimension_numbers = #tpu.dot_dimension_numbers<[1], [0], [0], [1], [0, 0, 1, 1], [], []>} : vector<2x32xf32>, vector<32x128xf32>, vector<2x128xf32> -> vector<2x128xf32>
      %181 = arith.addf %179, %180 : vector<2x128xf32>
      %182 = vector.extract_strided_slice %181 {offsets = [0, 0], sizes = [2, 96], strides = [1, 1]} : vector<2x128xf32> to vector<2x96xf32>
      %183 = arith.negf %182 : vector<2x96xf32>
      %184 = math.exp %183 : vector<2x96xf32>
      %cst_111 = arith.constant 1.000000e+00 : f32
      %185 = vector.broadcast %cst_111 : f32 to vector<2x96xf32>
      %186 = arith.addf %185, %184 : vector<2x96xf32>
      %187 = arith.divf %185, %186 : vector<2x96xf32>
      %188 = vector.extract_strided_slice %181 {offsets = [0, 96], sizes = [2, 32], strides = [1, 1]} : vector<2x128xf32> to vector<2x32xf32>
      %189 = math.tanh %188 : vector<2x32xf32>
      %190 = vector.extract_strided_slice %187 {offsets = [0, 0], sizes = [2, 32], strides = [1, 1]} : vector<2x96xf32> to vector<2x32xf32>
      %191 = vector.extract_strided_slice %187 {offsets = [0, 32], sizes = [2, 32], strides = [1, 1]} : vector<2x96xf32> to vector<2x32xf32>
      %192 = vector.extract_strided_slice %187 {offsets = [0, 64], sizes = [2, 32], strides = [1, 1]} : vector<2x96xf32> to vector<2x32xf32>
      %193 = arith.mulf %191, %178 : vector<2x32xf32>
      %194 = arith.mulf %190, %189 : vector<2x32xf32>
      %195 = arith.addf %193, %194 : vector<2x32xf32>
      %196 = math.tanh %195 : vector<2x32xf32>
      %197 = arith.mulf %192, %196 : vector<2x32xf32>
      %c0_112 = arith.constant 0 : index
      %c0_113 = arith.constant 0 : index
      %198 = vector.load %arg8[%c0_112, %c0_113] : memref<2x32xf32, #tpu.memory_space<vmem>>, vector<2x32xf32>
      tpu.vector_store %arg8[%c0_112, %c0_113], %197 {strides = array<i32>} : memref<2x32xf32, #tpu.memory_space<vmem>>, vector<2x32xf32>,
      %c0_114 = arith.constant 0 : index
      %c0_115 = arith.constant 0 : index
      %199 = vector.load %arg9[%c0_114, %c0_115] : memref<2x32xf32, #tpu.memory_space<vmem>>, vector<2x32xf32>
      tpu.vector_store %arg9[%c0_114, %c0_115], %195 {strides = array<i32>} : memref<2x32xf32, #tpu.memory_space<vmem>>, vector<2x32xf32>,
      %c0_116 = arith.constant 0 : index
      %c6_117 = arith.constant 6 : index
      %c0_118 = arith.constant 0 : index
      %c0_119 = arith.constant 0 : index
      %200 = vector.load %arg7[%c0_116, %c6_117, %c0_118, %c0_119] : memref<1x8x2x32xf32, #tpu.memory_space<vmem>>, vector<1x1x2x32xf32>
      %201 = vector.shape_cast %200 : vector<1x1x2x32xf32> to vector<2x32xf32>
      %202 = vector.shape_cast %197 : vector<2x32xf32> to vector<1x1x2x32xf32>
      tpu.vector_store %arg7[%c0_116, %c6_117, %c0_118, %c0_119], %202 {strides = array<i32>} : memref<1x8x2x32xf32, #tpu.memory_space<vmem>>, vector<1x1x2x32xf32>,
      %c0_120 = arith.constant 0 : index
      %c0_121 = arith.constant 0 : index
      %203 = vector.load %arg8[%c0_120, %c0_121] : memref<2x32xf32, #tpu.memory_space<vmem>>, vector<2x32xf32>
      %c0_122 = arith.constant 0 : index
      %c0_123 = arith.constant 0 : index
      %204 = vector.load %arg9[%c0_122, %c0_123] : memref<2x32xf32, #tpu.memory_space<vmem>>, vector<2x32xf32>
      %c14 = arith.constant 14 : index
      %c0_124 = arith.constant 0 : index
      %205 = vector.load %arg10[%c14, %c0_124] : memref<16x128xf32, #tpu.memory_space<vmem>>, vector<2x128xf32>
      %cst_125 = arith.constant dense<0.000000e+00> : vector<2x128xf32>
      %206 = tpu.matmul %203, %14, %cst_125 {dimension_numbers = #tpu.dot_dimension_numbers<[1], [0], [0], [1], [0, 0, 1, 1], [], []>} : vector<2x32xf32>, vector<32x128xf32>, vector<2x128xf32> -> vector<2x128xf32>
      %207 = arith.addf %205, %206 : vector<2x128xf32>
      %208 = vector.extract_strided_slice %207 {offsets = [0, 0], sizes = [2, 96], strides = [1, 1]} : vector<2x128xf32> to vector<2x96xf32>
      %209 = arith.negf %208 : vector<2x96xf32>
      %210 = math.exp %209 : vector<2x96xf32>
      %cst_126 = arith.constant 1.000000e+00 : f32
      %211 = vector.broadcast %cst_126 : f32 to vector<2x96xf32>
      %212 = arith.addf %211, %210 : vector<2x96xf32>
      %213 = arith.divf %211, %212 : vector<2x96xf32>
      %214 = vector.extract_strided_slice %207 {offsets = [0, 96], sizes = [2, 32], strides = [1, 1]} : vector<2x128xf32> to vector<2x32xf32>
      %215 = math.tanh %214 : vector<2x32xf32>
      %216 = vector.extract_strided_slice %213 {offsets = [0, 0], sizes = [2, 32], strides = [1, 1]} : vector<2x96xf32> to vector<2x32xf32>
      %217 = vector.extract_strided_slice %213 {offsets = [0, 32], sizes = [2, 32], strides = [1, 1]} : vector<2x96xf32> to vector<2x32xf32>
      %218 = vector.extract_strided_slice %213 {offsets = [0, 64], sizes = [2, 32], strides = [1, 1]} : vector<2x96xf32> to vector<2x32xf32>
      %219 = arith.mulf %217, %204 : vector<2x32xf32>
      %220 = arith.mulf %216, %215 : vector<2x32xf32>
      %221 = arith.addf %219, %220 : vector<2x32xf32>
      %222 = math.tanh %221 : vector<2x32xf32>
      %223 = arith.mulf %218, %222 : vector<2x32xf32>
      %c0_127 = arith.constant 0 : index
      %c0_128 = arith.constant 0 : index
      %224 = vector.load %arg8[%c0_127, %c0_128] : memref<2x32xf32, #tpu.memory_space<vmem>>, vector<2x32xf32>
      tpu.vector_store %arg8[%c0_127, %c0_128], %223 {strides = array<i32>} : memref<2x32xf32, #tpu.memory_space<vmem>>, vector<2x32xf32>,
      %c0_129 = arith.constant 0 : index
      %c0_130 = arith.constant 0 : index
      %225 = vector.load %arg9[%c0_129, %c0_130] : memref<2x32xf32, #tpu.memory_space<vmem>>, vector<2x32xf32>
      tpu.vector_store %arg9[%c0_129, %c0_130], %221 {strides = array<i32>} : memref<2x32xf32, #tpu.memory_space<vmem>>, vector<2x32xf32>,
      %c0_131 = arith.constant 0 : index
      %c7 = arith.constant 7 : index
      %c0_132 = arith.constant 0 : index
      %c0_133 = arith.constant 0 : index
      %226 = vector.load %arg7[%c0_131, %c7, %c0_132, %c0_133] : memref<1x8x2x32xf32, #tpu.memory_space<vmem>>, vector<1x1x2x32xf32>
      %227 = vector.shape_cast %226 : vector<1x1x2x32xf32> to vector<2x32xf32>
      %228 = vector.shape_cast %223 : vector<2x32xf32> to vector<1x1x2x32xf32>
      tpu.vector_store %arg7[%c0_131, %c7, %c0_132, %c0_133], %228 {strides = array<i32>} : memref<1x8x2x32xf32, #tpu.memory_space<vmem>>, vector<1x1x2x32xf32>,
    } else {
    }
    %c1_i32 = arith.constant 1 : i32
    %18 = arith.cmpi eq, %arg0, %c1_i32 : i32
    %19 = arith.extui %18 : i1 to i32
    %c0_i32_16 = arith.constant 0 : i32
    %20 = arith.cmpi ne, %19, %c0_i32_16 : i32
    scf.if %20 {
      %c0_17 = arith.constant 0 : index
      %c0_18 = arith.constant 0 : index
      %21 = vector.load %arg8[%c0_17, %c0_18] : memref<2x32xf32, #tpu.memory_space<vmem>>, vector<2x32xf32>
      %c0_19 = arith.constant 0 : index
      %c0_20 = arith.constant 0 : index
      %22 = vector.load %arg9[%c0_19, %c0_20] : memref<2x32xf32, #tpu.memory_space<vmem>>, vector<2x32xf32>
      %c14 = arith.constant 14 : index
      %c0_21 = arith.constant 0 : index
      %23 = vector.load %arg10[%c14, %c0_21] : memref<16x128xf32, #tpu.memory_space<vmem>>, vector<2x128xf32>
      %cst_22 = arith.constant dense<0.000000e+00> : vector<2x128xf32>
      %24 = tpu.matmul %21, %14, %cst_22 {dimension_numbers = #tpu.dot_dimension_numbers<[1], [0], [0], [1], [0, 0, 1, 1], [], []>} : vector<2x32xf32>, vector<32x128xf32>, vector<2x128xf32> -> vector<2x128xf32>
      %25 = arith.addf %23, %24 : vector<2x128xf32>
      %26 = vector.extract_strided_slice %25 {offsets = [0, 0], sizes = [2, 96], strides = [1, 1]} : vector<2x128xf32> to vector<2x96xf32>
      %27 = arith.negf %26 : vector<2x96xf32>
      %28 = math.exp %27 : vector<2x96xf32>
      %cst_23 = arith.constant 1.000000e+00 : f32
      %29 = vector.broadcast %cst_23 : f32 to vector<2x96xf32>
      %30 = arith.addf %29, %28 : vector<2x96xf32>
      %31 = arith.divf %29, %30 : vector<2x96xf32>
      %32 = vector.extract_strided_slice %25 {offsets = [0, 96], sizes = [2, 32], strides = [1, 1]} : vector<2x128xf32> to vector<2x32xf32>
      %33 = math.tanh %32 : vector<2x32xf32>
      %34 = vector.extract_strided_slice %31 {offsets = [0, 0], sizes = [2, 32], strides = [1, 1]} : vector<2x96xf32> to vector<2x32xf32>
      %35 = vector.extract_strided_slice %31 {offsets = [0, 32], sizes = [2, 32], strides = [1, 1]} : vector<2x96xf32> to vector<2x32xf32>
      %36 = vector.extract_strided_slice %31 {offsets = [0, 64], sizes = [2, 32], strides = [1, 1]} : vector<2x96xf32> to vector<2x32xf32>
      %37 = arith.mulf %35, %22 : vector<2x32xf32>
      %38 = arith.mulf %34, %33 : vector<2x32xf32>
      %39 = arith.addf %37, %38 : vector<2x32xf32>
      %40 = math.tanh %39 : vector<2x32xf32>
      %41 = arith.mulf %36, %40 : vector<2x32xf32>
      %c0_24 = arith.constant 0 : index
      %c0_25 = arith.constant 0 : index
      %42 = vector.load %arg8[%c0_24, %c0_25] : memref<2x32xf32, #tpu.memory_space<vmem>>, vector<2x32xf32>
      tpu.vector_store %arg8[%c0_24, %c0_25], %41 {strides = array<i32>} : memref<2x32xf32, #tpu.memory_space<vmem>>, vector<2x32xf32>,
      %c0_26 = arith.constant 0 : index
      %c0_27 = arith.constant 0 : index
      %43 = vector.load %arg9[%c0_26, %c0_27] : memref<2x32xf32, #tpu.memory_space<vmem>>, vector<2x32xf32>
      tpu.vector_store %arg9[%c0_26, %c0_27], %39 {strides = array<i32>} : memref<2x32xf32, #tpu.memory_space<vmem>>, vector<2x32xf32>,
      %c0_28 = arith.constant 0 : index
      %c7 = arith.constant 7 : index
      %c0_29 = arith.constant 0 : index
      %c0_30 = arith.constant 0 : index
      %44 = vector.load %arg7[%c0_28, %c7, %c0_29, %c0_30] : memref<1x8x2x32xf32, #tpu.memory_space<vmem>>, vector<1x1x2x32xf32>
      %45 = vector.shape_cast %44 : vector<1x1x2x32xf32> to vector<2x32xf32>
      %46 = vector.shape_cast %41 : vector<2x32xf32> to vector<1x1x2x32xf32>
      tpu.vector_store %arg7[%c0_28, %c7, %c0_29, %c0_30], %46 {strides = array<i32>} : memref<1x8x2x32xf32, #tpu.memory_space<vmem>>, vector<1x1x2x32xf32>,
      %c0_31 = arith.constant 0 : index
      %c0_32 = arith.constant 0 : index
      %47 = vector.load %arg8[%c0_31, %c0_32] : memref<2x32xf32, #tpu.memory_space<vmem>>, vector<2x32xf32>
      %c0_33 = arith.constant 0 : index
      %c0_34 = arith.constant 0 : index
      %48 = vector.load %arg9[%c0_33, %c0_34] : memref<2x32xf32, #tpu.memory_space<vmem>>, vector<2x32xf32>
      %c12 = arith.constant 12 : index
      %c0_35 = arith.constant 0 : index
      %49 = vector.load %arg10[%c12, %c0_35] : memref<16x128xf32, #tpu.memory_space<vmem>>, vector<2x128xf32>
      %cst_36 = arith.constant dense<0.000000e+00> : vector<2x128xf32>
      %50 = tpu.matmul %47, %14, %cst_36 {dimension_numbers = #tpu.dot_dimension_numbers<[1], [0], [0], [1], [0, 0, 1, 1], [], []>} : vector<2x32xf32>, vector<32x128xf32>, vector<2x128xf32> -> vector<2x128xf32>
      %51 = arith.addf %49, %50 : vector<2x128xf32>
      %52 = vector.extract_strided_slice %51 {offsets = [0, 0], sizes = [2, 96], strides = [1, 1]} : vector<2x128xf32> to vector<2x96xf32>
      %53 = arith.negf %52 : vector<2x96xf32>
      %54 = math.exp %53 : vector<2x96xf32>
      %cst_37 = arith.constant 1.000000e+00 : f32
      %55 = vector.broadcast %cst_37 : f32 to vector<2x96xf32>
      %56 = arith.addf %55, %54 : vector<2x96xf32>
      %57 = arith.divf %55, %56 : vector<2x96xf32>
      %58 = vector.extract_strided_slice %51 {offsets = [0, 96], sizes = [2, 32], strides = [1, 1]} : vector<2x128xf32> to vector<2x32xf32>
      %59 = math.tanh %58 : vector<2x32xf32>
      %60 = vector.extract_strided_slice %57 {offsets = [0, 0], sizes = [2, 32], strides = [1, 1]} : vector<2x96xf32> to vector<2x32xf32>
      %61 = vector.extract_strided_slice %57 {offsets = [0, 32], sizes = [2, 32], strides = [1, 1]} : vector<2x96xf32> to vector<2x32xf32>
      %62 = vector.extract_strided_slice %57 {offsets = [0, 64], sizes = [2, 32], strides = [1, 1]} : vector<2x96xf32> to vector<2x32xf32>
      %63 = arith.mulf %61, %48 : vector<2x32xf32>
      %64 = arith.mulf %60, %59 : vector<2x32xf32>
      %65 = arith.addf %63, %64 : vector<2x32xf32>
      %66 = math.tanh %65 : vector<2x32xf32>
      %67 = arith.mulf %62, %66 : vector<2x32xf32>
      %c0_38 = arith.constant 0 : index
      %c0_39 = arith.constant 0 : index
      %68 = vector.load %arg8[%c0_38, %c0_39] : memref<2x32xf32, #tpu.memory_space<vmem>>, vector<2x32xf32>
      tpu.vector_store %arg8[%c0_38, %c0_39], %67 {strides = array<i32>} : memref<2x32xf32, #tpu.memory_space<vmem>>, vector<2x32xf32>,
      %c0_40 = arith.constant 0 : index
      %c0_41 = arith.constant 0 : index
      %69 = vector.load %arg9[%c0_40, %c0_41] : memref<2x32xf32, #tpu.memory_space<vmem>>, vector<2x32xf32>
      tpu.vector_store %arg9[%c0_40, %c0_41], %65 {strides = array<i32>} : memref<2x32xf32, #tpu.memory_space<vmem>>, vector<2x32xf32>,
      %c0_42 = arith.constant 0 : index
      %c6 = arith.constant 6 : index
      %c0_43 = arith.constant 0 : index
      %c0_44 = arith.constant 0 : index
      %70 = vector.load %arg7[%c0_42, %c6, %c0_43, %c0_44] : memref<1x8x2x32xf32, #tpu.memory_space<vmem>>, vector<1x1x2x32xf32>
      %71 = vector.shape_cast %70 : vector<1x1x2x32xf32> to vector<2x32xf32>
      %72 = vector.shape_cast %67 : vector<2x32xf32> to vector<1x1x2x32xf32>
      tpu.vector_store %arg7[%c0_42, %c6, %c0_43, %c0_44], %72 {strides = array<i32>} : memref<1x8x2x32xf32, #tpu.memory_space<vmem>>, vector<1x1x2x32xf32>,
      %c0_45 = arith.constant 0 : index
      %c0_46 = arith.constant 0 : index
      %73 = vector.load %arg8[%c0_45, %c0_46] : memref<2x32xf32, #tpu.memory_space<vmem>>, vector<2x32xf32>
      %c0_47 = arith.constant 0 : index
      %c0_48 = arith.constant 0 : index
      %74 = vector.load %arg9[%c0_47, %c0_48] : memref<2x32xf32, #tpu.memory_space<vmem>>, vector<2x32xf32>
      %c10 = arith.constant 10 : index
      %c0_49 = arith.constant 0 : index
      %75 = vector.load %arg10[%c10, %c0_49] : memref<16x128xf32, #tpu.memory_space<vmem>>, vector<2x128xf32>
      %cst_50 = arith.constant dense<0.000000e+00> : vector<2x128xf32>
      %76 = tpu.matmul %73, %14, %cst_50 {dimension_numbers = #tpu.dot_dimension_numbers<[1], [0], [0], [1], [0, 0, 1, 1], [], []>} : vector<2x32xf32>, vector<32x128xf32>, vector<2x128xf32> -> vector<2x128xf32>
      %77 = arith.addf %75, %76 : vector<2x128xf32>
      %78 = vector.extract_strided_slice %77 {offsets = [0, 0], sizes = [2, 96], strides = [1, 1]} : vector<2x128xf32> to vector<2x96xf32>
      %79 = arith.negf %78 : vector<2x96xf32>
      %80 = math.exp %79 : vector<2x96xf32>
      %cst_51 = arith.constant 1.000000e+00 : f32
      %81 = vector.broadcast %cst_51 : f32 to vector<2x96xf32>
      %82 = arith.addf %81, %80 : vector<2x96xf32>
      %83 = arith.divf %81, %82 : vector<2x96xf32>
      %84 = vector.extract_strided_slice %77 {offsets = [0, 96], sizes = [2, 32], strides = [1, 1]} : vector<2x128xf32> to vector<2x32xf32>
      %85 = math.tanh %84 : vector<2x32xf32>
      %86 = vector.extract_strided_slice %83 {offsets = [0, 0], sizes = [2, 32], strides = [1, 1]} : vector<2x96xf32> to vector<2x32xf32>
      %87 = vector.extract_strided_slice %83 {offsets = [0, 32], sizes = [2, 32], strides = [1, 1]} : vector<2x96xf32> to vector<2x32xf32>
      %88 = vector.extract_strided_slice %83 {offsets = [0, 64], sizes = [2, 32], strides = [1, 1]} : vector<2x96xf32> to vector<2x32xf32>
      %89 = arith.mulf %87, %74 : vector<2x32xf32>
      %90 = arith.mulf %86, %85 : vector<2x32xf32>
      %91 = arith.addf %89, %90 : vector<2x32xf32>
      %92 = math.tanh %91 : vector<2x32xf32>
      %93 = arith.mulf %88, %92 : vector<2x32xf32>
      %c0_52 = arith.constant 0 : index
      %c0_53 = arith.constant 0 : index
      %94 = vector.load %arg8[%c0_52, %c0_53] : memref<2x32xf32, #tpu.memory_space<vmem>>, vector<2x32xf32>
      tpu.vector_store %arg8[%c0_52, %c0_53], %93 {strides = array<i32>} : memref<2x32xf32, #tpu.memory_space<vmem>>, vector<2x32xf32>,
      %c0_54 = arith.constant 0 : index
      %c0_55 = arith.constant 0 : index
      %95 = vector.load %arg9[%c0_54, %c0_55] : memref<2x32xf32, #tpu.memory_space<vmem>>, vector<2x32xf32>
      tpu.vector_store %arg9[%c0_54, %c0_55], %91 {strides = array<i32>} : memref<2x32xf32, #tpu.memory_space<vmem>>, vector<2x32xf32>,
      %c0_56 = arith.constant 0 : index
      %c5 = arith.constant 5 : index
      %c0_57 = arith.constant 0 : index
      %c0_58 = arith.constant 0 : index
      %96 = vector.load %arg7[%c0_56, %c5, %c0_57, %c0_58] : memref<1x8x2x32xf32, #tpu.memory_space<vmem>>, vector<1x1x2x32xf32>
      %97 = vector.shape_cast %96 : vector<1x1x2x32xf32> to vector<2x32xf32>
      %98 = vector.shape_cast %93 : vector<2x32xf32> to vector<1x1x2x32xf32>
      tpu.vector_store %arg7[%c0_56, %c5, %c0_57, %c0_58], %98 {strides = array<i32>} : memref<1x8x2x32xf32, #tpu.memory_space<vmem>>, vector<1x1x2x32xf32>,
      %c0_59 = arith.constant 0 : index
      %c0_60 = arith.constant 0 : index
      %99 = vector.load %arg8[%c0_59, %c0_60] : memref<2x32xf32, #tpu.memory_space<vmem>>, vector<2x32xf32>
      %c0_61 = arith.constant 0 : index
      %c0_62 = arith.constant 0 : index
      %100 = vector.load %arg9[%c0_61, %c0_62] : memref<2x32xf32, #tpu.memory_space<vmem>>, vector<2x32xf32>
      %c8 = arith.constant 8 : index
      %c0_63 = arith.constant 0 : index
      %101 = vector.load %arg10[%c8, %c0_63] : memref<16x128xf32, #tpu.memory_space<vmem>>, vector<2x128xf32>
      %cst_64 = arith.constant dense<0.000000e+00> : vector<2x128xf32>
      %102 = tpu.matmul %99, %14, %cst_64 {dimension_numbers = #tpu.dot_dimension_numbers<[1], [0], [0], [1], [0, 0, 1, 1], [], []>} : vector<2x32xf32>, vector<32x128xf32>, vector<2x128xf32> -> vector<2x128xf32>
      %103 = arith.addf %101, %102 : vector<2x128xf32>
      %104 = vector.extract_strided_slice %103 {offsets = [0, 0], sizes = [2, 96], strides = [1, 1]} : vector<2x128xf32> to vector<2x96xf32>
      %105 = arith.negf %104 : vector<2x96xf32>
      %106 = math.exp %105 : vector<2x96xf32>
      %cst_65 = arith.constant 1.000000e+00 : f32
      %107 = vector.broadcast %cst_65 : f32 to vector<2x96xf32>
      %108 = arith.addf %107, %106 : vector<2x96xf32>
      %109 = arith.divf %107, %108 : vector<2x96xf32>
      %110 = vector.extract_strided_slice %103 {offsets = [0, 96], sizes = [2, 32], strides = [1, 1]} : vector<2x128xf32> to vector<2x32xf32>
      %111 = math.tanh %110 : vector<2x32xf32>
      %112 = vector.extract_strided_slice %109 {offsets = [0, 0], sizes = [2, 32], strides = [1, 1]} : vector<2x96xf32> to vector<2x32xf32>
      %113 = vector.extract_strided_slice %109 {offsets = [0, 32], sizes = [2, 32], strides = [1, 1]} : vector<2x96xf32> to vector<2x32xf32>
      %114 = vector.extract_strided_slice %109 {offsets = [0, 64], sizes = [2, 32], strides = [1, 1]} : vector<2x96xf32> to vector<2x32xf32>
      %115 = arith.mulf %113, %100 : vector<2x32xf32>
      %116 = arith.mulf %112, %111 : vector<2x32xf32>
      %117 = arith.addf %115, %116 : vector<2x32xf32>
      %118 = math.tanh %117 : vector<2x32xf32>
      %119 = arith.mulf %114, %118 : vector<2x32xf32>
      %c0_66 = arith.constant 0 : index
      %c0_67 = arith.constant 0 : index
      %120 = vector.load %arg8[%c0_66, %c0_67] : memref<2x32xf32, #tpu.memory_space<vmem>>, vector<2x32xf32>
      tpu.vector_store %arg8[%c0_66, %c0_67], %119 {strides = array<i32>} : memref<2x32xf32, #tpu.memory_space<vmem>>, vector<2x32xf32>,
      %c0_68 = arith.constant 0 : index
      %c0_69 = arith.constant 0 : index
      %121 = vector.load %arg9[%c0_68, %c0_69] : memref<2x32xf32, #tpu.memory_space<vmem>>, vector<2x32xf32>
      tpu.vector_store %arg9[%c0_68, %c0_69], %117 {strides = array<i32>} : memref<2x32xf32, #tpu.memory_space<vmem>>, vector<2x32xf32>,
      %c0_70 = arith.constant 0 : index
      %c4 = arith.constant 4 : index
      %c0_71 = arith.constant 0 : index
      %c0_72 = arith.constant 0 : index
      %122 = vector.load %arg7[%c0_70, %c4, %c0_71, %c0_72] : memref<1x8x2x32xf32, #tpu.memory_space<vmem>>, vector<1x1x2x32xf32>
      %123 = vector.shape_cast %122 : vector<1x1x2x32xf32> to vector<2x32xf32>
      %124 = vector.shape_cast %119 : vector<2x32xf32> to vector<1x1x2x32xf32>
      tpu.vector_store %arg7[%c0_70, %c4, %c0_71, %c0_72], %124 {strides = array<i32>} : memref<1x8x2x32xf32, #tpu.memory_space<vmem>>, vector<1x1x2x32xf32>,
      %c0_73 = arith.constant 0 : index
      %c0_74 = arith.constant 0 : index
      %125 = vector.load %arg8[%c0_73, %c0_74] : memref<2x32xf32, #tpu.memory_space<vmem>>, vector<2x32xf32>
      %c0_75 = arith.constant 0 : index
      %c0_76 = arith.constant 0 : index
      %126 = vector.load %arg9[%c0_75, %c0_76] : memref<2x32xf32, #tpu.memory_space<vmem>>, vector<2x32xf32>
      %c6_77 = arith.constant 6 : index
      %c0_78 = arith.constant 0 : index
      %127 = vector.load %arg10[%c6_77, %c0_78] : memref<16x128xf32, #tpu.memory_space<vmem>>, vector<2x128xf32>
      %cst_79 = arith.constant dense<0.000000e+00> : vector<2x128xf32>
      %128 = tpu.matmul %125, %14, %cst_79 {dimension_numbers = #tpu.dot_dimension_numbers<[1], [0], [0], [1], [0, 0, 1, 1], [], []>} : vector<2x32xf32>, vector<32x128xf32>, vector<2x128xf32> -> vector<2x128xf32>
      %129 = arith.addf %127, %128 : vector<2x128xf32>
      %130 = vector.extract_strided_slice %129 {offsets = [0, 0], sizes = [2, 96], strides = [1, 1]} : vector<2x128xf32> to vector<2x96xf32>
      %131 = arith.negf %130 : vector<2x96xf32>
      %132 = math.exp %131 : vector<2x96xf32>
      %cst_80 = arith.constant 1.000000e+00 : f32
      %133 = vector.broadcast %cst_80 : f32 to vector<2x96xf32>
      %134 = arith.addf %133, %132 : vector<2x96xf32>
      %135 = arith.divf %133, %134 : vector<2x96xf32>
      %136 = vector.extract_strided_slice %129 {offsets = [0, 96], sizes = [2, 32], strides = [1, 1]} : vector<2x128xf32> to vector<2x32xf32>
      %137 = math.tanh %136 : vector<2x32xf32>
      %138 = vector.extract_strided_slice %135 {offsets = [0, 0], sizes = [2, 32], strides = [1, 1]} : vector<2x96xf32> to vector<2x32xf32>
      %139 = vector.extract_strided_slice %135 {offsets = [0, 32], sizes = [2, 32], strides = [1, 1]} : vector<2x96xf32> to vector<2x32xf32>
      %140 = vector.extract_strided_slice %135 {offsets = [0, 64], sizes = [2, 32], strides = [1, 1]} : vector<2x96xf32> to vector<2x32xf32>
      %141 = arith.mulf %139, %126 : vector<2x32xf32>
      %142 = arith.mulf %138, %137 : vector<2x32xf32>
      %143 = arith.addf %141, %142 : vector<2x32xf32>
      %144 = math.tanh %143 : vector<2x32xf32>
      %145 = arith.mulf %140, %144 : vector<2x32xf32>
      %c0_81 = arith.constant 0 : index
      %c0_82 = arith.constant 0 : index
      %146 = vector.load %arg8[%c0_81, %c0_82] : memref<2x32xf32, #tpu.memory_space<vmem>>, vector<2x32xf32>
      tpu.vector_store %arg8[%c0_81, %c0_82], %145 {strides = array<i32>} : memref<2x32xf32, #tpu.memory_space<vmem>>, vector<2x32xf32>,
      %c0_83 = arith.constant 0 : index
      %c0_84 = arith.constant 0 : index
      %147 = vector.load %arg9[%c0_83, %c0_84] : memref<2x32xf32, #tpu.memory_space<vmem>>, vector<2x32xf32>
      tpu.vector_store %arg9[%c0_83, %c0_84], %143 {strides = array<i32>} : memref<2x32xf32, #tpu.memory_space<vmem>>, vector<2x32xf32>,
      %c0_85 = arith.constant 0 : index
      %c3 = arith.constant 3 : index
      %c0_86 = arith.constant 0 : index
      %c0_87 = arith.constant 0 : index
      %148 = vector.load %arg7[%c0_85, %c3, %c0_86, %c0_87] : memref<1x8x2x32xf32, #tpu.memory_space<vmem>>, vector<1x1x2x32xf32>
      %149 = vector.shape_cast %148 : vector<1x1x2x32xf32> to vector<2x32xf32>
      %150 = vector.shape_cast %145 : vector<2x32xf32> to vector<1x1x2x32xf32>
      tpu.vector_store %arg7[%c0_85, %c3, %c0_86, %c0_87], %150 {strides = array<i32>} : memref<1x8x2x32xf32, #tpu.memory_space<vmem>>, vector<1x1x2x32xf32>,
      %c0_88 = arith.constant 0 : index
      %c0_89 = arith.constant 0 : index
      %151 = vector.load %arg8[%c0_88, %c0_89] : memref<2x32xf32, #tpu.memory_space<vmem>>, vector<2x32xf32>
      %c0_90 = arith.constant 0 : index
      %c0_91 = arith.constant 0 : index
      %152 = vector.load %arg9[%c0_90, %c0_91] : memref<2x32xf32, #tpu.memory_space<vmem>>, vector<2x32xf32>
      %c4_92 = arith.constant 4 : index
      %c0_93 = arith.constant 0 : index
      %153 = vector.load %arg10[%c4_92, %c0_93] : memref<16x128xf32, #tpu.memory_space<vmem>>, vector<2x128xf32>
      %cst_94 = arith.constant dense<0.000000e+00> : vector<2x128xf32>
      %154 = tpu.matmul %151, %14, %cst_94 {dimension_numbers = #tpu.dot_dimension_numbers<[1], [0], [0], [1], [0, 0, 1, 1], [], []>} : vector<2x32xf32>, vector<32x128xf32>, vector<2x128xf32> -> vector<2x128xf32>
      %155 = arith.addf %153, %154 : vector<2x128xf32>
      %156 = vector.extract_strided_slice %155 {offsets = [0, 0], sizes = [2, 96], strides = [1, 1]} : vector<2x128xf32> to vector<2x96xf32>
      %157 = arith.negf %156 : vector<2x96xf32>
      %158 = math.exp %157 : vector<2x96xf32>
      %cst_95 = arith.constant 1.000000e+00 : f32
      %159 = vector.broadcast %cst_95 : f32 to vector<2x96xf32>
      %160 = arith.addf %159, %158 : vector<2x96xf32>
      %161 = arith.divf %159, %160 : vector<2x96xf32>
      %162 = vector.extract_strided_slice %155 {offsets = [0, 96], sizes = [2, 32], strides = [1, 1]} : vector<2x128xf32> to vector<2x32xf32>
      %163 = math.tanh %162 : vector<2x32xf32>
      %164 = vector.extract_strided_slice %161 {offsets = [0, 0], sizes = [2, 32], strides = [1, 1]} : vector<2x96xf32> to vector<2x32xf32>
      %165 = vector.extract_strided_slice %161 {offsets = [0, 32], sizes = [2, 32], strides = [1, 1]} : vector<2x96xf32> to vector<2x32xf32>
      %166 = vector.extract_strided_slice %161 {offsets = [0, 64], sizes = [2, 32], strides = [1, 1]} : vector<2x96xf32> to vector<2x32xf32>
      %167 = arith.mulf %165, %152 : vector<2x32xf32>
      %168 = arith.mulf %164, %163 : vector<2x32xf32>
      %169 = arith.addf %167, %168 : vector<2x32xf32>
      %170 = math.tanh %169 : vector<2x32xf32>
      %171 = arith.mulf %166, %170 : vector<2x32xf32>
      %c0_96 = arith.constant 0 : index
      %c0_97 = arith.constant 0 : index
      %172 = vector.load %arg8[%c0_96, %c0_97] : memref<2x32xf32, #tpu.memory_space<vmem>>, vector<2x32xf32>
      tpu.vector_store %arg8[%c0_96, %c0_97], %171 {strides = array<i32>} : memref<2x32xf32, #tpu.memory_space<vmem>>, vector<2x32xf32>,
      %c0_98 = arith.constant 0 : index
      %c0_99 = arith.constant 0 : index
      %173 = vector.load %arg9[%c0_98, %c0_99] : memref<2x32xf32, #tpu.memory_space<vmem>>, vector<2x32xf32>
      tpu.vector_store %arg9[%c0_98, %c0_99], %169 {strides = array<i32>} : memref<2x32xf32, #tpu.memory_space<vmem>>, vector<2x32xf32>,
      %c0_100 = arith.constant 0 : index
      %c2 = arith.constant 2 : index
      %c0_101 = arith.constant 0 : index
      %c0_102 = arith.constant 0 : index
      %174 = vector.load %arg7[%c0_100, %c2, %c0_101, %c0_102] : memref<1x8x2x32xf32, #tpu.memory_space<vmem>>, vector<1x1x2x32xf32>
      %175 = vector.shape_cast %174 : vector<1x1x2x32xf32> to vector<2x32xf32>
      %176 = vector.shape_cast %171 : vector<2x32xf32> to vector<1x1x2x32xf32>
      tpu.vector_store %arg7[%c0_100, %c2, %c0_101, %c0_102], %176 {strides = array<i32>} : memref<1x8x2x32xf32, #tpu.memory_space<vmem>>, vector<1x1x2x32xf32>,
      %c0_103 = arith.constant 0 : index
      %c0_104 = arith.constant 0 : index
      %177 = vector.load %arg8[%c0_103, %c0_104] : memref<2x32xf32, #tpu.memory_space<vmem>>, vector<2x32xf32>
      %c0_105 = arith.constant 0 : index
      %c0_106 = arith.constant 0 : index
      %178 = vector.load %arg9[%c0_105, %c0_106] : memref<2x32xf32, #tpu.memory_space<vmem>>, vector<2x32xf32>
      %c2_107 = arith.constant 2 : index
      %c0_108 = arith.constant 0 : index
      %179 = vector.load %arg10[%c2_107, %c0_108] : memref<16x128xf32, #tpu.memory_space<vmem>>, vector<2x128xf32>
      %cst_109 = arith.constant dense<0.000000e+00> : vector<2x128xf32>
      %180 = tpu.matmul %177, %14, %cst_109 {dimension_numbers = #tpu.dot_dimension_numbers<[1], [0], [0], [1], [0, 0, 1, 1], [], []>} : vector<2x32xf32>, vector<32x128xf32>, vector<2x128xf32> -> vector<2x128xf32>
      %181 = arith.addf %179, %180 : vector<2x128xf32>
      %182 = vector.extract_strided_slice %181 {offsets = [0, 0], sizes = [2, 96], strides = [1, 1]} : vector<2x128xf32> to vector<2x96xf32>
      %183 = arith.negf %182 : vector<2x96xf32>
      %184 = math.exp %183 : vector<2x96xf32>
      %cst_110 = arith.constant 1.000000e+00 : f32
      %185 = vector.broadcast %cst_110 : f32 to vector<2x96xf32>
      %186 = arith.addf %185, %184 : vector<2x96xf32>
      %187 = arith.divf %185, %186 : vector<2x96xf32>
      %188 = vector.extract_strided_slice %181 {offsets = [0, 96], sizes = [2, 32], strides = [1, 1]} : vector<2x128xf32> to vector<2x32xf32>
      %189 = math.tanh %188 : vector<2x32xf32>
      %190 = vector.extract_strided_slice %187 {offsets = [0, 0], sizes = [2, 32], strides = [1, 1]} : vector<2x96xf32> to vector<2x32xf32>
      %191 = vector.extract_strided_slice %187 {offsets = [0, 32], sizes = [2, 32], strides = [1, 1]} : vector<2x96xf32> to vector<2x32xf32>
      %192 = vector.extract_strided_slice %187 {offsets = [0, 64], sizes = [2, 32], strides = [1, 1]} : vector<2x96xf32> to vector<2x32xf32>
      %193 = arith.mulf %191, %178 : vector<2x32xf32>
      %194 = arith.mulf %190, %189 : vector<2x32xf32>
      %195 = arith.addf %193, %194 : vector<2x32xf32>
      %196 = math.tanh %195 : vector<2x32xf32>
      %197 = arith.mulf %192, %196 : vector<2x32xf32>
      %c0_111 = arith.constant 0 : index
      %c0_112 = arith.constant 0 : index
      %198 = vector.load %arg8[%c0_111, %c0_112] : memref<2x32xf32, #tpu.memory_space<vmem>>, vector<2x32xf32>
      tpu.vector_store %arg8[%c0_111, %c0_112], %197 {strides = array<i32>} : memref<2x32xf32, #tpu.memory_space<vmem>>, vector<2x32xf32>,
      %c0_113 = arith.constant 0 : index
      %c0_114 = arith.constant 0 : index
      %199 = vector.load %arg9[%c0_113, %c0_114] : memref<2x32xf32, #tpu.memory_space<vmem>>, vector<2x32xf32>
      tpu.vector_store %arg9[%c0_113, %c0_114], %195 {strides = array<i32>} : memref<2x32xf32, #tpu.memory_space<vmem>>, vector<2x32xf32>,
      %c0_115 = arith.constant 0 : index
      %c1 = arith.constant 1 : index
      %c0_116 = arith.constant 0 : index
      %c0_117 = arith.constant 0 : index
      %200 = vector.load %arg7[%c0_115, %c1, %c0_116, %c0_117] : memref<1x8x2x32xf32, #tpu.memory_space<vmem>>, vector<1x1x2x32xf32>
      %201 = vector.shape_cast %200 : vector<1x1x2x32xf32> to vector<2x32xf32>
      %202 = vector.shape_cast %197 : vector<2x32xf32> to vector<1x1x2x32xf32>
      tpu.vector_store %arg7[%c0_115, %c1, %c0_116, %c0_117], %202 {strides = array<i32>} : memref<1x8x2x32xf32, #tpu.memory_space<vmem>>, vector<1x1x2x32xf32>,
      %c0_118 = arith.constant 0 : index
      %c0_119 = arith.constant 0 : index
      %203 = vector.load %arg8[%c0_118, %c0_119] : memref<2x32xf32, #tpu.memory_space<vmem>>, vector<2x32xf32>
      %c0_120 = arith.constant 0 : index
      %c0_121 = arith.constant 0 : index
      %204 = vector.load %arg9[%c0_120, %c0_121] : memref<2x32xf32, #tpu.memory_space<vmem>>, vector<2x32xf32>
      %c0_122 = arith.constant 0 : index
      %c0_123 = arith.constant 0 : index
      %205 = vector.load %arg10[%c0_122, %c0_123] : memref<16x128xf32, #tpu.memory_space<vmem>>, vector<2x128xf32>
      %cst_124 = arith.constant dense<0.000000e+00> : vector<2x128xf32>
      %206 = tpu.matmul %203, %14, %cst_124 {dimension_numbers = #tpu.dot_dimension_numbers<[1], [0], [0], [1], [0, 0, 1, 1], [], []>} : vector<2x32xf32>, vector<32x128xf32>, vector<2x128xf32> -> vector<2x128xf32>
      %207 = arith.addf %205, %206 : vector<2x128xf32>
      %208 = vector.extract_strided_slice %207 {offsets = [0, 0], sizes = [2, 96], strides = [1, 1]} : vector<2x128xf32> to vector<2x96xf32>
      %209 = arith.negf %208 : vector<2x96xf32>
      %210 = math.exp %209 : vector<2x96xf32>
      %cst_125 = arith.constant 1.000000e+00 : f32
      %211 = vector.broadcast %cst_125 : f32 to vector<2x96xf32>
      %212 = arith.addf %211, %210 : vector<2x96xf32>
      %213 = arith.divf %211, %212 : vector<2x96xf32>
      %214 = vector.extract_strided_slice %207 {offsets = [0, 96], sizes = [2, 32], strides = [1, 1]} : vector<2x128xf32> to vector<2x32xf32>
      %215 = math.tanh %214 : vector<2x32xf32>
      %216 = vector.extract_strided_slice %213 {offsets = [0, 0], sizes = [2, 32], strides = [1, 1]} : vector<2x96xf32> to vector<2x32xf32>
      %217 = vector.extract_strided_slice %213 {offsets = [0, 32], sizes = [2, 32], strides = [1, 1]} : vector<2x96xf32> to vector<2x32xf32>
      %218 = vector.extract_strided_slice %213 {offsets = [0, 64], sizes = [2, 32], strides = [1, 1]} : vector<2x96xf32> to vector<2x32xf32>
      %219 = arith.mulf %217, %204 : vector<2x32xf32>
      %220 = arith.mulf %216, %215 : vector<2x32xf32>
      %221 = arith.addf %219, %220 : vector<2x32xf32>
      %222 = math.tanh %221 : vector<2x32xf32>
      %223 = arith.mulf %218, %222 : vector<2x32xf32>
      %c0_126 = arith.constant 0 : index
      %c0_127 = arith.constant 0 : index
      %224 = vector.load %arg8[%c0_126, %c0_127] : memref<2x32xf32, #tpu.memory_space<vmem>>, vector<2x32xf32>
      tpu.vector_store %arg8[%c0_126, %c0_127], %223 {strides = array<i32>} : memref<2x32xf32, #tpu.memory_space<vmem>>, vector<2x32xf32>,
      %c0_128 = arith.constant 0 : index
      %c0_129 = arith.constant 0 : index
      %225 = vector.load %arg9[%c0_128, %c0_129] : memref<2x32xf32, #tpu.memory_space<vmem>>, vector<2x32xf32>
      tpu.vector_store %arg9[%c0_128, %c0_129], %221 {strides = array<i32>} : memref<2x32xf32, #tpu.memory_space<vmem>>, vector<2x32xf32>,
      %c0_130 = arith.constant 0 : index
      %c0_131 = arith.constant 0 : index
      %c0_132 = arith.constant 0 : index
      %c0_133 = arith.constant 0 : index
      %226 = vector.load %arg7[%c0_130, %c0_131, %c0_132, %c0_133] : memref<1x8x2x32xf32, #tpu.memory_space<vmem>>, vector<1x1x2x32xf32>
      %227 = vector.shape_cast %226 : vector<1x1x2x32xf32> to vector<2x32xf32>
      %228 = vector.shape_cast %223 : vector<2x32xf32> to vector<1x1x2x32xf32>
      tpu.vector_store %arg7[%c0_130, %c0_131, %c0_132, %c0_133], %228 {strides = array<i32>} : memref<1x8x2x32xf32, #tpu.memory_space<vmem>>, vector<1x1x2x32xf32>,
    } else {
    }
    return
  }
  func.func @transform_0(%arg0: i32, %arg1: i32, %arg2: i32) -> (i32, i32, i32) {
    %c2_i32 = arith.constant 2 : i32
    %0 = arith.muli %c2_i32, %arg2 : i32
    %c0_i32 = arith.constant 0 : i32
    %1 = arith.subi %c0_i32, %0 : i32
    %2 = arith.muli %arg0, %1 : i32
    %3 = arith.addi %arg2, %2 : i32
    %c0_i32_0 = arith.constant 0 : i32
    %c0_i32_1 = arith.constant 0 : i32
    return %arg1, %3, %c0_i32_0 : i32, i32, i32
  }
  func.func @transform_1(%arg0: i32, %arg1: i32, %arg2: i32) -> (i32, i32, i32) {
    %c0_i32 = arith.constant 0 : i32
    %c0_i32_0 = arith.constant 0 : i32
    %c0_i32_1 = arith.constant 0 : i32
    return %arg0, %c0_i32, %c0_i32_0 : i32, i32, i32
  }
  func.func @transform_2(%arg0: i32, %arg1: i32, %arg2: i32) -> (i32, i32, i32) {
    %c0_i32 = arith.constant 0 : i32
    %c0_i32_0 = arith.constant 0 : i32
    %c0_i32_1 = arith.constant 0 : i32
    return %arg0, %c0_i32, %c0_i32_0 : i32, i32, i32
  }
  func.func @transform_3(%arg0: i32, %arg1: i32, %arg2: i32) -> (i32, i32, i32) {
    %c0_i32 = arith.constant 0 : i32
    %c0_i32_0 = arith.constant 0 : i32
    %c0_i32_1 = arith.constant 0 : i32
    return %arg0, %c0_i32, %c0_i32_0 : i32, i32, i32
  }
  func.func @transform_4(%arg0: i32, %arg1: i32, %arg2: i32) -> (i32, i32, i32, i32) {
    %c2_i32 = arith.constant 2 : i32
    %0 = arith.muli %c2_i32, %arg2 : i32
    %c0_i32 = arith.constant 0 : i32
    %1 = arith.subi %c0_i32, %0 : i32
    %2 = arith.muli %arg0, %1 : i32
    %3 = arith.addi %arg2, %2 : i32
    %c0_i32_0 = arith.constant 0 : i32
    %c0_i32_1 = arith.constant 0 : i32
    return %arg0, %3, %arg1, %c0_i32_0 : i32, i32, i32, i32
  }
}

module attributes {stable_mosaic.version = 11 : i64} {
  func.func @_fused_lstm_kernel(%arg0: i32, %arg1: i32, %arg2: i32, %arg3: memref<1x16x16xf32, #tpu.memory_space<vmem>>, %arg4: memref<1x16x128xf32, #tpu.memory_space<vmem>>, %arg5: memref<1x32x128xf32, #tpu.memory_space<vmem>>, %arg6: memref<1x1x128xf32, #tpu.memory_space<vmem>>, %arg7: memref<1x8x2x32xf32, #tpu.memory_space<vmem>>, %arg8: memref<2x32xf32, #tpu.memory_space<vmem>>, %arg9: memref<2x32xf32, #tpu.memory_space<vmem>>, %arg10: memref<16x128xf32, #tpu.memory_space<vmem>>) attributes {dimension_semantics = [#tpu.dimension_semantics<parallel>, #tpu.dimension_semantics<parallel>, #tpu.dimension_semantics<arbitrary>], iteration_bounds = array<i64: 2, 1, 1>, scalar_prefetch = 0 : i64, scratch_operands = 3 : i64, tpu.core_type = #tpu.core_type<tc>, window_params = [{transform_indices = @transform_0, window_bounds = array<i64: 1, 16, 16>}, {transform_indices = @transform_1, window_bounds = array<i64: 1, 16, 128>}, {transform_indices = @transform_2, window_bounds = array<i64: 1, 32, 128>}, {transform_indices = @transform_3, window_bounds = array<i64: 1, 1, 128>}, {transform_indices = @transform_4, window_bounds = array<i64: 1, 8, 2, 32>}]} {
    %c0_i32 = arith.constant 0 : i32
    %0 = arith.cmpi eq, %arg2, %c0_i32 : i32
    %1 = arith.extui %0 : i1 to i32
    %c0_i32_0 = arith.constant 0 : i32
    %2 = arith.cmpi ne, %1, %c0_i32_0 : i32
    scf.if %2 {
      %cst_17 = arith.constant 0.000000e+00 : f32
      %21 = vector.broadcast %cst_17 : f32 to vector<2x32xf32>
      %c0_18 = arith.constant 0 : index
      %c0_19 = arith.constant 0 : index
      %22 = vector.load %arg8[%c0_18, %c0_19] : memref<2x32xf32, #tpu.memory_space<vmem>>, vector<2x32xf32>
      tpu.vector_store %arg8[%c0_18, %c0_19], %21 {strides = array<i32>} : memref<2x32xf32, #tpu.memory_space<vmem>>, vector<2x32xf32>,
      %cst_20 = arith.constant 0.000000e+00 : f32
      %23 = vector.broadcast %cst_20 : f32 to vector<2x32xf32>
      %c0_21 = arith.constant 0 : index
      %c0_22 = arith.constant 0 : index
      %24 = vector.load %arg9[%c0_21, %c0_22] : memref<2x32xf32, #tpu.memory_space<vmem>>, vector<2x32xf32>
      tpu.vector_store %arg9[%c0_21, %c0_22], %23 {strides = array<i32>} : memref<2x32xf32, #tpu.memory_space<vmem>>, vector<2x32xf32>,
    } else {
    }
    %c0 = arith.constant 0 : index
    %c0_1 = arith.constant 0 : index
    %c0_2 = arith.constant 0 : index
    %3 = vector.load %arg3[%c0, %c0_1, %c0_2] : memref<1x16x16xf32, #tpu.memory_space<vmem>>, vector<1x16x16xf32>
    %4 = vector.shape_cast %3 : vector<1x16x16xf32> to vector<16x16xf32>
    %c0_3 = arith.constant 0 : index
    %c0_4 = arith.constant 0 : index
    %c0_5 = arith.constant 0 : index
    %5 = vector.load %arg4[%c0_3, %c0_4, %c0_5] : memref<1x16x128xf32, #tpu.memory_space<vmem>>, vector<1x16x128xf32>
    %6 = vector.shape_cast %5 : vector<1x16x128xf32> to vector<16x128xf32>
    %cst = arith.constant dense<0.000000e+00> : vector<16x128xf32>
    %7 = tpu.matmul %4, %6, %cst {dimension_numbers = #tpu.dot_dimension_numbers<[1], [0], [0], [1], [0, 0, 1, 1], [], []>} : vector<16x16xf32>, vector<16x128xf32>, vector<16x128xf32> -> vector<16x128xf32>
    %c0_6 = arith.constant 0 : index
    %c0_7 = arith.constant 0 : index
    %c0_8 = arith.constant 0 : index
    %8 = vector.load %arg6[%c0_6, %c0_7, %c0_8] : memref<1x1x128xf32, #tpu.memory_space<vmem>>, vector<1x1x128xf32>
    %9 = vector.shape_cast %8 : vector<1x1x128xf32> to vector<1x128xf32>
    %10 = vector.broadcast %9 : vector<1x128xf32> to vector<16x128xf32>
    %11 = arith.addf %7, %10 : vector<16x128xf32>
    %c0_9 = arith.constant 0 : index
    %c0_10 = arith.constant 0 : index
    %12 = vector.load %arg10[%c0_9, %c0_10] : memref<16x128xf32, #tpu.memory_space<vmem>>, vector<16x128xf32>
    tpu.vector_store %arg10[%c0_9, %c0_10], %11 {strides = array<i32>} : memref<16x128xf32, #tpu.memory_space<vmem>>, vector<16x128xf32>,
    %c0_11 = arith.constant 0 : index
    %c0_12 = arith.constant 0 : index
    %c0_13 = arith.constant 0 : index
    %13 = vector.load %arg5[%c0_11, %c0_12, %c0_13] : memref<1x32x128xf32, #tpu.memory_space<vmem>>, vector<1x32x128xf32>
    %14 = vector.shape_cast %13 : vector<1x32x128xf32> to vector<32x128xf32>
    %c0_i32_14 = arith.constant 0 : i32
    %15 = arith.cmpi eq, %arg0, %c0_i32_14 : i32
    %16 = arith.extui %15 : i1 to i32
    %c0_i32_15 = arith.constant 0 : i32
    %17 = arith.cmpi ne, %16, %c0_i32_15 : i32
    scf.if %17 {
      %c0_17 = arith.constant 0 : index
      %c0_18 = arith.constant 0 : index
      %21 = vector.load %arg8[%c0_17, %c0_18] : memref<2x32xf32, #tpu.memory_space<vmem>>, vector<2x32xf32>
      %c0_19 = arith.constant 0 : index
      %c0_20 = arith.constant 0 : index
      %22 = vector.load %arg9[%c0_19, %c0_20] : memref<2x32xf32, #tpu.memory_space<vmem>>, vector<2x32xf32>
      %c0_21 = arith.constant 0 : index
      %c0_22 = arith.constant 0 : index
      %23 = vector.load %arg10[%c0_21, %c0_22] : memref<16x128xf32, #tpu.memory_space<vmem>>, vector<2x128xf32>
      %cst_23 = arith.constant dense<0.000000e+00> : vector<2x128xf32>
      %24 = tpu.matmul %21, %14, %cst_23 {dimension_numbers = #tpu.dot_dimension_numbers<[1], [0], [0], [1], [0, 0, 1, 1], [], []>} : vector<2x32xf32>, vector<32x128xf32>, vector<2x128xf32> -> vector<2x128xf32>
      %25 = arith.addf %23, %24 : vector<2x128xf32>
      %26 = vector.extract_strided_slice %25 {offsets = [0, 0], sizes = [2, 96], strides = [1, 1]} : vector<2x128xf32> to vector<2x96xf32>
      %27 = arith.negf %26 : vector<2x96xf32>
      %28 = math.exp %27 : vector<2x96xf32>
      %cst_24 = arith.constant 1.000000e+00 : f32
      %29 = vector.broadcast %cst_24 : f32 to vector<2x96xf32>
      %30 = arith.addf %29, %28 : vector<2x96xf32>
      %31 = arith.divf %29, %30 : vector<2x96xf32>
      %32 = vector.extract_strided_slice %25 {offsets = [0, 96], sizes = [2, 32], strides = [1, 1]} : vector<2x128xf32> to vector<2x32xf32>
      %33 = math.tanh %32 : vector<2x32xf32>
      %34 = vector.extract_strided_slice %31 {offsets = [0, 0], sizes = [2, 32], strides = [1, 1]} : vector<2x96xf32> to vector<2x32xf32>
      %35 = vector.extract_strided_slice %31 {offsets = [0, 32], sizes = [2, 32], strides = [1, 1]} : vector<2x96xf32> to vector<2x32xf32>
      %36 = vector.extract_strided_slice %31 {offsets = [0, 64], sizes = [2, 32], strides = [1, 1]} : vector<2x96xf32> to vector<2x32xf32>
      %37 = arith.mulf %35, %22 : vector<2x32xf32>
      %38 = arith.mulf %34, %33 : vector<2x32xf32>
      %39 = arith.addf %37, %38 : vector<2x32xf32>
      %40 = math.tanh %39 : vector<2x32xf32>
      %41 = arith.mulf %36, %40 : vector<2x32xf32>
      %c0_25 = arith.constant 0 : index
      %c0_26 = arith.constant 0 : index
      %42 = vector.load %arg8[%c0_25, %c0_26] : memref<2x32xf32, #tpu.memory_space<vmem>>, vector<2x32xf32>
      tpu.vector_store %arg8[%c0_25, %c0_26], %41 {strides = array<i32>} : memref<2x32xf32, #tpu.memory_space<vmem>>, vector<2x32xf32>,
      %c0_27 = arith.constant 0 : index
      %c0_28 = arith.constant 0 : index
      %43 = vector.load %arg9[%c0_27, %c0_28] : memref<2x32xf32, #tpu.memory_space<vmem>>, vector<2x32xf32>
      tpu.vector_store %arg9[%c0_27, %c0_28], %39 {strides = array<i32>} : memref<2x32xf32, #tpu.memory_space<vmem>>, vector<2x32xf32>,
      %c0_29 = arith.constant 0 : index
      %c0_30 = arith.constant 0 : index
      %c0_31 = arith.constant 0 : index
      %c0_32 = arith.constant 0 : index
      %44 = vector.load %arg7[%c0_29, %c0_30, %c0_31, %c0_32] : memref<1x8x2x32xf32, #tpu.memory_space<vmem>>, vector<1x1x2x32xf32>
      %45 = vector.shape_cast %44 : vector<1x1x2x32xf32> to vector<2x32xf32>
      %46 = vector.shape_cast %41 : vector<2x32xf32> to vector<1x1x2x32xf32>
      tpu.vector_store %arg7[%c0_29, %c0_30, %c0_31, %c0_32], %46 {strides = array<i32>} : memref<1x8x2x32xf32, #tpu.memory_space<vmem>>, vector<1x1x2x32xf32>,
      %c0_33 = arith.constant 0 : index
      %c0_34 = arith.constant 0 : index
      %47 = vector.load %arg8[%c0_33, %c0_34] : memref<2x32xf32, #tpu.memory_space<vmem>>, vector<2x32xf32>
      %c0_35 = arith.constant 0 : index
      %c0_36 = arith.constant 0 : index
      %48 = vector.load %arg9[%c0_35, %c0_36] : memref<2x32xf32, #tpu.memory_space<vmem>>, vector<2x32xf32>
      %c2 = arith.constant 2 : index
      %c0_37 = arith.constant 0 : index
      %49 = vector.load %arg10[%c2, %c0_37] : memref<16x128xf32, #tpu.memory_space<vmem>>, vector<2x128xf32>
      %cst_38 = arith.constant dense<0.000000e+00> : vector<2x128xf32>
      %50 = tpu.matmul %47, %14, %cst_38 {dimension_numbers = #tpu.dot_dimension_numbers<[1], [0], [0], [1], [0, 0, 1, 1], [], []>} : vector<2x32xf32>, vector<32x128xf32>, vector<2x128xf32> -> vector<2x128xf32>
      %51 = arith.addf %49, %50 : vector<2x128xf32>
      %52 = vector.extract_strided_slice %51 {offsets = [0, 0], sizes = [2, 96], strides = [1, 1]} : vector<2x128xf32> to vector<2x96xf32>
      %53 = arith.negf %52 : vector<2x96xf32>
      %54 = math.exp %53 : vector<2x96xf32>
      %cst_39 = arith.constant 1.000000e+00 : f32
      %55 = vector.broadcast %cst_39 : f32 to vector<2x96xf32>
      %56 = arith.addf %55, %54 : vector<2x96xf32>
      %57 = arith.divf %55, %56 : vector<2x96xf32>
      %58 = vector.extract_strided_slice %51 {offsets = [0, 96], sizes = [2, 32], strides = [1, 1]} : vector<2x128xf32> to vector<2x32xf32>
      %59 = math.tanh %58 : vector<2x32xf32>
      %60 = vector.extract_strided_slice %57 {offsets = [0, 0], sizes = [2, 32], strides = [1, 1]} : vector<2x96xf32> to vector<2x32xf32>
      %61 = vector.extract_strided_slice %57 {offsets = [0, 32], sizes = [2, 32], strides = [1, 1]} : vector<2x96xf32> to vector<2x32xf32>
      %62 = vector.extract_strided_slice %57 {offsets = [0, 64], sizes = [2, 32], strides = [1, 1]} : vector<2x96xf32> to vector<2x32xf32>
      %63 = arith.mulf %61, %48 : vector<2x32xf32>
      %64 = arith.mulf %60, %59 : vector<2x32xf32>
      %65 = arith.addf %63, %64 : vector<2x32xf32>
      %66 = math.tanh %65 : vector<2x32xf32>
      %67 = arith.mulf %62, %66 : vector<2x32xf32>
      %c0_40 = arith.constant 0 : index
      %c0_41 = arith.constant 0 : index
      %68 = vector.load %arg8[%c0_40, %c0_41] : memref<2x32xf32, #tpu.memory_space<vmem>>, vector<2x32xf32>
      tpu.vector_store %arg8[%c0_40, %c0_41], %67 {strides = array<i32>} : memref<2x32xf32, #tpu.memory_space<vmem>>, vector<2x32xf32>,
      %c0_42 = arith.constant 0 : index
      %c0_43 = arith.constant 0 : index
      %69 = vector.load %arg9[%c0_42, %c0_43] : memref<2x32xf32, #tpu.memory_space<vmem>>, vector<2x32xf32>
      tpu.vector_store %arg9[%c0_42, %c0_43], %65 {strides = array<i32>} : memref<2x32xf32, #tpu.memory_space<vmem>>, vector<2x32xf32>,
      %c0_44 = arith.constant 0 : index
      %c1 = arith.constant 1 : index
      %c0_45 = arith.constant 0 : index
      %c0_46 = arith.constant 0 : index
      %70 = vector.load %arg7[%c0_44, %c1, %c0_45, %c0_46] : memref<1x8x2x32xf32, #tpu.memory_space<vmem>>, vector<1x1x2x32xf32>
      %71 = vector.shape_cast %70 : vector<1x1x2x32xf32> to vector<2x32xf32>
      %72 = vector.shape_cast %67 : vector<2x32xf32> to vector<1x1x2x32xf32>
      tpu.vector_store %arg7[%c0_44, %c1, %c0_45, %c0_46], %72 {strides = array<i32>} : memref<1x8x2x32xf32, #tpu.memory_space<vmem>>, vector<1x1x2x32xf32>,
      %c0_47 = arith.constant 0 : index
      %c0_48 = arith.constant 0 : index
      %73 = vector.load %arg8[%c0_47, %c0_48] : memref<2x32xf32, #tpu.memory_space<vmem>>, vector<2x32xf32>
      %c0_49 = arith.constant 0 : index
      %c0_50 = arith.constant 0 : index
      %74 = vector.load %arg9[%c0_49, %c0_50] : memref<2x32xf32, #tpu.memory_space<vmem>>, vector<2x32xf32>
      %c4 = arith.constant 4 : index
      %c0_51 = arith.constant 0 : index
      %75 = vector.load %arg10[%c4, %c0_51] : memref<16x128xf32, #tpu.memory_space<vmem>>, vector<2x128xf32>
      %cst_52 = arith.constant dense<0.000000e+00> : vector<2x128xf32>
      %76 = tpu.matmul %73, %14, %cst_52 {dimension_numbers = #tpu.dot_dimension_numbers<[1], [0], [0], [1], [0, 0, 1, 1], [], []>} : vector<2x32xf32>, vector<32x128xf32>, vector<2x128xf32> -> vector<2x128xf32>
      %77 = arith.addf %75, %76 : vector<2x128xf32>
      %78 = vector.extract_strided_slice %77 {offsets = [0, 0], sizes = [2, 96], strides = [1, 1]} : vector<2x128xf32> to vector<2x96xf32>
      %79 = arith.negf %78 : vector<2x96xf32>
      %80 = math.exp %79 : vector<2x96xf32>
      %cst_53 = arith.constant 1.000000e+00 : f32
      %81 = vector.broadcast %cst_53 : f32 to vector<2x96xf32>
      %82 = arith.addf %81, %80 : vector<2x96xf32>
      %83 = arith.divf %81, %82 : vector<2x96xf32>
      %84 = vector.extract_strided_slice %77 {offsets = [0, 96], sizes = [2, 32], strides = [1, 1]} : vector<2x128xf32> to vector<2x32xf32>
      %85 = math.tanh %84 : vector<2x32xf32>
      %86 = vector.extract_strided_slice %83 {offsets = [0, 0], sizes = [2, 32], strides = [1, 1]} : vector<2x96xf32> to vector<2x32xf32>
      %87 = vector.extract_strided_slice %83 {offsets = [0, 32], sizes = [2, 32], strides = [1, 1]} : vector<2x96xf32> to vector<2x32xf32>
      %88 = vector.extract_strided_slice %83 {offsets = [0, 64], sizes = [2, 32], strides = [1, 1]} : vector<2x96xf32> to vector<2x32xf32>
      %89 = arith.mulf %87, %74 : vector<2x32xf32>
      %90 = arith.mulf %86, %85 : vector<2x32xf32>
      %91 = arith.addf %89, %90 : vector<2x32xf32>
      %92 = math.tanh %91 : vector<2x32xf32>
      %93 = arith.mulf %88, %92 : vector<2x32xf32>
      %c0_54 = arith.constant 0 : index
      %c0_55 = arith.constant 0 : index
      %94 = vector.load %arg8[%c0_54, %c0_55] : memref<2x32xf32, #tpu.memory_space<vmem>>, vector<2x32xf32>
      tpu.vector_store %arg8[%c0_54, %c0_55], %93 {strides = array<i32>} : memref<2x32xf32, #tpu.memory_space<vmem>>, vector<2x32xf32>,
      %c0_56 = arith.constant 0 : index
      %c0_57 = arith.constant 0 : index
      %95 = vector.load %arg9[%c0_56, %c0_57] : memref<2x32xf32, #tpu.memory_space<vmem>>, vector<2x32xf32>
      tpu.vector_store %arg9[%c0_56, %c0_57], %91 {strides = array<i32>} : memref<2x32xf32, #tpu.memory_space<vmem>>, vector<2x32xf32>,
      %c0_58 = arith.constant 0 : index
      %c2_59 = arith.constant 2 : index
      %c0_60 = arith.constant 0 : index
      %c0_61 = arith.constant 0 : index
      %96 = vector.load %arg7[%c0_58, %c2_59, %c0_60, %c0_61] : memref<1x8x2x32xf32, #tpu.memory_space<vmem>>, vector<1x1x2x32xf32>
      %97 = vector.shape_cast %96 : vector<1x1x2x32xf32> to vector<2x32xf32>
      %98 = vector.shape_cast %93 : vector<2x32xf32> to vector<1x1x2x32xf32>
      tpu.vector_store %arg7[%c0_58, %c2_59, %c0_60, %c0_61], %98 {strides = array<i32>} : memref<1x8x2x32xf32, #tpu.memory_space<vmem>>, vector<1x1x2x32xf32>,
      %c0_62 = arith.constant 0 : index
      %c0_63 = arith.constant 0 : index
      %99 = vector.load %arg8[%c0_62, %c0_63] : memref<2x32xf32, #tpu.memory_space<vmem>>, vector<2x32xf32>
      %c0_64 = arith.constant 0 : index
      %c0_65 = arith.constant 0 : index
      %100 = vector.load %arg9[%c0_64, %c0_65] : memref<2x32xf32, #tpu.memory_space<vmem>>, vector<2x32xf32>
      %c6 = arith.constant 6 : index
      %c0_66 = arith.constant 0 : index
      %101 = vector.load %arg10[%c6, %c0_66] : memref<16x128xf32, #tpu.memory_space<vmem>>, vector<2x128xf32>
      %cst_67 = arith.constant dense<0.000000e+00> : vector<2x128xf32>
      %102 = tpu.matmul %99, %14, %cst_67 {dimension_numbers = #tpu.dot_dimension_numbers<[1], [0], [0], [1], [0, 0, 1, 1], [], []>} : vector<2x32xf32>, vector<32x128xf32>, vector<2x128xf32> -> vector<2x128xf32>
      %103 = arith.addf %101, %102 : vector<2x128xf32>
      %104 = vector.extract_strided_slice %103 {offsets = [0, 0], sizes = [2, 96], strides = [1, 1]} : vector<2x128xf32> to vector<2x96xf32>
      %105 = arith.negf %104 : vector<2x96xf32>
      %106 = math.exp %105 : vector<2x96xf32>
      %cst_68 = arith.constant 1.000000e+00 : f32
      %107 = vector.broadcast %cst_68 : f32 to vector<2x96xf32>
      %108 = arith.addf %107, %106 : vector<2x96xf32>
      %109 = arith.divf %107, %108 : vector<2x96xf32>
      %110 = vector.extract_strided_slice %103 {offsets = [0, 96], sizes = [2, 32], strides = [1, 1]} : vector<2x128xf32> to vector<2x32xf32>
      %111 = math.tanh %110 : vector<2x32xf32>
      %112 = vector.extract_strided_slice %109 {offsets = [0, 0], sizes = [2, 32], strides = [1, 1]} : vector<2x96xf32> to vector<2x32xf32>
      %113 = vector.extract_strided_slice %109 {offsets = [0, 32], sizes = [2, 32], strides = [1, 1]} : vector<2x96xf32> to vector<2x32xf32>
      %114 = vector.extract_strided_slice %109 {offsets = [0, 64], sizes = [2, 32], strides = [1, 1]} : vector<2x96xf32> to vector<2x32xf32>
      %115 = arith.mulf %113, %100 : vector<2x32xf32>
      %116 = arith.mulf %112, %111 : vector<2x32xf32>
      %117 = arith.addf %115, %116 : vector<2x32xf32>
      %118 = math.tanh %117 : vector<2x32xf32>
      %119 = arith.mulf %114, %118 : vector<2x32xf32>
      %c0_69 = arith.constant 0 : index
      %c0_70 = arith.constant 0 : index
      %120 = vector.load %arg8[%c0_69, %c0_70] : memref<2x32xf32, #tpu.memory_space<vmem>>, vector<2x32xf32>
      tpu.vector_store %arg8[%c0_69, %c0_70], %119 {strides = array<i32>} : memref<2x32xf32, #tpu.memory_space<vmem>>, vector<2x32xf32>,
      %c0_71 = arith.constant 0 : index
      %c0_72 = arith.constant 0 : index
      %121 = vector.load %arg9[%c0_71, %c0_72] : memref<2x32xf32, #tpu.memory_space<vmem>>, vector<2x32xf32>
      tpu.vector_store %arg9[%c0_71, %c0_72], %117 {strides = array<i32>} : memref<2x32xf32, #tpu.memory_space<vmem>>, vector<2x32xf32>,
      %c0_73 = arith.constant 0 : index
      %c3 = arith.constant 3 : index
      %c0_74 = arith.constant 0 : index
      %c0_75 = arith.constant 0 : index
      %122 = vector.load %arg7[%c0_73, %c3, %c0_74, %c0_75] : memref<1x8x2x32xf32, #tpu.memory_space<vmem>>, vector<1x1x2x32xf32>
      %123 = vector.shape_cast %122 : vector<1x1x2x32xf32> to vector<2x32xf32>
      %124 = vector.shape_cast %119 : vector<2x32xf32> to vector<1x1x2x32xf32>
      tpu.vector_store %arg7[%c0_73, %c3, %c0_74, %c0_75], %124 {strides = array<i32>} : memref<1x8x2x32xf32, #tpu.memory_space<vmem>>, vector<1x1x2x32xf32>,
      %c0_76 = arith.constant 0 : index
      %c0_77 = arith.constant 0 : index
      %125 = vector.load %arg8[%c0_76, %c0_77] : memref<2x32xf32, #tpu.memory_space<vmem>>, vector<2x32xf32>
      %c0_78 = arith.constant 0 : index
      %c0_79 = arith.constant 0 : index
      %126 = vector.load %arg9[%c0_78, %c0_79] : memref<2x32xf32, #tpu.memory_space<vmem>>, vector<2x32xf32>
      %c8 = arith.constant 8 : index
      %c0_80 = arith.constant 0 : index
      %127 = vector.load %arg10[%c8, %c0_80] : memref<16x128xf32, #tpu.memory_space<vmem>>, vector<2x128xf32>
      %cst_81 = arith.constant dense<0.000000e+00> : vector<2x128xf32>
      %128 = tpu.matmul %125, %14, %cst_81 {dimension_numbers = #tpu.dot_dimension_numbers<[1], [0], [0], [1], [0, 0, 1, 1], [], []>} : vector<2x32xf32>, vector<32x128xf32>, vector<2x128xf32> -> vector<2x128xf32>
      %129 = arith.addf %127, %128 : vector<2x128xf32>
      %130 = vector.extract_strided_slice %129 {offsets = [0, 0], sizes = [2, 96], strides = [1, 1]} : vector<2x128xf32> to vector<2x96xf32>
      %131 = arith.negf %130 : vector<2x96xf32>
      %132 = math.exp %131 : vector<2x96xf32>
      %cst_82 = arith.constant 1.000000e+00 : f32
      %133 = vector.broadcast %cst_82 : f32 to vector<2x96xf32>
      %134 = arith.addf %133, %132 : vector<2x96xf32>
      %135 = arith.divf %133, %134 : vector<2x96xf32>
      %136 = vector.extract_strided_slice %129 {offsets = [0, 96], sizes = [2, 32], strides = [1, 1]} : vector<2x128xf32> to vector<2x32xf32>
      %137 = math.tanh %136 : vector<2x32xf32>
      %138 = vector.extract_strided_slice %135 {offsets = [0, 0], sizes = [2, 32], strides = [1, 1]} : vector<2x96xf32> to vector<2x32xf32>
      %139 = vector.extract_strided_slice %135 {offsets = [0, 32], sizes = [2, 32], strides = [1, 1]} : vector<2x96xf32> to vector<2x32xf32>
      %140 = vector.extract_strided_slice %135 {offsets = [0, 64], sizes = [2, 32], strides = [1, 1]} : vector<2x96xf32> to vector<2x32xf32>
      %141 = arith.mulf %139, %126 : vector<2x32xf32>
      %142 = arith.mulf %138, %137 : vector<2x32xf32>
      %143 = arith.addf %141, %142 : vector<2x32xf32>
      %144 = math.tanh %143 : vector<2x32xf32>
      %145 = arith.mulf %140, %144 : vector<2x32xf32>
      %c0_83 = arith.constant 0 : index
      %c0_84 = arith.constant 0 : index
      %146 = vector.load %arg8[%c0_83, %c0_84] : memref<2x32xf32, #tpu.memory_space<vmem>>, vector<2x32xf32>
      tpu.vector_store %arg8[%c0_83, %c0_84], %145 {strides = array<i32>} : memref<2x32xf32, #tpu.memory_space<vmem>>, vector<2x32xf32>,
      %c0_85 = arith.constant 0 : index
      %c0_86 = arith.constant 0 : index
      %147 = vector.load %arg9[%c0_85, %c0_86] : memref<2x32xf32, #tpu.memory_space<vmem>>, vector<2x32xf32>
      tpu.vector_store %arg9[%c0_85, %c0_86], %143 {strides = array<i32>} : memref<2x32xf32, #tpu.memory_space<vmem>>, vector<2x32xf32>,
      %c0_87 = arith.constant 0 : index
      %c4_88 = arith.constant 4 : index
      %c0_89 = arith.constant 0 : index
      %c0_90 = arith.constant 0 : index
      %148 = vector.load %arg7[%c0_87, %c4_88, %c0_89, %c0_90] : memref<1x8x2x32xf32, #tpu.memory_space<vmem>>, vector<1x1x2x32xf32>
      %149 = vector.shape_cast %148 : vector<1x1x2x32xf32> to vector<2x32xf32>
      %150 = vector.shape_cast %145 : vector<2x32xf32> to vector<1x1x2x32xf32>
      tpu.vector_store %arg7[%c0_87, %c4_88, %c0_89, %c0_90], %150 {strides = array<i32>} : memref<1x8x2x32xf32, #tpu.memory_space<vmem>>, vector<1x1x2x32xf32>,
      %c0_91 = arith.constant 0 : index
      %c0_92 = arith.constant 0 : index
      %151 = vector.load %arg8[%c0_91, %c0_92] : memref<2x32xf32, #tpu.memory_space<vmem>>, vector<2x32xf32>
      %c0_93 = arith.constant 0 : index
      %c0_94 = arith.constant 0 : index
      %152 = vector.load %arg9[%c0_93, %c0_94] : memref<2x32xf32, #tpu.memory_space<vmem>>, vector<2x32xf32>
      %c10 = arith.constant 10 : index
      %c0_95 = arith.constant 0 : index
      %153 = vector.load %arg10[%c10, %c0_95] : memref<16x128xf32, #tpu.memory_space<vmem>>, vector<2x128xf32>
      %cst_96 = arith.constant dense<0.000000e+00> : vector<2x128xf32>
      %154 = tpu.matmul %151, %14, %cst_96 {dimension_numbers = #tpu.dot_dimension_numbers<[1], [0], [0], [1], [0, 0, 1, 1], [], []>} : vector<2x32xf32>, vector<32x128xf32>, vector<2x128xf32> -> vector<2x128xf32>
      %155 = arith.addf %153, %154 : vector<2x128xf32>
      %156 = vector.extract_strided_slice %155 {offsets = [0, 0], sizes = [2, 96], strides = [1, 1]} : vector<2x128xf32> to vector<2x96xf32>
      %157 = arith.negf %156 : vector<2x96xf32>
      %158 = math.exp %157 : vector<2x96xf32>
      %cst_97 = arith.constant 1.000000e+00 : f32
      %159 = vector.broadcast %cst_97 : f32 to vector<2x96xf32>
      %160 = arith.addf %159, %158 : vector<2x96xf32>
      %161 = arith.divf %159, %160 : vector<2x96xf32>
      %162 = vector.extract_strided_slice %155 {offsets = [0, 96], sizes = [2, 32], strides = [1, 1]} : vector<2x128xf32> to vector<2x32xf32>
      %163 = math.tanh %162 : vector<2x32xf32>
      %164 = vector.extract_strided_slice %161 {offsets = [0, 0], sizes = [2, 32], strides = [1, 1]} : vector<2x96xf32> to vector<2x32xf32>
      %165 = vector.extract_strided_slice %161 {offsets = [0, 32], sizes = [2, 32], strides = [1, 1]} : vector<2x96xf32> to vector<2x32xf32>
      %166 = vector.extract_strided_slice %161 {offsets = [0, 64], sizes = [2, 32], strides = [1, 1]} : vector<2x96xf32> to vector<2x32xf32>
      %167 = arith.mulf %165, %152 : vector<2x32xf32>
      %168 = arith.mulf %164, %163 : vector<2x32xf32>
      %169 = arith.addf %167, %168 : vector<2x32xf32>
      %170 = math.tanh %169 : vector<2x32xf32>
      %171 = arith.mulf %166, %170 : vector<2x32xf32>
      %c0_98 = arith.constant 0 : index
      %c0_99 = arith.constant 0 : index
      %172 = vector.load %arg8[%c0_98, %c0_99] : memref<2x32xf32, #tpu.memory_space<vmem>>, vector<2x32xf32>
      tpu.vector_store %arg8[%c0_98, %c0_99], %171 {strides = array<i32>} : memref<2x32xf32, #tpu.memory_space<vmem>>, vector<2x32xf32>,
      %c0_100 = arith.constant 0 : index
      %c0_101 = arith.constant 0 : index
      %173 = vector.load %arg9[%c0_100, %c0_101] : memref<2x32xf32, #tpu.memory_space<vmem>>, vector<2x32xf32>
      tpu.vector_store %arg9[%c0_100, %c0_101], %169 {strides = array<i32>} : memref<2x32xf32, #tpu.memory_space<vmem>>, vector<2x32xf32>,
      %c0_102 = arith.constant 0 : index
      %c5 = arith.constant 5 : index
      %c0_103 = arith.constant 0 : index
      %c0_104 = arith.constant 0 : index
      %174 = vector.load %arg7[%c0_102, %c5, %c0_103, %c0_104] : memref<1x8x2x32xf32, #tpu.memory_space<vmem>>, vector<1x1x2x32xf32>
      %175 = vector.shape_cast %174 : vector<1x1x2x32xf32> to vector<2x32xf32>
      %176 = vector.shape_cast %171 : vector<2x32xf32> to vector<1x1x2x32xf32>
      tpu.vector_store %arg7[%c0_102, %c5, %c0_103, %c0_104], %176 {strides = array<i32>} : memref<1x8x2x32xf32, #tpu.memory_space<vmem>>, vector<1x1x2x32xf32>,
      %c0_105 = arith.constant 0 : index
      %c0_106 = arith.constant 0 : index
      %177 = vector.load %arg8[%c0_105, %c0_106] : memref<2x32xf32, #tpu.memory_space<vmem>>, vector<2x32xf32>
      %c0_107 = arith.constant 0 : index
      %c0_108 = arith.constant 0 : index
      %178 = vector.load %arg9[%c0_107, %c0_108] : memref<2x32xf32, #tpu.memory_space<vmem>>, vector<2x32xf32>
      %c12 = arith.constant 12 : index
      %c0_109 = arith.constant 0 : index
      %179 = vector.load %arg10[%c12, %c0_109] : memref<16x128xf32, #tpu.memory_space<vmem>>, vector<2x128xf32>
      %cst_110 = arith.constant dense<0.000000e+00> : vector<2x128xf32>
      %180 = tpu.matmul %177, %14, %cst_110 {dimension_numbers = #tpu.dot_dimension_numbers<[1], [0], [0], [1], [0, 0, 1, 1], [], []>} : vector<2x32xf32>, vector<32x128xf32>, vector<2x128xf32> -> vector<2x128xf32>
      %181 = arith.addf %179, %180 : vector<2x128xf32>
      %182 = vector.extract_strided_slice %181 {offsets = [0, 0], sizes = [2, 96], strides = [1, 1]} : vector<2x128xf32> to vector<2x96xf32>
      %183 = arith.negf %182 : vector<2x96xf32>
      %184 = math.exp %183 : vector<2x96xf32>
      %cst_111 = arith.constant 1.000000e+00 : f32
      %185 = vector.broadcast %cst_111 : f32 to vector<2x96xf32>
      %186 = arith.addf %185, %184 : vector<2x96xf32>
      %187 = arith.divf %185, %186 : vector<2x96xf32>
      %188 = vector.extract_strided_slice %181 {offsets = [0, 96], sizes = [2, 32], strides = [1, 1]} : vector<2x128xf32> to vector<2x32xf32>
      %189 = math.tanh %188 : vector<2x32xf32>
      %190 = vector.extract_strided_slice %187 {offsets = [0, 0], sizes = [2, 32], strides = [1, 1]} : vector<2x96xf32> to vector<2x32xf32>
      %191 = vector.extract_strided_slice %187 {offsets = [0, 32], sizes = [2, 32], strides = [1, 1]} : vector<2x96xf32> to vector<2x32xf32>
      %192 = vector.extract_strided_slice %187 {offsets = [0, 64], sizes = [2, 32], strides = [1, 1]} : vector<2x96xf32> to vector<2x32xf32>
      %193 = arith.mulf %191, %178 : vector<2x32xf32>
      %194 = arith.mulf %190, %189 : vector<2x32xf32>
      %195 = arith.addf %193, %194 : vector<2x32xf32>
      %196 = math.tanh %195 : vector<2x32xf32>
      %197 = arith.mulf %192, %196 : vector<2x32xf32>
      %c0_112 = arith.constant 0 : index
      %c0_113 = arith.constant 0 : index
      %198 = vector.load %arg8[%c0_112, %c0_113] : memref<2x32xf32, #tpu.memory_space<vmem>>, vector<2x32xf32>
      tpu.vector_store %arg8[%c0_112, %c0_113], %197 {strides = array<i32>} : memref<2x32xf32, #tpu.memory_space<vmem>>, vector<2x32xf32>,
      %c0_114 = arith.constant 0 : index
      %c0_115 = arith.constant 0 : index
      %199 = vector.load %arg9[%c0_114, %c0_115] : memref<2x32xf32, #tpu.memory_space<vmem>>, vector<2x32xf32>
      tpu.vector_store %arg9[%c0_114, %c0_115], %195 {strides = array<i32>} : memref<2x32xf32, #tpu.memory_space<vmem>>, vector<2x32xf32>,
      %c0_116 = arith.constant 0 : index
      %c6_117 = arith.constant 6 : index
      %c0_118 = arith.constant 0 : index
      %c0_119 = arith.constant 0 : index
      %200 = vector.load %arg7[%c0_116, %c6_117, %c0_118, %c0_119] : memref<1x8x2x32xf32, #tpu.memory_space<vmem>>, vector<1x1x2x32xf32>
      %201 = vector.shape_cast %200 : vector<1x1x2x32xf32> to vector<2x32xf32>
      %202 = vector.shape_cast %197 : vector<2x32xf32> to vector<1x1x2x32xf32>
      tpu.vector_store %arg7[%c0_116, %c6_117, %c0_118, %c0_119], %202 {strides = array<i32>} : memref<1x8x2x32xf32, #tpu.memory_space<vmem>>, vector<1x1x2x32xf32>,
      %c0_120 = arith.constant 0 : index
      %c0_121 = arith.constant 0 : index
      %203 = vector.load %arg8[%c0_120, %c0_121] : memref<2x32xf32, #tpu.memory_space<vmem>>, vector<2x32xf32>
      %c0_122 = arith.constant 0 : index
      %c0_123 = arith.constant 0 : index
      %204 = vector.load %arg9[%c0_122, %c0_123] : memref<2x32xf32, #tpu.memory_space<vmem>>, vector<2x32xf32>
      %c14 = arith.constant 14 : index
      %c0_124 = arith.constant 0 : index
      %205 = vector.load %arg10[%c14, %c0_124] : memref<16x128xf32, #tpu.memory_space<vmem>>, vector<2x128xf32>
      %cst_125 = arith.constant dense<0.000000e+00> : vector<2x128xf32>
      %206 = tpu.matmul %203, %14, %cst_125 {dimension_numbers = #tpu.dot_dimension_numbers<[1], [0], [0], [1], [0, 0, 1, 1], [], []>} : vector<2x32xf32>, vector<32x128xf32>, vector<2x128xf32> -> vector<2x128xf32>
      %207 = arith.addf %205, %206 : vector<2x128xf32>
      %208 = vector.extract_strided_slice %207 {offsets = [0, 0], sizes = [2, 96], strides = [1, 1]} : vector<2x128xf32> to vector<2x96xf32>
      %209 = arith.negf %208 : vector<2x96xf32>
      %210 = math.exp %209 : vector<2x96xf32>
      %cst_126 = arith.constant 1.000000e+00 : f32
      %211 = vector.broadcast %cst_126 : f32 to vector<2x96xf32>
      %212 = arith.addf %211, %210 : vector<2x96xf32>
      %213 = arith.divf %211, %212 : vector<2x96xf32>
      %214 = vector.extract_strided_slice %207 {offsets = [0, 96], sizes = [2, 32], strides = [1, 1]} : vector<2x128xf32> to vector<2x32xf32>
      %215 = math.tanh %214 : vector<2x32xf32>
      %216 = vector.extract_strided_slice %213 {offsets = [0, 0], sizes = [2, 32], strides = [1, 1]} : vector<2x96xf32> to vector<2x32xf32>
      %217 = vector.extract_strided_slice %213 {offsets = [0, 32], sizes = [2, 32], strides = [1, 1]} : vector<2x96xf32> to vector<2x32xf32>
      %218 = vector.extract_strided_slice %213 {offsets = [0, 64], sizes = [2, 32], strides = [1, 1]} : vector<2x96xf32> to vector<2x32xf32>
      %219 = arith.mulf %217, %204 : vector<2x32xf32>
      %220 = arith.mulf %216, %215 : vector<2x32xf32>
      %221 = arith.addf %219, %220 : vector<2x32xf32>
      %222 = math.tanh %221 : vector<2x32xf32>
      %223 = arith.mulf %218, %222 : vector<2x32xf32>
      %c0_127 = arith.constant 0 : index
      %c0_128 = arith.constant 0 : index
      %224 = vector.load %arg8[%c0_127, %c0_128] : memref<2x32xf32, #tpu.memory_space<vmem>>, vector<2x32xf32>
      tpu.vector_store %arg8[%c0_127, %c0_128], %223 {strides = array<i32>} : memref<2x32xf32, #tpu.memory_space<vmem>>, vector<2x32xf32>,
      %c0_129 = arith.constant 0 : index
      %c0_130 = arith.constant 0 : index
      %225 = vector.load %arg9[%c0_129, %c0_130] : memref<2x32xf32, #tpu.memory_space<vmem>>, vector<2x32xf32>
      tpu.vector_store %arg9[%c0_129, %c0_130], %221 {strides = array<i32>} : memref<2x32xf32, #tpu.memory_space<vmem>>, vector<2x32xf32>,
      %c0_131 = arith.constant 0 : index
      %c7 = arith.constant 7 : index
      %c0_132 = arith.constant 0 : index
      %c0_133 = arith.constant 0 : index
      %226 = vector.load %arg7[%c0_131, %c7, %c0_132, %c0_133] : memref<1x8x2x32xf32, #tpu.memory_space<vmem>>, vector<1x1x2x32xf32>
      %227 = vector.shape_cast %226 : vector<1x1x2x32xf32> to vector<2x32xf32>
      %228 = vector.shape_cast %223 : vector<2x32xf32> to vector<1x1x2x32xf32>
      tpu.vector_store %arg7[%c0_131, %c7, %c0_132, %c0_133], %228 {strides = array<i32>} : memref<1x8x2x32xf32, #tpu.memory_space<vmem>>, vector<1x1x2x32xf32>,
    } else {
    }
    %c1_i32 = arith.constant 1 : i32
    %18 = arith.cmpi eq, %arg0, %c1_i32 : i32
    %19 = arith.extui %18 : i1 to i32
    %c0_i32_16 = arith.constant 0 : i32
    %20 = arith.cmpi ne, %19, %c0_i32_16 : i32
    scf.if %20 {
      %c0_17 = arith.constant 0 : index
      %c0_18 = arith.constant 0 : index
      %21 = vector.load %arg8[%c0_17, %c0_18] : memref<2x32xf32, #tpu.memory_space<vmem>>, vector<2x32xf32>
      %c0_19 = arith.constant 0 : index
      %c0_20 = arith.constant 0 : index
      %22 = vector.load %arg9[%c0_19, %c0_20] : memref<2x32xf32, #tpu.memory_space<vmem>>, vector<2x32xf32>
      %c14 = arith.constant 14 : index
      %c0_21 = arith.constant 0 : index
      %23 = vector.load %arg10[%c14, %c0_21] : memref<16x128xf32, #tpu.memory_space<vmem>>, vector<2x128xf32>
      %cst_22 = arith.constant dense<0.000000e+00> : vector<2x128xf32>
      %24 = tpu.matmul %21, %14, %cst_22 {dimension_numbers = #tpu.dot_dimension_numbers<[1], [0], [0], [1], [0, 0, 1, 1], [], []>} : vector<2x32xf32>, vector<32x128xf32>, vector<2x128xf32> -> vector<2x128xf32>
      %25 = arith.addf %23, %24 : vector<2x128xf32>
      %26 = vector.extract_strided_slice %25 {offsets = [0, 0], sizes = [2, 96], strides = [1, 1]} : vector<2x128xf32> to vector<2x96xf32>
      %27 = arith.negf %26 : vector<2x96xf32>
      %28 = math.exp %27 : vector<2x96xf32>
      %cst_23 = arith.constant 1.000000e+00 : f32
      %29 = vector.broadcast %cst_23 : f32 to vector<2x96xf32>
      %30 = arith.addf %29, %28 : vector<2x96xf32>
      %31 = arith.divf %29, %30 : vector<2x96xf32>
      %32 = vector.extract_strided_slice %25 {offsets = [0, 96], sizes = [2, 32], strides = [1, 1]} : vector<2x128xf32> to vector<2x32xf32>
      %33 = math.tanh %32 : vector<2x32xf32>
      %34 = vector.extract_strided_slice %31 {offsets = [0, 0], sizes = [2, 32], strides = [1, 1]} : vector<2x96xf32> to vector<2x32xf32>
      %35 = vector.extract_strided_slice %31 {offsets = [0, 32], sizes = [2, 32], strides = [1, 1]} : vector<2x96xf32> to vector<2x32xf32>
      %36 = vector.extract_strided_slice %31 {offsets = [0, 64], sizes = [2, 32], strides = [1, 1]} : vector<2x96xf32> to vector<2x32xf32>
      %37 = arith.mulf %35, %22 : vector<2x32xf32>
      %38 = arith.mulf %34, %33 : vector<2x32xf32>
      %39 = arith.addf %37, %38 : vector<2x32xf32>
      %40 = math.tanh %39 : vector<2x32xf32>
      %41 = arith.mulf %36, %40 : vector<2x32xf32>
      %c0_24 = arith.constant 0 : index
      %c0_25 = arith.constant 0 : index
      %42 = vector.load %arg8[%c0_24, %c0_25] : memref<2x32xf32, #tpu.memory_space<vmem>>, vector<2x32xf32>
      tpu.vector_store %arg8[%c0_24, %c0_25], %41 {strides = array<i32>} : memref<2x32xf32, #tpu.memory_space<vmem>>, vector<2x32xf32>,
      %c0_26 = arith.constant 0 : index
      %c0_27 = arith.constant 0 : index
      %43 = vector.load %arg9[%c0_26, %c0_27] : memref<2x32xf32, #tpu.memory_space<vmem>>, vector<2x32xf32>
      tpu.vector_store %arg9[%c0_26, %c0_27], %39 {strides = array<i32>} : memref<2x32xf32, #tpu.memory_space<vmem>>, vector<2x32xf32>,
      %c0_28 = arith.constant 0 : index
      %c7 = arith.constant 7 : index
      %c0_29 = arith.constant 0 : index
      %c0_30 = arith.constant 0 : index
      %44 = vector.load %arg7[%c0_28, %c7, %c0_29, %c0_30] : memref<1x8x2x32xf32, #tpu.memory_space<vmem>>, vector<1x1x2x32xf32>
      %45 = vector.shape_cast %44 : vector<1x1x2x32xf32> to vector<2x32xf32>
      %46 = vector.shape_cast %41 : vector<2x32xf32> to vector<1x1x2x32xf32>
      tpu.vector_store %arg7[%c0_28, %c7, %c0_29, %c0_30], %46 {strides = array<i32>} : memref<1x8x2x32xf32, #tpu.memory_space<vmem>>, vector<1x1x2x32xf32>,
      %c0_31 = arith.constant 0 : index
      %c0_32 = arith.constant 0 : index
      %47 = vector.load %arg8[%c0_31, %c0_32] : memref<2x32xf32, #tpu.memory_space<vmem>>, vector<2x32xf32>
      %c0_33 = arith.constant 0 : index
      %c0_34 = arith.constant 0 : index
      %48 = vector.load %arg9[%c0_33, %c0_34] : memref<2x32xf32, #tpu.memory_space<vmem>>, vector<2x32xf32>
      %c12 = arith.constant 12 : index
      %c0_35 = arith.constant 0 : index
      %49 = vector.load %arg10[%c12, %c0_35] : memref<16x128xf32, #tpu.memory_space<vmem>>, vector<2x128xf32>
      %cst_36 = arith.constant dense<0.000000e+00> : vector<2x128xf32>
      %50 = tpu.matmul %47, %14, %cst_36 {dimension_numbers = #tpu.dot_dimension_numbers<[1], [0], [0], [1], [0, 0, 1, 1], [], []>} : vector<2x32xf32>, vector<32x128xf32>, vector<2x128xf32> -> vector<2x128xf32>
      %51 = arith.addf %49, %50 : vector<2x128xf32>
      %52 = vector.extract_strided_slice %51 {offsets = [0, 0], sizes = [2, 96], strides = [1, 1]} : vector<2x128xf32> to vector<2x96xf32>
      %53 = arith.negf %52 : vector<2x96xf32>
      %54 = math.exp %53 : vector<2x96xf32>
      %cst_37 = arith.constant 1.000000e+00 : f32
      %55 = vector.broadcast %cst_37 : f32 to vector<2x96xf32>
      %56 = arith.addf %55, %54 : vector<2x96xf32>
      %57 = arith.divf %55, %56 : vector<2x96xf32>
      %58 = vector.extract_strided_slice %51 {offsets = [0, 96], sizes = [2, 32], strides = [1, 1]} : vector<2x128xf32> to vector<2x32xf32>
      %59 = math.tanh %58 : vector<2x32xf32>
      %60 = vector.extract_strided_slice %57 {offsets = [0, 0], sizes = [2, 32], strides = [1, 1]} : vector<2x96xf32> to vector<2x32xf32>
      %61 = vector.extract_strided_slice %57 {offsets = [0, 32], sizes = [2, 32], strides = [1, 1]} : vector<2x96xf32> to vector<2x32xf32>
      %62 = vector.extract_strided_slice %57 {offsets = [0, 64], sizes = [2, 32], strides = [1, 1]} : vector<2x96xf32> to vector<2x32xf32>
      %63 = arith.mulf %61, %48 : vector<2x32xf32>
      %64 = arith.mulf %60, %59 : vector<2x32xf32>
      %65 = arith.addf %63, %64 : vector<2x32xf32>
      %66 = math.tanh %65 : vector<2x32xf32>
      %67 = arith.mulf %62, %66 : vector<2x32xf32>
      %c0_38 = arith.constant 0 : index
      %c0_39 = arith.constant 0 : index
      %68 = vector.load %arg8[%c0_38, %c0_39] : memref<2x32xf32, #tpu.memory_space<vmem>>, vector<2x32xf32>
      tpu.vector_store %arg8[%c0_38, %c0_39], %67 {strides = array<i32>} : memref<2x32xf32, #tpu.memory_space<vmem>>, vector<2x32xf32>,
      %c0_40 = arith.constant 0 : index
      %c0_41 = arith.constant 0 : index
      %69 = vector.load %arg9[%c0_40, %c0_41] : memref<2x32xf32, #tpu.memory_space<vmem>>, vector<2x32xf32>
      tpu.vector_store %arg9[%c0_40, %c0_41], %65 {strides = array<i32>} : memref<2x32xf32, #tpu.memory_space<vmem>>, vector<2x32xf32>,
      %c0_42 = arith.constant 0 : index
      %c6 = arith.constant 6 : index
      %c0_43 = arith.constant 0 : index
      %c0_44 = arith.constant 0 : index
      %70 = vector.load %arg7[%c0_42, %c6, %c0_43, %c0_44] : memref<1x8x2x32xf32, #tpu.memory_space<vmem>>, vector<1x1x2x32xf32>
      %71 = vector.shape_cast %70 : vector<1x1x2x32xf32> to vector<2x32xf32>
      %72 = vector.shape_cast %67 : vector<2x32xf32> to vector<1x1x2x32xf32>
      tpu.vector_store %arg7[%c0_42, %c6, %c0_43, %c0_44], %72 {strides = array<i32>} : memref<1x8x2x32xf32, #tpu.memory_space<vmem>>, vector<1x1x2x32xf32>,
      %c0_45 = arith.constant 0 : index
      %c0_46 = arith.constant 0 : index
      %73 = vector.load %arg8[%c0_45, %c0_46] : memref<2x32xf32, #tpu.memory_space<vmem>>, vector<2x32xf32>
      %c0_47 = arith.constant 0 : index
      %c0_48 = arith.constant 0 : index
      %74 = vector.load %arg9[%c0_47, %c0_48] : memref<2x32xf32, #tpu.memory_space<vmem>>, vector<2x32xf32>
      %c10 = arith.constant 10 : index
      %c0_49 = arith.constant 0 : index
      %75 = vector.load %arg10[%c10, %c0_49] : memref<16x128xf32, #tpu.memory_space<vmem>>, vector<2x128xf32>
      %cst_50 = arith.constant dense<0.000000e+00> : vector<2x128xf32>
      %76 = tpu.matmul %73, %14, %cst_50 {dimension_numbers = #tpu.dot_dimension_numbers<[1], [0], [0], [1], [0, 0, 1, 1], [], []>} : vector<2x32xf32>, vector<32x128xf32>, vector<2x128xf32> -> vector<2x128xf32>
      %77 = arith.addf %75, %76 : vector<2x128xf32>
      %78 = vector.extract_strided_slice %77 {offsets = [0, 0], sizes = [2, 96], strides = [1, 1]} : vector<2x128xf32> to vector<2x96xf32>
      %79 = arith.negf %78 : vector<2x96xf32>
      %80 = math.exp %79 : vector<2x96xf32>
      %cst_51 = arith.constant 1.000000e+00 : f32
      %81 = vector.broadcast %cst_51 : f32 to vector<2x96xf32>
      %82 = arith.addf %81, %80 : vector<2x96xf32>
      %83 = arith.divf %81, %82 : vector<2x96xf32>
      %84 = vector.extract_strided_slice %77 {offsets = [0, 96], sizes = [2, 32], strides = [1, 1]} : vector<2x128xf32> to vector<2x32xf32>
      %85 = math.tanh %84 : vector<2x32xf32>
      %86 = vector.extract_strided_slice %83 {offsets = [0, 0], sizes = [2, 32], strides = [1, 1]} : vector<2x96xf32> to vector<2x32xf32>
      %87 = vector.extract_strided_slice %83 {offsets = [0, 32], sizes = [2, 32], strides = [1, 1]} : vector<2x96xf32> to vector<2x32xf32>
      %88 = vector.extract_strided_slice %83 {offsets = [0, 64], sizes = [2, 32], strides = [1, 1]} : vector<2x96xf32> to vector<2x32xf32>
      %89 = arith.mulf %87, %74 : vector<2x32xf32>
      %90 = arith.mulf %86, %85 : vector<2x32xf32>
      %91 = arith.addf %89, %90 : vector<2x32xf32>
      %92 = math.tanh %91 : vector<2x32xf32>
      %93 = arith.mulf %88, %92 : vector<2x32xf32>
      %c0_52 = arith.constant 0 : index
      %c0_53 = arith.constant 0 : index
      %94 = vector.load %arg8[%c0_52, %c0_53] : memref<2x32xf32, #tpu.memory_space<vmem>>, vector<2x32xf32>
      tpu.vector_store %arg8[%c0_52, %c0_53], %93 {strides = array<i32>} : memref<2x32xf32, #tpu.memory_space<vmem>>, vector<2x32xf32>,
      %c0_54 = arith.constant 0 : index
      %c0_55 = arith.constant 0 : index
      %95 = vector.load %arg9[%c0_54, %c0_55] : memref<2x32xf32, #tpu.memory_space<vmem>>, vector<2x32xf32>
      tpu.vector_store %arg9[%c0_54, %c0_55], %91 {strides = array<i32>} : memref<2x32xf32, #tpu.memory_space<vmem>>, vector<2x32xf32>,
      %c0_56 = arith.constant 0 : index
      %c5 = arith.constant 5 : index
      %c0_57 = arith.constant 0 : index
      %c0_58 = arith.constant 0 : index
      %96 = vector.load %arg7[%c0_56, %c5, %c0_57, %c0_58] : memref<1x8x2x32xf32, #tpu.memory_space<vmem>>, vector<1x1x2x32xf32>
      %97 = vector.shape_cast %96 : vector<1x1x2x32xf32> to vector<2x32xf32>
      %98 = vector.shape_cast %93 : vector<2x32xf32> to vector<1x1x2x32xf32>
      tpu.vector_store %arg7[%c0_56, %c5, %c0_57, %c0_58], %98 {strides = array<i32>} : memref<1x8x2x32xf32, #tpu.memory_space<vmem>>, vector<1x1x2x32xf32>,
      %c0_59 = arith.constant 0 : index
      %c0_60 = arith.constant 0 : index
      %99 = vector.load %arg8[%c0_59, %c0_60] : memref<2x32xf32, #tpu.memory_space<vmem>>, vector<2x32xf32>
      %c0_61 = arith.constant 0 : index
      %c0_62 = arith.constant 0 : index
      %100 = vector.load %arg9[%c0_61, %c0_62] : memref<2x32xf32, #tpu.memory_space<vmem>>, vector<2x32xf32>
      %c8 = arith.constant 8 : index
      %c0_63 = arith.constant 0 : index
      %101 = vector.load %arg10[%c8, %c0_63] : memref<16x128xf32, #tpu.memory_space<vmem>>, vector<2x128xf32>
      %cst_64 = arith.constant dense<0.000000e+00> : vector<2x128xf32>
      %102 = tpu.matmul %99, %14, %cst_64 {dimension_numbers = #tpu.dot_dimension_numbers<[1], [0], [0], [1], [0, 0, 1, 1], [], []>} : vector<2x32xf32>, vector<32x128xf32>, vector<2x128xf32> -> vector<2x128xf32>
      %103 = arith.addf %101, %102 : vector<2x128xf32>
      %104 = vector.extract_strided_slice %103 {offsets = [0, 0], sizes = [2, 96], strides = [1, 1]} : vector<2x128xf32> to vector<2x96xf32>
      %105 = arith.negf %104 : vector<2x96xf32>
      %106 = math.exp %105 : vector<2x96xf32>
      %cst_65 = arith.constant 1.000000e+00 : f32
      %107 = vector.broadcast %cst_65 : f32 to vector<2x96xf32>
      %108 = arith.addf %107, %106 : vector<2x96xf32>
      %109 = arith.divf %107, %108 : vector<2x96xf32>
      %110 = vector.extract_strided_slice %103 {offsets = [0, 96], sizes = [2, 32], strides = [1, 1]} : vector<2x128xf32> to vector<2x32xf32>
      %111 = math.tanh %110 : vector<2x32xf32>
      %112 = vector.extract_strided_slice %109 {offsets = [0, 0], sizes = [2, 32], strides = [1, 1]} : vector<2x96xf32> to vector<2x32xf32>
      %113 = vector.extract_strided_slice %109 {offsets = [0, 32], sizes = [2, 32], strides = [1, 1]} : vector<2x96xf32> to vector<2x32xf32>
      %114 = vector.extract_strided_slice %109 {offsets = [0, 64], sizes = [2, 32], strides = [1, 1]} : vector<2x96xf32> to vector<2x32xf32>
      %115 = arith.mulf %113, %100 : vector<2x32xf32>
      %116 = arith.mulf %112, %111 : vector<2x32xf32>
      %117 = arith.addf %115, %116 : vector<2x32xf32>
      %118 = math.tanh %117 : vector<2x32xf32>
      %119 = arith.mulf %114, %118 : vector<2x32xf32>
      %c0_66 = arith.constant 0 : index
      %c0_67 = arith.constant 0 : index
      %120 = vector.load %arg8[%c0_66, %c0_67] : memref<2x32xf32, #tpu.memory_space<vmem>>, vector<2x32xf32>
      tpu.vector_store %arg8[%c0_66, %c0_67], %119 {strides = array<i32>} : memref<2x32xf32, #tpu.memory_space<vmem>>, vector<2x32xf32>,
      %c0_68 = arith.constant 0 : index
      %c0_69 = arith.constant 0 : index
      %121 = vector.load %arg9[%c0_68, %c0_69] : memref<2x32xf32, #tpu.memory_space<vmem>>, vector<2x32xf32>
      tpu.vector_store %arg9[%c0_68, %c0_69], %117 {strides = array<i32>} : memref<2x32xf32, #tpu.memory_space<vmem>>, vector<2x32xf32>,
      %c0_70 = arith.constant 0 : index
      %c4 = arith.constant 4 : index
      %c0_71 = arith.constant 0 : index
      %c0_72 = arith.constant 0 : index
      %122 = vector.load %arg7[%c0_70, %c4, %c0_71, %c0_72] : memref<1x8x2x32xf32, #tpu.memory_space<vmem>>, vector<1x1x2x32xf32>
      %123 = vector.shape_cast %122 : vector<1x1x2x32xf32> to vector<2x32xf32>
      %124 = vector.shape_cast %119 : vector<2x32xf32> to vector<1x1x2x32xf32>
      tpu.vector_store %arg7[%c0_70, %c4, %c0_71, %c0_72], %124 {strides = array<i32>} : memref<1x8x2x32xf32, #tpu.memory_space<vmem>>, vector<1x1x2x32xf32>,
      %c0_73 = arith.constant 0 : index
      %c0_74 = arith.constant 0 : index
      %125 = vector.load %arg8[%c0_73, %c0_74] : memref<2x32xf32, #tpu.memory_space<vmem>>, vector<2x32xf32>
      %c0_75 = arith.constant 0 : index
      %c0_76 = arith.constant 0 : index
      %126 = vector.load %arg9[%c0_75, %c0_76] : memref<2x32xf32, #tpu.memory_space<vmem>>, vector<2x32xf32>
      %c6_77 = arith.constant 6 : index
      %c0_78 = arith.constant 0 : index
      %127 = vector.load %arg10[%c6_77, %c0_78] : memref<16x128xf32, #tpu.memory_space<vmem>>, vector<2x128xf32>
      %cst_79 = arith.constant dense<0.000000e+00> : vector<2x128xf32>
      %128 = tpu.matmul %125, %14, %cst_79 {dimension_numbers = #tpu.dot_dimension_numbers<[1], [0], [0], [1], [0, 0, 1, 1], [], []>} : vector<2x32xf32>, vector<32x128xf32>, vector<2x128xf32> -> vector<2x128xf32>
      %129 = arith.addf %127, %128 : vector<2x128xf32>
      %130 = vector.extract_strided_slice %129 {offsets = [0, 0], sizes = [2, 96], strides = [1, 1]} : vector<2x128xf32> to vector<2x96xf32>
      %131 = arith.negf %130 : vector<2x96xf32>
      %132 = math.exp %131 : vector<2x96xf32>
      %cst_80 = arith.constant 1.000000e+00 : f32
      %133 = vector.broadcast %cst_80 : f32 to vector<2x96xf32>
      %134 = arith.addf %133, %132 : vector<2x96xf32>
      %135 = arith.divf %133, %134 : vector<2x96xf32>
      %136 = vector.extract_strided_slice %129 {offsets = [0, 96], sizes = [2, 32], strides = [1, 1]} : vector<2x128xf32> to vector<2x32xf32>
      %137 = math.tanh %136 : vector<2x32xf32>
      %138 = vector.extract_strided_slice %135 {offsets = [0, 0], sizes = [2, 32], strides = [1, 1]} : vector<2x96xf32> to vector<2x32xf32>
      %139 = vector.extract_strided_slice %135 {offsets = [0, 32], sizes = [2, 32], strides = [1, 1]} : vector<2x96xf32> to vector<2x32xf32>
      %140 = vector.extract_strided_slice %135 {offsets = [0, 64], sizes = [2, 32], strides = [1, 1]} : vector<2x96xf32> to vector<2x32xf32>
      %141 = arith.mulf %139, %126 : vector<2x32xf32>
      %142 = arith.mulf %138, %137 : vector<2x32xf32>
      %143 = arith.addf %141, %142 : vector<2x32xf32>
      %144 = math.tanh %143 : vector<2x32xf32>
      %145 = arith.mulf %140, %144 : vector<2x32xf32>
      %c0_81 = arith.constant 0 : index
      %c0_82 = arith.constant 0 : index
      %146 = vector.load %arg8[%c0_81, %c0_82] : memref<2x32xf32, #tpu.memory_space<vmem>>, vector<2x32xf32>
      tpu.vector_store %arg8[%c0_81, %c0_82], %145 {strides = array<i32>} : memref<2x32xf32, #tpu.memory_space<vmem>>, vector<2x32xf32>,
      %c0_83 = arith.constant 0 : index
      %c0_84 = arith.constant 0 : index
      %147 = vector.load %arg9[%c0_83, %c0_84] : memref<2x32xf32, #tpu.memory_space<vmem>>, vector<2x32xf32>
      tpu.vector_store %arg9[%c0_83, %c0_84], %143 {strides = array<i32>} : memref<2x32xf32, #tpu.memory_space<vmem>>, vector<2x32xf32>,
      %c0_85 = arith.constant 0 : index
      %c3 = arith.constant 3 : index
      %c0_86 = arith.constant 0 : index
      %c0_87 = arith.constant 0 : index
      %148 = vector.load %arg7[%c0_85, %c3, %c0_86, %c0_87] : memref<1x8x2x32xf32, #tpu.memory_space<vmem>>, vector<1x1x2x32xf32>
      %149 = vector.shape_cast %148 : vector<1x1x2x32xf32> to vector<2x32xf32>
      %150 = vector.shape_cast %145 : vector<2x32xf32> to vector<1x1x2x32xf32>
      tpu.vector_store %arg7[%c0_85, %c3, %c0_86, %c0_87], %150 {strides = array<i32>} : memref<1x8x2x32xf32, #tpu.memory_space<vmem>>, vector<1x1x2x32xf32>,
      %c0_88 = arith.constant 0 : index
      %c0_89 = arith.constant 0 : index
      %151 = vector.load %arg8[%c0_88, %c0_89] : memref<2x32xf32, #tpu.memory_space<vmem>>, vector<2x32xf32>
      %c0_90 = arith.constant 0 : index
      %c0_91 = arith.constant 0 : index
      %152 = vector.load %arg9[%c0_90, %c0_91] : memref<2x32xf32, #tpu.memory_space<vmem>>, vector<2x32xf32>
      %c4_92 = arith.constant 4 : index
      %c0_93 = arith.constant 0 : index
      %153 = vector.load %arg10[%c4_92, %c0_93] : memref<16x128xf32, #tpu.memory_space<vmem>>, vector<2x128xf32>
      %cst_94 = arith.constant dense<0.000000e+00> : vector<2x128xf32>
      %154 = tpu.matmul %151, %14, %cst_94 {dimension_numbers = #tpu.dot_dimension_numbers<[1], [0], [0], [1], [0, 0, 1, 1], [], []>} : vector<2x32xf32>, vector<32x128xf32>, vector<2x128xf32> -> vector<2x128xf32>
      %155 = arith.addf %153, %154 : vector<2x128xf32>
      %156 = vector.extract_strided_slice %155 {offsets = [0, 0], sizes = [2, 96], strides = [1, 1]} : vector<2x128xf32> to vector<2x96xf32>
      %157 = arith.negf %156 : vector<2x96xf32>
      %158 = math.exp %157 : vector<2x96xf32>
      %cst_95 = arith.constant 1.000000e+00 : f32
      %159 = vector.broadcast %cst_95 : f32 to vector<2x96xf32>
      %160 = arith.addf %159, %158 : vector<2x96xf32>
      %161 = arith.divf %159, %160 : vector<2x96xf32>
      %162 = vector.extract_strided_slice %155 {offsets = [0, 96], sizes = [2, 32], strides = [1, 1]} : vector<2x128xf32> to vector<2x32xf32>
      %163 = math.tanh %162 : vector<2x32xf32>
      %164 = vector.extract_strided_slice %161 {offsets = [0, 0], sizes = [2, 32], strides = [1, 1]} : vector<2x96xf32> to vector<2x32xf32>
      %165 = vector.extract_strided_slice %161 {offsets = [0, 32], sizes = [2, 32], strides = [1, 1]} : vector<2x96xf32> to vector<2x32xf32>
      %166 = vector.extract_strided_slice %161 {offsets = [0, 64], sizes = [2, 32], strides = [1, 1]} : vector<2x96xf32> to vector<2x32xf32>
      %167 = arith.mulf %165, %152 : vector<2x32xf32>
      %168 = arith.mulf %164, %163 : vector<2x32xf32>
      %169 = arith.addf %167, %168 : vector<2x32xf32>
      %170 = math.tanh %169 : vector<2x32xf32>
      %171 = arith.mulf %166, %170 : vector<2x32xf32>
      %c0_96 = arith.constant 0 : index
      %c0_97 = arith.constant 0 : index
      %172 = vector.load %arg8[%c0_96, %c0_97] : memref<2x32xf32, #tpu.memory_space<vmem>>, vector<2x32xf32>
      tpu.vector_store %arg8[%c0_96, %c0_97], %171 {strides = array<i32>} : memref<2x32xf32, #tpu.memory_space<vmem>>, vector<2x32xf32>,
      %c0_98 = arith.constant 0 : index
      %c0_99 = arith.constant 0 : index
      %173 = vector.load %arg9[%c0_98, %c0_99] : memref<2x32xf32, #tpu.memory_space<vmem>>, vector<2x32xf32>
      tpu.vector_store %arg9[%c0_98, %c0_99], %169 {strides = array<i32>} : memref<2x32xf32, #tpu.memory_space<vmem>>, vector<2x32xf32>,
      %c0_100 = arith.constant 0 : index
      %c2 = arith.constant 2 : index
      %c0_101 = arith.constant 0 : index
      %c0_102 = arith.constant 0 : index
      %174 = vector.load %arg7[%c0_100, %c2, %c0_101, %c0_102] : memref<1x8x2x32xf32, #tpu.memory_space<vmem>>, vector<1x1x2x32xf32>
      %175 = vector.shape_cast %174 : vector<1x1x2x32xf32> to vector<2x32xf32>
      %176 = vector.shape_cast %171 : vector<2x32xf32> to vector<1x1x2x32xf32>
      tpu.vector_store %arg7[%c0_100, %c2, %c0_101, %c0_102], %176 {strides = array<i32>} : memref<1x8x2x32xf32, #tpu.memory_space<vmem>>, vector<1x1x2x32xf32>,
      %c0_103 = arith.constant 0 : index
      %c0_104 = arith.constant 0 : index
      %177 = vector.load %arg8[%c0_103, %c0_104] : memref<2x32xf32, #tpu.memory_space<vmem>>, vector<2x32xf32>
      %c0_105 = arith.constant 0 : index
      %c0_106 = arith.constant 0 : index
      %178 = vector.load %arg9[%c0_105, %c0_106] : memref<2x32xf32, #tpu.memory_space<vmem>>, vector<2x32xf32>
      %c2_107 = arith.constant 2 : index
      %c0_108 = arith.constant 0 : index
      %179 = vector.load %arg10[%c2_107, %c0_108] : memref<16x128xf32, #tpu.memory_space<vmem>>, vector<2x128xf32>
      %cst_109 = arith.constant dense<0.000000e+00> : vector<2x128xf32>
      %180 = tpu.matmul %177, %14, %cst_109 {dimension_numbers = #tpu.dot_dimension_numbers<[1], [0], [0], [1], [0, 0, 1, 1], [], []>} : vector<2x32xf32>, vector<32x128xf32>, vector<2x128xf32> -> vector<2x128xf32>
      %181 = arith.addf %179, %180 : vector<2x128xf32>
      %182 = vector.extract_strided_slice %181 {offsets = [0, 0], sizes = [2, 96], strides = [1, 1]} : vector<2x128xf32> to vector<2x96xf32>
      %183 = arith.negf %182 : vector<2x96xf32>
      %184 = math.exp %183 : vector<2x96xf32>
      %cst_110 = arith.constant 1.000000e+00 : f32
      %185 = vector.broadcast %cst_110 : f32 to vector<2x96xf32>
      %186 = arith.addf %185, %184 : vector<2x96xf32>
      %187 = arith.divf %185, %186 : vector<2x96xf32>
      %188 = vector.extract_strided_slice %181 {offsets = [0, 96], sizes = [2, 32], strides = [1, 1]} : vector<2x128xf32> to vector<2x32xf32>
      %189 = math.tanh %188 : vector<2x32xf32>
      %190 = vector.extract_strided_slice %187 {offsets = [0, 0], sizes = [2, 32], strides = [1, 1]} : vector<2x96xf32> to vector<2x32xf32>
      %191 = vector.extract_strided_slice %187 {offsets = [0, 32], sizes = [2, 32], strides = [1, 1]} : vector<2x96xf32> to vector<2x32xf32>
      %192 = vector.extract_strided_slice %187 {offsets = [0, 64], sizes = [2, 32], strides = [1, 1]} : vector<2x96xf32> to vector<2x32xf32>
      %193 = arith.mulf %191, %178 : vector<2x32xf32>
      %194 = arith.mulf %190, %189 : vector<2x32xf32>
      %195 = arith.addf %193, %194 : vector<2x32xf32>
      %196 = math.tanh %195 : vector<2x32xf32>
      %197 = arith.mulf %192, %196 : vector<2x32xf32>
      %c0_111 = arith.constant 0 : index
      %c0_112 = arith.constant 0 : index
      %198 = vector.load %arg8[%c0_111, %c0_112] : memref<2x32xf32, #tpu.memory_space<vmem>>, vector<2x32xf32>
      tpu.vector_store %arg8[%c0_111, %c0_112], %197 {strides = array<i32>} : memref<2x32xf32, #tpu.memory_space<vmem>>, vector<2x32xf32>,
      %c0_113 = arith.constant 0 : index
      %c0_114 = arith.constant 0 : index
      %199 = vector.load %arg9[%c0_113, %c0_114] : memref<2x32xf32, #tpu.memory_space<vmem>>, vector<2x32xf32>
      tpu.vector_store %arg9[%c0_113, %c0_114], %195 {strides = array<i32>} : memref<2x32xf32, #tpu.memory_space<vmem>>, vector<2x32xf32>,
      %c0_115 = arith.constant 0 : index
      %c1 = arith.constant 1 : index
      %c0_116 = arith.constant 0 : index
      %c0_117 = arith.constant 0 : index
      %200 = vector.load %arg7[%c0_115, %c1, %c0_116, %c0_117] : memref<1x8x2x32xf32, #tpu.memory_space<vmem>>, vector<1x1x2x32xf32>
      %201 = vector.shape_cast %200 : vector<1x1x2x32xf32> to vector<2x32xf32>
      %202 = vector.shape_cast %197 : vector<2x32xf32> to vector<1x1x2x32xf32>
      tpu.vector_store %arg7[%c0_115, %c1, %c0_116, %c0_117], %202 {strides = array<i32>} : memref<1x8x2x32xf32, #tpu.memory_space<vmem>>, vector<1x1x2x32xf32>,
      %c0_118 = arith.constant 0 : index
      %c0_119 = arith.constant 0 : index
      %203 = vector.load %arg8[%c0_118, %c0_119] : memref<2x32xf32, #tpu.memory_space<vmem>>, vector<2x32xf32>
      %c0_120 = arith.constant 0 : index
      %c0_121 = arith.constant 0 : index
      %204 = vector.load %arg9[%c0_120, %c0_121] : memref<2x32xf32, #tpu.memory_space<vmem>>, vector<2x32xf32>
      %c0_122 = arith.constant 0 : index
      %c0_123 = arith.constant 0 : index
      %205 = vector.load %arg10[%c0_122, %c0_123] : memref<16x128xf32, #tpu.memory_space<vmem>>, vector<2x128xf32>
      %cst_124 = arith.constant dense<0.000000e+00> : vector<2x128xf32>
      %206 = tpu.matmul %203, %14, %cst_124 {dimension_numbers = #tpu.dot_dimension_numbers<[1], [0], [0], [1], [0, 0, 1, 1], [], []>} : vector<2x32xf32>, vector<32x128xf32>, vector<2x128xf32> -> vector<2x128xf32>
      %207 = arith.addf %205, %206 : vector<2x128xf32>
      %208 = vector.extract_strided_slice %207 {offsets = [0, 0], sizes = [2, 96], strides = [1, 1]} : vector<2x128xf32> to vector<2x96xf32>
      %209 = arith.negf %208 : vector<2x96xf32>
      %210 = math.exp %209 : vector<2x96xf32>
      %cst_125 = arith.constant 1.000000e+00 : f32
      %211 = vector.broadcast %cst_125 : f32 to vector<2x96xf32>
      %212 = arith.addf %211, %210 : vector<2x96xf32>
      %213 = arith.divf %211, %212 : vector<2x96xf32>
      %214 = vector.extract_strided_slice %207 {offsets = [0, 96], sizes = [2, 32], strides = [1, 1]} : vector<2x128xf32> to vector<2x32xf32>
      %215 = math.tanh %214 : vector<2x32xf32>
      %216 = vector.extract_strided_slice %213 {offsets = [0, 0], sizes = [2, 32], strides = [1, 1]} : vector<2x96xf32> to vector<2x32xf32>
      %217 = vector.extract_strided_slice %213 {offsets = [0, 32], sizes = [2, 32], strides = [1, 1]} : vector<2x96xf32> to vector<2x32xf32>
      %218 = vector.extract_strided_slice %213 {offsets = [0, 64], sizes = [2, 32], strides = [1, 1]} : vector<2x96xf32> to vector<2x32xf32>
      %219 = arith.mulf %217, %204 : vector<2x32xf32>
      %220 = arith.mulf %216, %215 : vector<2x32xf32>
      %221 = arith.addf %219, %220 : vector<2x32xf32>
      %222 = math.tanh %221 : vector<2x32xf32>
      %223 = arith.mulf %218, %222 : vector<2x32xf32>
      %c0_126 = arith.constant 0 : index
      %c0_127 = arith.constant 0 : index
      %224 = vector.load %arg8[%c0_126, %c0_127] : memref<2x32xf32, #tpu.memory_space<vmem>>, vector<2x32xf32>
      tpu.vector_store %arg8[%c0_126, %c0_127], %223 {strides = array<i32>} : memref<2x32xf32, #tpu.memory_space<vmem>>, vector<2x32xf32>,
      %c0_128 = arith.constant 0 : index
      %c0_129 = arith.constant 0 : index
      %225 = vector.load %arg9[%c0_128, %c0_129] : memref<2x32xf32, #tpu.memory_space<vmem>>, vector<2x32xf32>
      tpu.vector_store %arg9[%c0_128, %c0_129], %221 {strides = array<i32>} : memref<2x32xf32, #tpu.memory_space<vmem>>, vector<2x32xf32>,
      %c0_130 = arith.constant 0 : index
      %c0_131 = arith.constant 0 : index
      %c0_132 = arith.constant 0 : index
      %c0_133 = arith.constant 0 : index
      %226 = vector.load %arg7[%c0_130, %c0_131, %c0_132, %c0_133] : memref<1x8x2x32xf32, #tpu.memory_space<vmem>>, vector<1x1x2x32xf32>
      %227 = vector.shape_cast %226 : vector<1x1x2x32xf32> to vector<2x32xf32>
      %228 = vector.shape_cast %223 : vector<2x32xf32> to vector<1x1x2x32xf32>
      tpu.vector_store %arg7[%c0_130, %c0_131, %c0_132, %c0_133], %228 {strides = array<i32>} : memref<1x8x2x32xf32, #tpu.memory_space<vmem>>, vector<1x1x2x32xf32>,
    } else {
    }
    return
  }
  func.func @transform_0(%arg0: i32, %arg1: i32, %arg2: i32) -> (i32, i32, i32) {
    %c2_i32 = arith.constant 2 : i32
    %0 = arith.muli %c2_i32, %arg2 : i32
    %c0_i32 = arith.constant 0 : i32
    %1 = arith.subi %c0_i32, %0 : i32
    %2 = arith.muli %arg0, %1 : i32
    %3 = arith.addi %arg2, %2 : i32
    %c0_i32_0 = arith.constant 0 : i32
    %c0_i32_1 = arith.constant 0 : i32
    return %arg1, %3, %c0_i32_0 : i32, i32, i32
  }
  func.func @transform_1(%arg0: i32, %arg1: i32, %arg2: i32) -> (i32, i32, i32) {
    %c0_i32 = arith.constant 0 : i32
    %c0_i32_0 = arith.constant 0 : i32
    %c0_i32_1 = arith.constant 0 : i32
    return %arg0, %c0_i32, %c0_i32_0 : i32, i32, i32
  }
  func.func @transform_2(%arg0: i32, %arg1: i32, %arg2: i32) -> (i32, i32, i32) {
    %c0_i32 = arith.constant 0 : i32
    %c0_i32_0 = arith.constant 0 : i32
    %c0_i32_1 = arith.constant 0 : i32
    return %arg0, %c0_i32, %c0_i32_0 : i32, i32, i32
  }
  func.func @transform_3(%arg0: i32, %arg1: i32, %arg2: i32) -> (i32, i32, i32) {
    %c0_i32 = arith.constant 0 : i32
    %c0_i32_0 = arith.constant 0 : i32
    %c0_i32_1 = arith.constant 0 : i32
    return %arg0, %c0_i32, %c0_i32_0 : i32, i32, i32
  }
  func.func @transform_4(%arg0: i32, %arg1: i32, %arg2: i32) -> (i32, i32, i32, i32) {
    %c2_i32 = arith.constant 2 : i32
    %0 = arith.muli %c2_i32, %arg2 : i32
    %c0_i32 = arith.constant 0 : i32
    %1 = arith.subi %c0_i32, %0 : i32
    %2 = arith.muli %arg0, %1 : i32
    %3 = arith.addi %arg2, %2 : i32
    %c0_i32_0 = arith.constant 0 : i32
    %c0_i32_1 = arith.constant 0 : i32
    return %arg0, %3, %arg1, %c0_i32_0 : i32, i32, i32, i32
  }
}

</mosaic_0001>

<bundles_post_ra>
// kernel: tpu_custom_call.1
= control target key start
LH: loop header
LB: loop body
LE: loop exit
PB: predicated region body
PF: predicated region fallthrough
CT: control target
= control target key end

     0   :  { %9 = vsyncpa [#allocation6], 0  ;;  %s3908_s0 = inlined_call_operand.hbm [shape: f32[1,16,16], index: 0, kind: input, shape index: {}]   ;;  %s3909_s1 = inlined_call_operand.hbm [shape: f32[2,16,128], index: 1, kind: input, shape index: {}]   ;;  %s3910_s2 = inlined_call_operand.hbm [shape: f32[2,32,128], index: 2, kind: input, shape index: {}]   ;;  %s3911_s3 = inlined_call_operand.vmem [shape: f32[2,1,128], index: 3, kind: input, shape index: {}]   ;;  %s3912_s4 = inlined_call_operand.hbm [shape: f32[2,8,2,32], index: 4, kind: output, shape index: {}]  }
   0x1   :  { %11 = vsyncpa [#allocation6 + $0x1], 0 }
   0x2   :  { %12 = vsyncpa [#allocation9], 0 }
   0x3   :  { %13 = vsyncpa [#allocation7], 0 }
   0x4   :  { %15 = vsyncpa [#allocation7 + $0x1], 0  ;;  %s3354_s15 = smov 0   ;;  %s3356_s16 = smov 0  }
   0x5   :  { %s3358_s17 = smov 0   ;;  %s3360_s18 = smov 0  }
   0x6   :  { %s3362_s19 = smov 0   ;;  %s3364_s20 = smov 0  }
   0x7 LB: > { %s2469_s21 = sadd.s32 4294967295, %s3306_s20   ;;  %s2470_s22 = sadd.s32 4294967294, %s3306_s20   ;;  %s3306_s20 = sphi %s3364_s20, %s21_s20   ;;  %s3302_s19 = sphi %s3362_s19, %s3939_s19   ;;  %s3298_s18 = sphi %s3360_s18, %s3938_s18   ;;  %s3294_s17 = sphi %s3358_s17, %s3937_s17   ;;  %s3290_s16 = sphi %s3356_s16, %s3936_s16   ;;  %s3286_s15 = sphi %s3354_s15, %s3935_s15  }
   0x8   : > { %s40_s23 = sadd.s32 1, %s3302_s19  ;;  %s83_s24 = sadd.s32 1, %s3294_s17 }
   0x9   : > { %p42_p0 = scmp.ge.s32.totalorder %s40_s23, 2  ;;  %p96_p1 = scmp.ne.s32.totalorder %s3290_s16, %s3286_s15 }
   0xa   : > { %p3390_p2 = scmp.eq.s32.totalorder %s2469_s21, 0  ;;  %p183_p3 = scmp.ne.s32.totalorder %s3294_s17, %s3290_s16 }
   0xb   : > { %s3941_s23 = smov (%p42_p0, %s40_s23), 0  ;;  %p184_p5 = scmp.eq.s32.totalorder %s2469_s21, 1 }
   0xc   : > { %s3920_s25 = scalar_select %p3390_p2, 1, 0 }
   0xd   : > { %p3400_p4 = por %p3390_p2, %p96_p1  ;;  %s80_s27 = ssub.s32 %s3302_s19, %s3941_s23 }
   0xe   : > { %p190_p6 = scmp.eq.s32.totalorder %s2470_s22, 1  ;;  %p81_p7 = scmp.eq.s32.totalorder %s80_s27, 0 }
   0xf   : > { %s3921_s26 = scalar_select %p3400_p4, 1, 0 }
  0x10   : > { %p3406_p8 = por %p184_p5, %p183_p3  ;;  %p3410_p9 = por %p190_p6, %p96_p1 }
  0x11   : > { %p2471_p10 = scmp.ge.s32.totalorder %s3306_s20, 1  ;;  %p197_p11 = scmp.lt.s32.totalorder %s3306_s20, 3 }
  0x12   : > { %s3922_s28 = scalar_select %p3406_p8, 1, 0 }
  0x13   : > { %s3923_s29 = scalar_select %p3410_p9, 1, 0 }
  0x14   : > { %s3416_s30 = scalar_select %p81_p7, %s3294_s17, %s83_s24  }
  0x15   : > { %s3913_s5 = sshll.u32 %s3298_s18, 8  ;;  %p3427_p12 = pnand %p2471_p10, %p197_p11 }
  0x16   : > { %s3425_s8 = scalar_lea.hbm %s3909_s1, %s3913_s5  ;;  %s3308_s10 = smov [#allocation8]  }
  0x17   : > { %s3924_s9 = scalar_select %p3427_p12, 1, 0 }
  0x18   : > { %s212_s11 = sshll.u32 %s3308_s10, 4  ;;  %p2917_p13 = pneg %p3427_p12  ;;  %s3431_s11 = int_to_ptr.vmem [resolvable:$true] %s212_s11 }
  0x19   : > { %s2538_s12 = sshll.u32 %s3298_s18, 9  ;;  %s3309_s24 = smov [#allocation10]  }
  0x1a   : > { %p3439_p1 = pnand %p2917_p13, %p3400_p4  ;;  %s3446_s22 = scalar_lea.hbm %s3910_s2, %s2538_s12 }
  0x1b   : > { %s3448_s27 = sshll.u32 %s3309_s24, 4  ;;  %s3132_s6 = scalar_lea.hbm %s3425_s8, 256  ;;  %s229_s27 = int_to_ptr.vmem [resolvable:$true] %s3448_s27 }
  0x1c   : > { %p3133_p3 = scmp.ne.s32.totalorder %s3425_s8, %s3132_s6  ;;  %p3134_p5 = pneg %p3439_p1 }
  0x1d   : > { %s3137_s5 = scalar_lea.hbm %s3909_s1, 512  ;;  %p3138_p10 = scmp.lt.u32.totalorder %s3425_s8, %s3909_s1 }
  0x1e   : > { %p3135_p6 = pnand %p3134_p5, %p3133_p3  ;;  %p3139_p11 = scmp.lt.u32.totalorder %s3137_s5, %s3132_s6 }
  0x1f   : > { %p3141_p0 = scmp.lt.u32.totalorder %s3132_s6, %s3425_s8 }
  0x20   : > { %p3136_p7 = pneg %p3135_p6  ;;  %p3140_p13 = por %p3139_p11, %p3138_p10 }
  0x22   : > { %p3142_p9 = por %p3141_p0, %p3140_p13 }
  0x24   : > { %p3143_p8 = pnand %p3142_p9, %p3136_p7 }
  0x26   : > { %3146 = shalt.err (!%p3143_p8)
}
  0x27   : > { %s3147_s12 = scalar_lea.vmem %s3431_s11, 256  ;;  %p3155_p2 = scmp.lt.s32.totalorder %s3431_s11, %s3431_s11 }
  0x28   : > { %p3148_p3 = scmp.ne.s32.totalorder %s3431_s11, %s3147_s12  ;;  %p3156_p12 = scmp.lt.s32.totalorder %s3147_s12, %s3147_s12 }
  0x2a   : > { %p3150_p6 = pnand %p3148_p3, %p3134_p5  ;;  %p3157_p10 = por %p3156_p12, %p3155_p2 }
  0x2c   : > { %p3151_p4 = pneg %p3150_p6 }
  0x2e   : > { %p3158_p11 = pnand %p3157_p10, %p3151_p4 }
  0x30   : > { %3161 = shalt.err (!%p3158_p11)
}
  0x31   : > { %s3310_s5 = smov 128   ;;  %s3311_s24 = smov 8  }
  0x32   : > { %2920 = dma.hbm_to_vmem [thread:$0]  (!%p3439_p1), %s3425_s8, 256, %s3431_s11, [#allocation9], %s3310_s5, %s3310_s5, %s3311_s24  }
  0x33   : > { %s3162_s6 = scalar_lea.hbm %s3446_s22, 512  ;;  %s3167_s14 = scalar_lea.hbm %s3910_s2, 1024 }
  0x34   : > { %p3163_p4 = scmp.ne.s32.totalorder %s3446_s22, %s3162_s6  ;;  %p3168_p12 = scmp.lt.u32.totalorder %s3446_s22, %s3910_s2 }
  0x35   : > { %p3169_p0 = scmp.lt.u32.totalorder %s3167_s14, %s3162_s6  ;;  %p3171_p13 = scmp.lt.u32.totalorder %s3162_s6, %s3446_s22 }
  0x36   : > { %p3165_p8 = pnand %p3163_p4, %p3134_p5 }
  0x37   : > { %p3170_p7 = por %p3169_p0, %p3168_p12 }
  0x38   : > { %p3166_p9 = pneg %p3165_p8 }
  0x39   : > { %p3172_p3 = por %p3171_p13, %p3170_p7 }
  0x3b   : > { %p3173_p6 = pnand %p3172_p3, %p3166_p9 }
  0x3d   : > { %3176 = shalt.err (!%p3173_p6)
}
  0x3e   : > { %s3177_s8 = scalar_lea.vmem %s229_s27, 512  ;;  %p3185_p8 = scmp.lt.s32.totalorder %s229_s27, %s229_s27 }
  0x3f   : > { %p3178_p10 = scmp.ne.s32.totalorder %s229_s27, %s3177_s8  ;;  %p3186_p2 = scmp.lt.s32.totalorder %s3177_s8, %s3177_s8 }
  0x41   : > { %p3180_p11 = pnand %p3178_p10, %p3134_p5  ;;  %p3187_p0 = por %p3186_p2, %p3185_p8 }
  0x43   : > { %p3181_p4 = pneg %p3180_p11 }
  0x45   : > { %p3188_p12 = pnand %p3187_p0, %p3181_p4 }
  0x47   : > { %3191 = shalt.err (!%p3188_p12)
}
  0x48   : > { %2923 = dma.hbm_to_vmem [thread:$0]  (!%p3439_p1), %s3446_s22, 512, %s229_s27, [#allocation9], %s3310_s5, %s3310_s5, %s3311_s24  }
  0x49   : > { %p2933_p9 = scmp.eq.s32.totalorder %s3306_s20, 0  ;;  %s3312_s11 = smov [#allocation5]  }
  0x4a   : > { %s265_s6 = sshll.u32 %s3312_s11, 4  ;;  %p3926_p5 = scmp.lt.s32.totalorder %s3306_s20, 2  ;;  %s266_s6 = int_to_ptr.vmem [resolvable:$true] %s265_s6 }
  0x4b   : > { %s3192_s13 = scalar_lea.hbm %s3908_s0, 256 }
  0x4c   : > { %p3506_p7 = pnand %p2933_p9, %p3926_p5  ;;  %p3193_p2 = scmp.ne.s32.totalorder %s3908_s0, %s3192_s13 }
  0x4d   : > { %p3199_p6 = scmp.lt.u32.totalorder %s3192_s13, %s3908_s0 }
  0x4e   : > { %p3194_p1 = pneg %p3506_p7 }
  0x50   : > { %p3195_p13 = pnand %p3194_p1, %p3193_p2 }
  0x52   : > { %p3196_p3 = pneg %p3195_p13 }
  0x54   : > { %p3201_p10 = pnand %p3199_p6, %p3196_p3 }
  0x56   : > { %3204 = shalt.err (!%p3201_p10)
}
  0x57   : > { %s3205_s8 = scalar_lea.vmem %s266_s6, 256  ;;  %s3212_s11 = scalar_lea.vmem %s266_s6, 512 }
  0x58   : > { %p3206_p11 = scmp.ne.s32.totalorder %s266_s6, %s3205_s8  ;;  %p3213_p0 = scmp.lt.s32.totalorder %s266_s6, %s266_s6 }
  0x59   : > { %p3214_p12 = scmp.lt.s32.totalorder %s3212_s11, %s3205_s8 }
  0x5a   : > { %p3208_p4 = pnand %p3206_p11, %p3194_p1 }
  0x5b   : > { %p3215_p9 = por %p3214_p12, %p3213_p0 }
  0x5c   : > { %p3209_p8 = pneg %p3208_p4 }
  0x5e   : > { %p3216_p5 = pnand %p3215_p9, %p3209_p8 }
  0x60   : > { %3219 = shalt.err (!%p3216_p5)
}
  0x61   : > { %2927 = dma.hbm_to_vmem [thread:$0]  (!%p3506_p7), %s3908_s0, 256, %s266_s6, [#allocation6], %s3310_s5, %s3310_s5, %s3311_s24  }
  0x62   : > { %p3928_p2 = scmp.ne.s32.totalorder %s3924_s9, 0 }
  0x63   : > { %p3929_p1 = scmp.ne.s32.totalorder (!%p3928_p2), %s3920_s25, 0 }
  0x64   : > { %277 = sbr.rel (%p3928_p2) target bundleno = 11715 (0x2dc3), region = 36 }
  0x6b   : > { %3273 = dma.done.wait (%p3929_p1), [#allocation6], 256  }
  0x6c   : > { %3275 = vsyncadd (%p3929_p1), [#allocation6], 4294967040  ;;  %p3930_p13 = scmp.ne.s32.totalorder %s3921_s26, 0 }
  0x6e   : > { %3277 = dma.done.wait (%p3930_p13), [#allocation9], 768  }
  0x6f   : > { %3279 = vsyncadd (%p3930_p13), [#allocation9], 4294966528  ;;  %vm336_vm0 = vcmask 254976   ;;  %s316_s7 = sand.u32 1, %s3290_s16   ;;  %v3313_v0 = vmov 0.0   ;;  %v3544_v1 = vld [vmem:[#allocation10] sm:$0xff] }
  0x70   : > { %337 = vst.msk [vmem:[#allocation2] sm:$0x3] %vm336_vm0, %v3313_v0  ;;  %338 = vst.msk [vmem:[#allocation3] sm:$0x3] %vm336_vm0, %v3313_v0  ;;  %s2480_s9 = sshll.u32 %s316_s7, 4  ;;  %v3546_v2 = vld [vmem:[#allocation10 + $0x8] sm:$0xff] }
  0x71   : > { %v3548_v3 = vld [vmem:[#allocation10 + $0x10] sm:$0xff]  ;;  %vm350_vm1 = vcmask 130048   ;;  %v3550_v4 = vld [vmem:[#allocation10 + $0x18] sm:$0xff]  ;;  %p324_p7 = scmp.lt.s32.totalorder %s3298_s18, 1  ;;  %s3557_s6 = scalar_lea.vmem [#allocation11], %s2480_s9 }
  0x72   : > { %v341_v5 = vld [vmem:[#allocation8] sm:$0xff]  ;;  %v342_v6 = vld [vmem:[#allocation8 + $0x8] sm:$0xff]  ;;  %p2484_p3 = scmp.ne.s32.totalorder %s3298_s18, 0 }
  0x73   : > { %v2807_v7 = vpack.c.bf16 %v342_v6, %v341_v5  ;;  %v339_v8 = vld [vmem:[#allocation5] sm:$0xff]  ;;  %v340_v9 = vld [vmem:[#allocation5 + $0x8] sm:$0xff]  ;;  %s325_s25 = scalar_select %p324_p7, %s3298_s18, 1 }
  0x74   : > { %2628 = vmatprep.mubr.msk.f32.mxu0 %vm350_vm1, %v339_v8  ;;  %v3562_v15 = vpack.c.bf16 (!%p2484_p3), %v3546_v2, %v3544_v1  ;;  %v3314_v16 = vmov (!%p2484_p3), 0.0|0.0   ;;  %v3569_v17 = vpack.c.bf16 (!%p2484_p3), %v3550_v4, %v3548_v3  ;;  %vm3315_vm2 = vmmov (!%p2484_p3), 0   ;;  %s3317_s13 = smov (!%p2484_p3), 32   ;;  %s3318_s21 = smov (!%p2484_p3), 96  }
  0x75   : > { %2808 = vmatprep.subr.bf16.mxu0 %v2807_v7  ;;  %s326_s24 = scalar_lea.vmem %s3911_s3, %s325_s25  ;;  %2817 = vmatprep.subr.bf16.mxu1 (!%p2484_p3), %v3314_v16  ;;  %v3316_v18 = vmov (!%p2484_p3), 0.0   ;;  %vm445_vm3 = vcmask (!%p2484_p3), 261120   ;;  %s3319_s12 = smov (!%p2484_p3), 64  }
  0x76   : > { %2810 = vmatpush3.bf16.msra.mxu0 %v2807_v7  ;;  %v2481_v10 = vld [vmem:[%s326_s24] ss:$0 sm:$0xff]  ;;  %2819 = vmatpush3.bf16.msra.mxu1 (!%p2484_p3), %v3562_v15 }
  0x77   : > { %2811 = vmatprep.subr.bf16.mxu0 (!%p2484_p3), %v3314_v16  ;;  %2820 = vmatprep.subr.bf16.mxu1 (!%p2484_p3), %v3314_v16  ;;  %v442_v19 = vld [vmem:[#allocation2] sm:$0x3] (!%p2484_p3)  ;;  %v443_v25 = vld [vmem:[#allocation3] sm:$0x3] (!%p2484_p3) }
  0x78   : > { %2650 = vmatprep.mubr.msk.f32.mxu1 (!%p2484_p3), %vm3315_vm2, %v3316_v18 }
  0x79   : > { %2629 = vmatmul.mubr.msk.f32.vlgmr.msra.gmra.mrb[0].mxu0 %vm350_vm1, %v340_v9 }
  0x7a   : > { %2813 = vmatpush3.bf16.msra.mxu0 (!%p2484_p3), %v3562_v15  ;;  %2639 = vmatprep.mubr.msk.f32.mxu0 (!%p2484_p3), %vm3315_vm2, %v3316_v18 }
  0x7b   : > { %2814 = vmatprep.subr.bf16.mxu0 (!%p2484_p3), %v3314_v16  ;;  %2822 = vmatpush3.bf16.msra.mxu1 (!%p2484_p3), %v3569_v17 }
  0x7c   : > { %2829 = vmatprep.subr.bf16.mxu1 (!%p2484_p3), %v3314_v16 }
  0x7e   : > { %2816 = vmatpush3.bf16.msra.mxu0 (!%p2484_p3), %v3569_v17 }
  0x7f   : > { %2823 = vmatprep.subr.bf16.mxu0 (!%p2484_p3), %v3314_v16 }
 0x14a   : > { %441 = sbr.rel (%p2484_p3) target bundleno = 6006 (0x1776), region = 56 }
 0x14c   : > { %v2630_v11 = vpop.f32.mrb[0].mxu0 }
 0x14d   : > { %v429_v12 = vadd.f32 %v2630_v11, %v2481_v10  ;;  %v423_v13 = vpop.f32.mrb[1].mxu0  ;;  %2640 = vmatmul.mubr.msk.f32.vlgmr.msra.gmra.mrb[0].mxu0 (!%p2484_p3), %vm445_vm3, %v442_v19 }
 0x14e   : > { %v424_v14 = vadd.f32 %v2481_v10, %v423_v13  ;;  %2825 = vmatpush3.bf16.msra.mxu0 (!%p2484_p3), %v3562_v15  ;;  %2661 = vmatprep.mubr.msk.f32.mxu0 (!%p2484_p3), %vm3315_vm2, %v3316_v18 }
 0x14f   : > { %433 = vst [vmem:[#allocation4 + $0x8] sm:$0xff] %v429_v12  ;;  %2826 = vmatprep.subr.bf16.mxu0 (!%p2484_p3), %v3314_v16 }
 0x150   : > { %432 = vst [vmem:[#allocation4] sm:$0xff] %v424_v14 }
 0x152   : > { %2828 = vmatpush3.bf16.msra.mxu0 %v3569_v17 }
 0x153   : > { %2835 = vmatprep.subr.bf16.mxu0 %v3314_v16 }
 0x157   : > { %v444_v20 = vld [vmem:[#allocation4] sm:$0x3]  ;;  %v562_v43 = vld [vmem:[#allocation4 + $0x2] sm:$0x3]  ;;  %v679_v5 = vld [vmem:[#allocation4 + $0x4] sm:$0x3] }
 0x220   : > { %v515_v21 = vpop.f32.mrb[0].mxu0 }
 0x221   : > { %v519_v22 = vadd.f32 %v515_v21, %v444_v20  ;;  %v2641_v23 = vpop.f32.mrb[1].mxu0 }
 0x223   : > { %3004 = vtanh.f32 %v519_v22  ;;  %v2486_v26 = vmul.f32 -1.442695, %v519_v22 }
 0x225   : > { %3006 = vpow2.f32 %v2486_v26 }
 0x22d   : > { %v3005_v24 = vpop.eup %3004 }
 0x22e   : > { %533 = vrot.lane.b32.xlu0 %v3005_v24, %s3317_s13 }
 0x22f   : > { %v3007_v27 = vpop.eup %3006 }
 0x230   : > { %v523_v28 = vadd.f32 1.0, %v3007_v27 }
 0x232   : > { %528 = vrot.lane.b32.xlu0 %v443_v25, %s3317_s13  ;;  %3008 = vrcp.f32 %v523_v28 }
 0x23c   : > { %v3009_v29 = vpop.eup %3008 }
 0x2a0   : > { %v534_v30 = vpop.permute.xlu0 %533 }
 0x2a1   : > { %v536_v31 = vmul.f32 %v3009_v29, %v534_v30 }
 0x2a3   : > { %538 = vrot.lane.b32.xlu1 %v536_v31, %s3317_s13  ;;  %v796_v31 = vld [vmem:[#allocation4 + $0x6] sm:$0x3] }
 0x2a4   : > { %v529_v32 = vpop.permute.xlu0 %528 }
 0x2a5   : > { %v531_v33 = vmul.f32 %v3009_v29, %v529_v32 }
 0x315   : > { %v539_v34 = vpop.permute.xlu1 %538 }
 0x316   : > { %v541_v35 = vadd.f32 %v539_v34, %v531_v33 }
 0x318   : > { %3010 = vtanh.f32 %v541_v35 }
 0x322   : > { %v3011_v36 = vpop.eup %3010 }
 0x323   : > { %544 = vrot.lane.b32.xlu1 %v3011_v36, %s3317_s13 }
 0x327   : > { %555 = vrot.lane.b32.xlu1 %v541_v35, %s3318_s21 }
 0x395   : > { %v545_v37 = vpop.permute.xlu1 %544 }
 0x396   : > { %v547_v38 = vmul.f32 %v3009_v29, %v545_v37 }
 0x398   : > { %549 = vrot.lane.b32.xlu0 %v547_v38, %s3319_s12 }
 0x399   : > { %v556_v39 = vpop.permute.xlu1 %555 }
 0x39a   : > { %558 = vst.msk [vmem:[#allocation3] sm:$0x3] %vm336_vm0, %v556_v39 }
 0x3a1   : > { %v561_v40 = vld [vmem:[#allocation3] sm:$0x3] }
 0x3a2   : > { %645 = vrot.lane.b32.xlu1 %v561_v40, %s3317_s13 }
 0x40a   : > { %v550_v41 = vpop.permute.xlu0 %549 }
 0x40b   : > { %553 = vst.msk [vmem:[#allocation2] sm:$0x3] %vm336_vm0, %v550_v41  ;;  %559 = vst.msk [vmem:[%s3557_s6] sm:$0x3] %vm336_vm0, %v550_v41 }
 0x412   : > { %v560_v42 = vld [vmem:[#allocation2] sm:$0x3] }
 0x413   : > { %2651 = vmatmul.mubr.msk.f32.vlgmr.msra.gmra.mrb[0].mxu1 %vm445_vm3, %v560_v42 }
 0x414   : > { %2831 = vmatpush3.bf16.msra.mxu1 %v3562_v15  ;;  %2672 = vmatprep.mubr.msk.f32.mxu1 %vm3315_vm2, %v3316_v18  ;;  %v646_v54 = vpop.permute.xlu1 %645 }
 0x415   : > { %2832 = vmatprep.subr.bf16.mxu1 %v3314_v16 }
 0x418   : > { %2834 = vmatpush3.bf16.msra.mxu1 %v3569_v17 }
 0x419   : > { %2841 = vmatprep.subr.bf16.mxu1 %v3314_v16 }
 0x4e6   : > { %v632_v44 = vpop.f32.mrb[0].mxu1 }
 0x4e7   : > { %v636_v45 = vadd.f32 %v632_v44, %v562_v43  ;;  %v2652_v46 = vpop.f32.mrb[1].mxu1 }
 0x4e9   : > { %3012 = vtanh.f32 %v636_v45  ;;  %v2488_v48 = vmul.f32 -1.442695, %v636_v45 }
 0x4eb   : > { %3014 = vpow2.f32 %v2488_v48 }
 0x4f3   : > { %v3013_v47 = vpop.eup %3012 }
 0x4f4   : > { %650 = vrot.lane.b32.xlu0 %v3013_v47, %s3317_s13 }
 0x4f5   : > { %v3015_v49 = vpop.eup %3014 }
 0x4f6   : > { %v640_v50 = vadd.f32 1.0, %v3015_v49 }
 0x4f8   : > { %3016 = vrcp.f32 %v640_v50 }
 0x502   : > { %v3017_v51 = vpop.eup %3016 }
 0x503   : > { %v648_v55 = vmul.f32 %v3017_v51, %v646_v54 }
 0x566   : > { %v651_v52 = vpop.permute.xlu0 %650 }
 0x567   : > { %v653_v53 = vmul.f32 %v3017_v51, %v651_v52 }
 0x569   : > { %655 = vrot.lane.b32.xlu0 %v653_v53, %s3317_s13  ;;  %v913_v53 = vld [vmem:[#allocation4 + $0x8] sm:$0x3] }
 0x5db   : > { %v656_v56 = vpop.permute.xlu0 %655 }
 0x5dc   : > { %v658_v57 = vadd.f32 %v656_v56, %v648_v55 }
 0x5de   : > { %3018 = vtanh.f32 %v658_v57 }
 0x5e8   : > { %v3019_v58 = vpop.eup %3018 }
 0x5e9   : > { %661 = vrot.lane.b32.xlu1 %v3019_v58, %s3317_s13 }
 0x5ed   : > { %671 = vrot.lane.b32.xlu1 %v658_v57, %s3318_s21 }
 0x65b   : > { %v662_v59 = vpop.permute.xlu1 %661 }
 0x65c   : > { %v664_v60 = vmul.f32 %v3017_v51, %v662_v59 }
 0x65e   : > { %666 = vrot.lane.b32.xlu0 %v664_v60, %s3319_s12 }
 0x65f   : > { %v672_v61 = vpop.permute.xlu1 %671 }
 0x660   : > { %674 = vst.msk [vmem:[#allocation3] sm:$0x3] %vm336_vm0, %v672_v61 }
 0x667   : > { %v678_v62 = vld [vmem:[#allocation3] sm:$0x3] }
 0x668   : > { %762 = vrot.lane.b32.xlu1 %v678_v62, %s3317_s13 }
 0x6d0   : > { %v667_v63 = vpop.permute.xlu0 %666 }
 0x6d1   : > { %669 = vst.msk [vmem:[#allocation2] sm:$0x3] %vm336_vm0, %v667_v63  ;;  %2489 = vst.msk [vmem:[%s3557_s6 + $0x2] sm:$0x3] %vm336_vm0, %v667_v63 }
 0x6d8   : > { %v677_v0 = vld [vmem:[#allocation2] sm:$0x3] }
 0x6d9   : > { %2662 = vmatmul.mubr.msk.f32.vlgmr.msra.gmra.mrb[2].mxu0 %vm445_vm3, %v677_v0 }
 0x6da   : > { %2837 = vmatpush3.bf16.msra.mxu0 %v3562_v15  ;;  %2683 = vmatprep.mubr.msk.f32.mxu0 %vm3315_vm2, %v3316_v18  ;;  %v763_v20 = vpop.permute.xlu1 %762 }
 0x6db   : > { %2838 = vmatprep.subr.bf16.mxu0 %v3314_v16 }
 0x6de   : > { %2840 = vmatpush3.bf16.msra.mxu0 %v3569_v17 }
 0x6df   : > { %2847 = vmatprep.subr.bf16.mxu0 %v3314_v16 }
 0x7ac   : > { %v749_v6 = vpop.f32.mrb[2].mxu0 }
 0x7ad   : > { %v753_v7 = vadd.f32 %v749_v6, %v679_v5  ;;  %v2663_v8 = vpop.f32.mrb[3].mxu0 }
 0x7af   : > { %3020 = vtanh.f32 %v753_v7  ;;  %v2491_v10 = vmul.f32 -1.442695, %v753_v7 }
 0x7b1   : > { %3022 = vpow2.f32 %v2491_v10 }
 0x7b9   : > { %v3021_v9 = vpop.eup %3020 }
 0x7ba   : > { %767 = vrot.lane.b32.xlu0 %v3021_v9, %s3317_s13 }
 0x7bb   : > { %v3023_v11 = vpop.eup %3022 }
 0x7bc   : > { %v757_v12 = vadd.f32 1.0, %v3023_v11 }
 0x7be   : > { %3024 = vrcp.f32 %v757_v12 }
 0x7c8   : > { %v3025_v13 = vpop.eup %3024 }
 0x7c9   : > { %v765_v21 = vmul.f32 %v3025_v13, %v763_v20 }
 0x82c   : > { %v768_v14 = vpop.permute.xlu0 %767 }
 0x82d   : > { %v770_v19 = vmul.f32 %v3025_v13, %v768_v14 }
 0x82f   : > { %772 = vrot.lane.b32.xlu0 %v770_v19, %s3317_s13  ;;  %v1030_v19 = vld [vmem:[#allocation4 + $0xa] sm:$0x3] }
 0x8a1   : > { %v773_v22 = vpop.permute.xlu0 %772 }
 0x8a2   : > { %v775_v23 = vadd.f32 %v773_v22, %v765_v21 }
 0x8a4   : > { %3026 = vtanh.f32 %v775_v23 }
 0x8ae   : > { %v3027_v24 = vpop.eup %3026 }
 0x8af   : > { %778 = vrot.lane.b32.xlu1 %v3027_v24, %s3317_s13 }
 0x8b3   : > { %788 = vrot.lane.b32.xlu1 %v775_v23, %s3318_s21 }
 0x921   : > { %v779_v25 = vpop.permute.xlu1 %778 }
 0x922   : > { %v781_v26 = vmul.f32 %v3025_v13, %v779_v25 }
 0x924   : > { %783 = vrot.lane.b32.xlu0 %v781_v26, %s3319_s12 }
 0x925   : > { %v789_v27 = vpop.permute.xlu1 %788 }
 0x926   : > { %791 = vst.msk [vmem:[#allocation3] sm:$0x3] %vm336_vm0, %v789_v27 }
 0x92d   : > { %v795_v28 = vld [vmem:[#allocation3] sm:$0x3] }
 0x92e   : > { %879 = vrot.lane.b32.xlu1 %v795_v28, %s3317_s13 }
 0x996   : > { %v784_v29 = vpop.permute.xlu0 %783 }
 0x997   : > { %786 = vst.msk [vmem:[#allocation2] sm:$0x3] %vm336_vm0, %v784_v29  ;;  %2492 = vst.msk [vmem:[%s3557_s6 + $0x4] sm:$0x3] %vm336_vm0, %v784_v29 }
 0x99e   : > { %v794_v30 = vld [vmem:[#allocation2] sm:$0x3] }
 0x99f   : > { %2673 = vmatmul.mubr.msk.f32.vlgmr.msra.gmra.mrb[2].mxu1 %vm445_vm3, %v794_v30 }
 0x9a0   : > { %2843 = vmatpush3.bf16.msra.mxu1 %v3562_v15  ;;  %2694 = vmatprep.mubr.msk.f32.mxu1 %vm3315_vm2, %v3316_v18  ;;  %v880_v42 = vpop.permute.xlu1 %879 }
 0x9a1   : > { %2844 = vmatprep.subr.bf16.mxu1 %v3314_v16 }
 0x9a4   : > { %2846 = vmatpush3.bf16.msra.mxu1 %v3569_v17 }
 0x9a5   : > { %2853 = vmatprep.subr.bf16.mxu1 %v3314_v16 }
 0xa72   : > { %v866_v32 = vpop.f32.mrb[2].mxu1 }
 0xa73   : > { %v870_v33 = vadd.f32 %v866_v32, %v796_v31  ;;  %v2674_v34 = vpop.f32.mrb[3].mxu1 }
 0xa75   : > { %3028 = vtanh.f32 %v870_v33  ;;  %v2494_v36 = vmul.f32 -1.442695, %v870_v33 }
 0xa77   : > { %3030 = vpow2.f32 %v2494_v36 }
 0xa7f   : > { %v3029_v35 = vpop.eup %3028 }
 0xa80   : > { %884 = vrot.lane.b32.xlu0 %v3029_v35, %s3317_s13 }
 0xa81   : > { %v3031_v37 = vpop.eup %3030 }
 0xa82   : > { %v874_v38 = vadd.f32 1.0, %v3031_v37  ;;  %v1147_v37 = vld [vmem:[#allocation4 + $0xc] sm:$0x3] }
 0xa84   : > { %3032 = vrcp.f32 %v874_v38 }
 0xa8e   : > { %v3033_v39 = vpop.eup %3032 }
 0xa8f   : > { %v882_v43 = vmul.f32 %v3033_v39, %v880_v42 }
 0xaf2   : > { %v885_v40 = vpop.permute.xlu0 %884 }
 0xaf3   : > { %v887_v41 = vmul.f32 %v3033_v39, %v885_v40 }
 0xaf5   : > { %889 = vrot.lane.b32.xlu0 %v887_v41, %s3317_s13 }
 0xb67   : > { %v890_v44 = vpop.permute.xlu0 %889 }
 0xb68   : > { %v892_v45 = vadd.f32 %v890_v44, %v882_v43 }
 0xb6a   : > { %3034 = vtanh.f32 %v892_v45 }
 0xb74   : > { %v3035_v46 = vpop.eup %3034 }
 0xb75   : > { %895 = vrot.lane.b32.xlu1 %v3035_v46, %s3317_s13 }
 0xb79   : > { %905 = vrot.lane.b32.xlu1 %v892_v45, %s3318_s21 }
 0xbe7   : > { %v896_v47 = vpop.permute.xlu1 %895 }
 0xbe8   : > { %v898_v48 = vmul.f32 %v3033_v39, %v896_v47 }
 0xbea   : > { %900 = vrot.lane.b32.xlu0 %v898_v48, %s3319_s12 }
 0xbeb   : > { %v906_v49 = vpop.permute.xlu1 %905 }
 0xbec   : > { %908 = vst.msk [vmem:[#allocation3] sm:$0x3] %vm336_vm0, %v906_v49 }
 0xbf3   : > { %v912_v50 = vld [vmem:[#allocation3] sm:$0x3] }
 0xbf4   : > { %996 = vrot.lane.b32.xlu1 %v912_v50, %s3317_s13 }
 0xc5c   : > { %v901_v51 = vpop.permute.xlu0 %900 }
 0xc5d   : > { %903 = vst.msk [vmem:[#allocation2] sm:$0x3] %vm336_vm0, %v901_v51  ;;  %2495 = vst.msk [vmem:[%s3557_s6 + $0x6] sm:$0x3] %vm336_vm0, %v901_v51 }
 0xc64   : > { %v911_v52 = vld [vmem:[#allocation2] sm:$0x3] }
 0xc65   : > { %2684 = vmatmul.mubr.msk.f32.vlgmr.msra.gmra.mrb[4].mxu0 %vm445_vm3, %v911_v52 }
 0xc66   : > { %2849 = vmatpush3.bf16.msra.mxu0 %v3562_v15  ;;  %2705 = vmatprep.mubr.msk.f32.mxu0 %vm3315_vm2, %v3316_v18  ;;  %v997_v0 = vpop.permute.xlu1 %996 }
 0xc67   : > { %2850 = vmatprep.subr.bf16.mxu0 %v3314_v16 }
 0xc6a   : > { %2852 = vmatpush3.bf16.msra.mxu0 %v3569_v17 }
 0xd38   : > { %v983_v54 = vpop.f32.mrb[4].mxu0 }
 0xd39   : > { %v987_v55 = vadd.f32 %v983_v54, %v913_v53  ;;  %v2685_v56 = vpop.f32.mrb[5].mxu0 }
 0xd3b   : > { %3036 = vtanh.f32 %v987_v55  ;;  %v2497_v58 = vmul.f32 -1.442695, %v987_v55 }
 0xd3d   : > { %3038 = vpow2.f32 %v2497_v58 }
 0xd45   : > { %v3037_v57 = vpop.eup %3036 }
 0xd46   : > { %1001 = vrot.lane.b32.xlu0 %v3037_v57, %s3317_s13 }
 0xd47   : > { %v3039_v59 = vpop.eup %3038 }
 0xd48   : > { %v991_v60 = vadd.f32 1.0, %v3039_v59  ;;  %v1264_v59 = vld [vmem:[#allocation4 + $0xe] sm:$0x3] }
 0xd4a   : > { %3040 = vrcp.f32 %v991_v60 }
 0xd54   : > { %v3041_v61 = vpop.eup %3040 }
 0xd55   : > { %v999_v5 = vmul.f32 %v3041_v61, %v997_v0 }
 0xdb8   : > { %v1002_v62 = vpop.permute.xlu0 %1001 }
 0xdb9   : > { %v1004_v63 = vmul.f32 %v3041_v61, %v1002_v62 }
 0xdbb   : > { %1006 = vrot.lane.b32.xlu0 %v1004_v63, %s3317_s13 }
 0xe2d   : > { %v1007_v6 = vpop.permute.xlu0 %1006 }
 0xe2e   : > { %v1009_v7 = vadd.f32 %v1007_v6, %v999_v5 }
 0xe30   : > { %3042 = vtanh.f32 %v1009_v7 }
 0xe3a   : > { %v3043_v8 = vpop.eup %3042 }
 0xe3b   : > { %1012 = vrot.lane.b32.xlu1 %v3043_v8, %s3317_s13 }
 0xe3f   : > { %1022 = vrot.lane.b32.xlu1 %v1009_v7, %s3318_s21 }
 0xead   : > { %v1013_v9 = vpop.permute.xlu1 %1012 }
 0xeae   : > { %v1015_v10 = vmul.f32 %v3041_v61, %v1013_v9 }
 0xeb0   : > { %1017 = vrot.lane.b32.xlu0 %v1015_v10, %s3319_s12 }
 0xeb1   : > { %v1023_v11 = vpop.permute.xlu1 %1022 }
 0xeb2   : > { %1025 = vst.msk [vmem:[#allocation3] sm:$0x3] %vm336_vm0, %v1023_v11 }
 0xeb9   : > { %v1029_v12 = vld [vmem:[#allocation3] sm:$0x3] }
 0xeba   : > { %1113 = vrot.lane.b32.xlu1 %v1029_v12, %s3317_s13 }
 0xf22   : > { %v1018_v13 = vpop.permute.xlu0 %1017 }
 0xf23   : > { %1020 = vst.msk [vmem:[#allocation2] sm:$0x3] %vm336_vm0, %v1018_v13  ;;  %2498 = vst.msk [vmem:[%s3557_s6 + $0x8] sm:$0x3] %vm336_vm0, %v1018_v13 }
 0xf2a   : > { %v1028_v14 = vld [vmem:[#allocation2] sm:$0x3] }
 0xf2b   : > { %2695 = vmatmul.mubr.msk.f32.vlgmr.msra.gmra.mrb[4].mxu1 %vm445_vm3, %v1028_v14 }
 0xf2c   : > { %2855 = vmatpush3.bf16.msra.mxu1 %v3562_v15  ;;  %2716 = vmatprep.mubr.msk.f32.mxu1 %vm3315_vm2, %v3316_v18 }
 0xf2d   : > { %2856 = vmatprep.subr.bf16.mxu1 %v3314_v16  ;;  %v1114_v16 = vpop.permute.xlu1 %1113 }
 0xf30   : > { %2858 = vmatpush3.bf16.msra.mxu1 %v3569_v17 }
 0xffe   : > { %v1100_v20 = vpop.f32.mrb[4].mxu1 }
 0xfff   : > { %v1104_v21 = vadd.f32 %v1100_v20, %v1030_v19  ;;  %v2696_v22 = vpop.f32.mrb[5].mxu1 }
0x1001   : > { %3044 = vtanh.f32 %v1104_v21  ;;  %v2500_v24 = vmul.f32 -1.442695, %v1104_v21 }
0x1003   : > { %3046 = vpow2.f32 %v2500_v24 }
0x100b   : > { %v3045_v23 = vpop.eup %3044 }
0x100c   : > { %1118 = vrot.lane.b32.xlu0 %v3045_v23, %s3317_s13 }
0x100d   : > { %v3047_v25 = vpop.eup %3046 }
0x100e   : > { %v1108_v26 = vadd.f32 1.0, %v3047_v25 }
0x1010   : > { %3048 = vrcp.f32 %v1108_v26 }
0x101a   : > { %v3049_v15 = vpop.eup %3048 }
0x101b   : > { %v1116_v17 = vmul.f32 %v3049_v15, %v1114_v16 }
0x107e   : > { %v1119_v27 = vpop.permute.xlu0 %1118 }
0x107f   : > { %v1121_v18 = vmul.f32 %v3049_v15, %v1119_v27 }
0x1081   : > { %1123 = vrot.lane.b32.xlu0 %v1121_v18, %s3317_s13 }
0x10f3   : > { %v1124_v28 = vpop.permute.xlu0 %1123 }
0x10f4   : > { %v1126_v29 = vadd.f32 %v1124_v28, %v1116_v17 }
0x10f6   : > { %3050 = vtanh.f32 %v1126_v29 }
0x1100   : > { %v3051_v30 = vpop.eup %3050 }
0x1101   : > { %1129 = vrot.lane.b32.xlu1 %v3051_v30, %s3317_s13 }
0x1105   : > { %1139 = vrot.lane.b32.xlu1 %v1126_v29, %s3318_s21 }
0x1173   : > { %v1130_v31 = vpop.permute.xlu1 %1129 }
0x1174   : > { %v1132_v32 = vmul.f32 %v3049_v15, %v1130_v31 }
0x1176   : > { %1134 = vrot.lane.b32.xlu0 %v1132_v32, %s3319_s12 }
0x1177   : > { %v1140_v33 = vpop.permute.xlu1 %1139 }
0x1178   : > { %1142 = vst.msk [vmem:[#allocation3] sm:$0x3] %vm336_vm0, %v1140_v33 }
0x117f   : > { %v1146_v34 = vld [vmem:[#allocation3] sm:$0x3] }
0x1180   : > { %1230 = vrot.lane.b32.xlu1 %v1146_v34, %s3317_s13 }
0x11e8   : > { %v1135_v35 = vpop.permute.xlu0 %1134 }
0x11e9   : > { %1137 = vst.msk [vmem:[#allocation2] sm:$0x3] %vm336_vm0, %v1135_v35  ;;  %2501 = vst.msk [vmem:[%s3557_s6 + $0xa] sm:$0x3] %vm336_vm0, %v1135_v35 }
0x11f0   : > { %v1145_v36 = vld [vmem:[#allocation2] sm:$0x3] }
0x11f1   : > { %2706 = vmatmul.mubr.msk.f32.vlgmr.msra.gmra.mrb[6].mxu0 %vm445_vm3, %v1145_v36 }
0x11f2   : > { %v1231_v48 = vpop.permute.xlu1 %1230 }
0x12c4   : > { %v1217_v38 = vpop.f32.mrb[6].mxu0 }
0x12c5   : > { %v1221_v39 = vadd.f32 %v1217_v38, %v1147_v37  ;;  %v2707_v40 = vpop.f32.mrb[7].mxu0 }
0x12c7   : > { %3052 = vtanh.f32 %v1221_v39  ;;  %v2503_v42 = vmul.f32 -1.442695, %v1221_v39 }
0x12c9   : > { %3054 = vpow2.f32 %v2503_v42 }
0x12d1   : > { %v3053_v41 = vpop.eup %3052 }
0x12d2   : > { %1235 = vrot.lane.b32.xlu0 %v3053_v41, %s3317_s13 }
0x12d3   : > { %v3055_v43 = vpop.eup %3054 }
0x12d4   : > { %v1225_v44 = vadd.f32 1.0, %v3055_v43 }
0x12d6   : > { %3056 = vrcp.f32 %v1225_v44 }
0x12e0   : > { %v3057_v45 = vpop.eup %3056 }
0x12e1   : > { %v1233_v49 = vmul.f32 %v3057_v45, %v1231_v48 }
0x1344   : > { %v1236_v46 = vpop.permute.xlu0 %1235 }
0x1345   : > { %v1238_v47 = vmul.f32 %v3057_v45, %v1236_v46 }
0x1347   : > { %1240 = vrot.lane.b32.xlu0 %v1238_v47, %s3317_s13 }
0x13b9   : > { %v1241_v50 = vpop.permute.xlu0 %1240 }
0x13ba   : > { %v1243_v51 = vadd.f32 %v1241_v50, %v1233_v49 }
0x13bc   : > { %3058 = vtanh.f32 %v1243_v51 }
0x13c6   : > { %v3059_v52 = vpop.eup %3058 }
0x13c7   : > { %1246 = vrot.lane.b32.xlu1 %v3059_v52, %s3317_s13 }
0x13cb   : > { %1256 = vrot.lane.b32.xlu1 %v1243_v51, %s3318_s21 }
0x1439   : > { %v1247_v53 = vpop.permute.xlu1 %1246 }
0x143a   : > { %v1249_v54 = vmul.f32 %v3057_v45, %v1247_v53 }
0x143c   : > { %1251 = vrot.lane.b32.xlu0 %v1249_v54, %s3319_s12 }
0x143d   : > { %v1257_v55 = vpop.permute.xlu1 %1256 }
0x143e   : > { %1259 = vst.msk [vmem:[#allocation3] sm:$0x3] %vm336_vm0, %v1257_v55 }
0x1445   : > { %v1263_v56 = vld [vmem:[#allocation3] sm:$0x3] }
0x1446   : > { %1347 = vrot.lane.b32.xlu1 %v1263_v56, %s3317_s13 }
0x14ae   : > { %v1252_v57 = vpop.permute.xlu0 %1251 }
0x14af   : > { %1254 = vst.msk [vmem:[#allocation2] sm:$0x3] %vm336_vm0, %v1252_v57  ;;  %2504 = vst.msk [vmem:[%s3557_s6 + $0xc] sm:$0x3] %vm336_vm0, %v1252_v57 }
0x14b6   : > { %v1262_v58 = vld [vmem:[#allocation2] sm:$0x3] }
0x14b7   : > { %2717 = vmatmul.mubr.msk.f32.vlgmr.msra.gmra.mrb[6].mxu1 %vm445_vm3, %v1262_v58 }
0x14b8   : > { %v1348_v10 = vpop.permute.xlu1 %1347 }
0x158a   : > { %v1334_v60 = vpop.f32.mrb[6].mxu1 }
0x158b   : > { %v1338_v61 = vadd.f32 %v1334_v60, %v1264_v59  ;;  %v2718_v62 = vpop.f32.mrb[7].mxu1 }
0x158d   : > { %3060 = vtanh.f32 %v1338_v61  ;;  %v2506_v0 = vmul.f32 -1.442695, %v1338_v61 }
0x158f   : > { %3062 = vpow2.f32 %v2506_v0 }
0x1597   : > { %v3061_v63 = vpop.eup %3060 }
0x1598   : > { %1352 = vrot.lane.b32.xlu0 %v3061_v63, %s3317_s13 }
0x1599   : > { %v3063_v5 = vpop.eup %3062 }
0x159a   : > { %v1342_v6 = vadd.f32 1.0, %v3063_v5 }
0x159c   : > { %3064 = vrcp.f32 %v1342_v6 }
0x15a6   : > { %v3065_v7 = vpop.eup %3064 }
0x15a7   : > { %v1350_v11 = vmul.f32 %v3065_v7, %v1348_v10 }
0x160a   : > { %v1353_v8 = vpop.permute.xlu0 %1352 }
0x160b   : > { %v1355_v9 = vmul.f32 %v3065_v7, %v1353_v8 }
0x160d   : > { %1357 = vrot.lane.b32.xlu0 %v1355_v9, %s3317_s13 }
0x167f   : > { %v1358_v12 = vpop.permute.xlu0 %1357 }
0x1680   : > { %v1360_v13 = vadd.f32 %v1358_v12, %v1350_v11 }
0x1682   : > { %3066 = vtanh.f32 %v1360_v13 }
0x168c   : > { %v3067_v14 = vpop.eup %3066 }
0x168d   : > { %1363 = vrot.lane.b32.xlu1 %v3067_v14, %s3317_s13 }
0x1691   : > { %1373 = vrot.lane.b32.xlu1 %v1360_v13, %s3318_s21 }
0x16ff   : > { %v1364_v19 = vpop.permute.xlu1 %1363 }
0x1700   : > { %v1366_v20 = vmul.f32 %v3065_v7, %v1364_v19 }
0x1702   : > { %1368 = vrot.lane.b32.xlu0 %v1366_v20, %s3319_s12 }
0x1703   : > { %v1374_v21 = vpop.permute.xlu1 %1373 }
0x1704   : > { %1376 = vst.msk [vmem:[#allocation3] sm:$0x3] %vm336_vm0, %v1374_v21 }
0x1774   : > { %v1369_v22 = vpop.permute.xlu0 %1368 }
0x1775   : > { %1371 = vst.msk [vmem:[#allocation2] sm:$0x3] %vm336_vm0, %v1369_v22  ;;  %2507 = vst.msk [vmem:[%s3557_s6 + $0xe] sm:$0x3] %vm336_vm0, %v1369_v22 }
0x1776 PF: > { %p2508_p6 = scmp.ne.s32.totalorder %s3298_s18, 1 }
0x1777   : > { %v3707_v23 = vpack.c.bf16 (!%p2508_p6), %v3546_v2, %v3544_v1  ;;  %v3320_v24 = vmov (!%p2508_p6), 0.0|0.0   ;;  %v3714_v25 = vpack.c.bf16 (!%p2508_p6), %v3550_v4, %v3548_v3  ;;  %vm3321_vm4 = vmmov (!%p2508_p6), 0   ;;  %s3323_s22 = smov (!%p2508_p6), 32   ;;  %v1384_v18 = vld [vmem:[#allocation3] sm:$0x3] (!%p2508_p6)  ;;  %s3324_s27 = smov (!%p2508_p6), 96  }
0x1778   : > { %1382 = sbr.rel (%p2508_p6) target bundleno = 11689 (0x2da9), region = 60  ;;  %2859 = vmatprep.subr.bf16.mxu0 (!%p2508_p6), %v3320_v24  ;;  %2865 = vmatprep.subr.bf16.mxu1 (!%p2508_p6), %v3320_v24  ;;  %v3322_v26 = vmov (!%p2508_p6), 0.0   ;;  %vm1386_vm5 = vcmask (!%p2508_p6), 261120   ;;  %s3325_s8 = smov (!%p2508_p6), 64  }
0x1779   : > { %2861 = vmatpush3.bf16.msra.mxu0 (!%p2508_p6), %v3707_v23  ;;  %2727 = vmatprep.mubr.msk.f32.mxu0 (!%p2508_p6), %vm3321_vm4, %v3322_v26 }
0x177a   : > { %2862 = vmatprep.subr.bf16.mxu0 (!%p2508_p6), %v3320_v24  ;;  %2867 = vmatpush3.bf16.msra.mxu1 (!%p2508_p6), %v3707_v23 }
0x177b   : > { %2868 = vmatprep.subr.bf16.mxu1 (!%p2508_p6), %v3320_v24  ;;  %2738 = vmatprep.mubr.msk.f32.mxu1 (!%p2508_p6), %vm3321_vm4, %v3322_v26  ;;  %v1385_v2 = vld [vmem:[#allocation4 + $0xe] sm:$0x3] (!%p2508_p6)  ;;  %v1504_v43 = vld [vmem:[#allocation4 + $0xc] sm:$0x3] (!%p2508_p6)  ;;  %v1621_v5 = vld [vmem:[#allocation4 + $0xa] sm:$0x3] (!%p2508_p6) }
0x177c   : > { %v1383_v1 = vld [vmem:[#allocation2] sm:$0x3] (!%p2508_p6) }
0x177d   : > { %2864 = vmatpush3.bf16.msra.mxu0 (!%p2508_p6), %v3714_v25 }
0x177e   : > { %2870 = vmatpush3.bf16.msra.mxu1 (!%p2508_p6), %v3714_v25  ;;  %2871 = vmatprep.subr.bf16.mxu0 (!%p2508_p6), %v3320_v24 }
0x177f   : > { %2877 = vmatprep.subr.bf16.mxu1 %v3320_v24 }
0x1780   : > { %2728 = vmatmul.mubr.msk.f32.vlgmr.msra.gmra.mrb[0].mxu0 %vm1386_vm5, %v1383_v1 }
0x1781   : > { %2873 = vmatpush3.bf16.msra.mxu0 %v3707_v23  ;;  %2749 = vmatprep.mubr.msk.f32.mxu0 %vm3321_vm4, %v3322_v26 }
0x1782   : > { %2874 = vmatprep.subr.bf16.mxu0 %v3320_v24 }
0x1785   : > { %2876 = vmatpush3.bf16.msra.mxu0 %v3714_v25 }
0x1786   : > { %2883 = vmatprep.subr.bf16.mxu0 %v3320_v24 }
0x1853   : > { %v1456_v3 = vpop.f32.mrb[0].mxu0 }
0x1854   : > { %v1460_v4 = vadd.f32 %v1456_v3, %v1385_v2  ;;  %v2729_v15 = vpop.f32.mrb[1].mxu0 }
0x1856   : > { %3068 = vtanh.f32 %v1460_v4  ;;  %v2510_v16 = vmul.f32 -1.442695, %v1460_v4 }
0x1858   : > { %3070 = vpow2.f32 %v2510_v16 }
0x1860   : > { %v3069_v27 = vpop.eup %3068 }
0x1861   : > { %1474 = vrot.lane.b32.xlu0 %v3069_v27, %s3323_s22 }
0x1862   : > { %v3071_v17 = vpop.eup %3070 }
0x1863   : > { %v1464_v28 = vadd.f32 1.0, %v3071_v17  ;;  %v1738_v17 = vld [vmem:[#allocation4 + $0x8] sm:$0x3] }
0x1865   : > { %1469 = vrot.lane.b32.xlu0 %v1384_v18, %s3323_s22  ;;  %3072 = vrcp.f32 %v1464_v28 }
0x186f   : > { %v3073_v29 = vpop.eup %3072 }
0x18d3   : > { %v1475_v30 = vpop.permute.xlu0 %1474 }
0x18d4   : > { %v1477_v31 = vmul.f32 %v3073_v29, %v1475_v30 }
0x18d6   : > { %1479 = vrot.lane.b32.xlu1 %v1477_v31, %s3323_s22 }
0x18d7   : > { %v1470_v32 = vpop.permute.xlu0 %1469 }
0x18d8   : > { %v1472_v33 = vmul.f32 %v3073_v29, %v1470_v32 }
0x1948   : > { %v1480_v34 = vpop.permute.xlu1 %1479 }
0x1949   : > { %v1482_v35 = vadd.f32 %v1480_v34, %v1472_v33 }
0x194b   : > { %3074 = vtanh.f32 %v1482_v35 }
0x1955   : > { %v3075_v36 = vpop.eup %3074 }
0x1956   : > { %1485 = vrot.lane.b32.xlu1 %v3075_v36, %s3323_s22 }
0x195a   : > { %1496 = vrot.lane.b32.xlu1 %v1482_v35, %s3324_s27 }
0x19c8   : > { %v1486_v37 = vpop.permute.xlu1 %1485 }
0x19c9   : > { %v1488_v38 = vmul.f32 %v3073_v29, %v1486_v37 }
0x19cb   : > { %1490 = vrot.lane.b32.xlu0 %v1488_v38, %s3325_s8 }
0x19cc   : > { %v1497_v39 = vpop.permute.xlu1 %1496 }
0x19cd   : > { %1499 = vst.msk [vmem:[#allocation3] sm:$0x3] %vm336_vm0, %v1497_v39 }
0x19d4   : > { %v1503_v40 = vld [vmem:[#allocation3] sm:$0x3] }
0x19d5   : > { %1587 = vrot.lane.b32.xlu1 %v1503_v40, %s3323_s22 }
0x1a3d   : > { %v1491_v41 = vpop.permute.xlu0 %1490 }
0x1a3e   : > { %1494 = vst.msk [vmem:[#allocation2] sm:$0x3] %vm336_vm0, %v1491_v41  ;;  %2511 = vst.msk [vmem:[%s3557_s6 + $0xe] sm:$0x3] %vm336_vm0, %v1491_v41 }
0x1a45   : > { %v1502_v42 = vld [vmem:[#allocation2] sm:$0x3] }
0x1a46   : > { %2739 = vmatmul.mubr.msk.f32.vlgmr.msra.gmra.mrb[0].mxu1 %vm1386_vm5, %v1502_v42 }
0x1a47   : > { %2879 = vmatpush3.bf16.msra.mxu1 %v3707_v23  ;;  %2760 = vmatprep.mubr.msk.f32.mxu1 %vm3321_vm4, %v3322_v26  ;;  %v1588_v54 = vpop.permute.xlu1 %1587 }
0x1a48   : > { %2880 = vmatprep.subr.bf16.mxu1 %v3320_v24 }
0x1a4b   : > { %2882 = vmatpush3.bf16.msra.mxu1 %v3714_v25 }
0x1a4c   : > { %2889 = vmatprep.subr.bf16.mxu1 %v3320_v24 }
0x1b19   : > { %v1574_v44 = vpop.f32.mrb[0].mxu1 }
0x1b1a   : > { %v1578_v45 = vadd.f32 %v1574_v44, %v1504_v43  ;;  %v2740_v46 = vpop.f32.mrb[1].mxu1 }
0x1b1c   : > { %3076 = vtanh.f32 %v1578_v45  ;;  %v2513_v48 = vmul.f32 -1.442695, %v1578_v45 }
0x1b1e   : > { %3078 = vpow2.f32 %v2513_v48 }
0x1b26   : > { %v3077_v47 = vpop.eup %3076 }
0x1b27   : > { %1592 = vrot.lane.b32.xlu0 %v3077_v47, %s3323_s22 }
0x1b28   : > { %v3079_v49 = vpop.eup %3078 }
0x1b29   : > { %v1582_v50 = vadd.f32 1.0, %v3079_v49  ;;  %v1855_v49 = vld [vmem:[#allocation4 + $0x6] sm:$0x3] }
0x1b2b   : > { %3080 = vrcp.f32 %v1582_v50 }
0x1b35   : > { %v3081_v51 = vpop.eup %3080 }
0x1b36   : > { %v1590_v55 = vmul.f32 %v3081_v51, %v1588_v54 }
0x1b99   : > { %v1593_v52 = vpop.permute.xlu0 %1592 }
0x1b9a   : > { %v1595_v53 = vmul.f32 %v3081_v51, %v1593_v52 }
0x1b9c   : > { %1597 = vrot.lane.b32.xlu0 %v1595_v53, %s3323_s22 }
0x1c0e   : > { %v1598_v56 = vpop.permute.xlu0 %1597 }
0x1c0f   : > { %v1600_v57 = vadd.f32 %v1598_v56, %v1590_v55 }
0x1c11   : > { %3082 = vtanh.f32 %v1600_v57 }
0x1c1b   : > { %v3083_v58 = vpop.eup %3082 }
0x1c1c   : > { %1603 = vrot.lane.b32.xlu1 %v3083_v58, %s3323_s22 }
0x1c20   : > { %1613 = vrot.lane.b32.xlu1 %v1600_v57, %s3324_s27 }
0x1c8e   : > { %v1604_v59 = vpop.permute.xlu1 %1603 }
0x1c8f   : > { %v1606_v60 = vmul.f32 %v3081_v51, %v1604_v59 }
0x1c91   : > { %1608 = vrot.lane.b32.xlu0 %v1606_v60, %s3325_s8 }
0x1c92   : > { %v1614_v61 = vpop.permute.xlu1 %1613 }
0x1c93   : > { %1616 = vst.msk [vmem:[#allocation3] sm:$0x3] %vm336_vm0, %v1614_v61 }
0x1c9a   : > { %v1620_v62 = vld [vmem:[#allocation3] sm:$0x3] }
0x1c9b   : > { %1704 = vrot.lane.b32.xlu1 %v1620_v62, %s3323_s22 }
0x1d03   : > { %v1609_v63 = vpop.permute.xlu0 %1608 }
0x1d04   : > { %1611 = vst.msk [vmem:[#allocation2] sm:$0x3] %vm336_vm0, %v1609_v63  ;;  %2514 = vst.msk [vmem:[%s3557_s6 + $0xc] sm:$0x3] %vm336_vm0, %v1609_v63 }
0x1d0b   : > { %v1619_v0 = vld [vmem:[#allocation2] sm:$0x3] }
0x1d0c   : > { %2750 = vmatmul.mubr.msk.f32.vlgmr.msra.gmra.mrb[2].mxu0 %vm1386_vm5, %v1619_v0 }
0x1d0d   : > { %2885 = vmatpush3.bf16.msra.mxu0 %v3707_v23  ;;  %2771 = vmatprep.mubr.msk.f32.mxu0 %vm3321_vm4, %v3322_v26  ;;  %v1705_v20 = vpop.permute.xlu1 %1704 }
0x1d0e   : > { %2886 = vmatprep.subr.bf16.mxu0 %v3320_v24 }
0x1d11   : > { %2888 = vmatpush3.bf16.msra.mxu0 %v3714_v25 }
0x1d12   : > { %2895 = vmatprep.subr.bf16.mxu0 %v3320_v24 }
0x1ddf   : > { %v1691_v6 = vpop.f32.mrb[2].mxu0 }
0x1de0   : > { %v1695_v7 = vadd.f32 %v1691_v6, %v1621_v5  ;;  %v2751_v8 = vpop.f32.mrb[3].mxu0 }
0x1de2   : > { %3084 = vtanh.f32 %v1695_v7  ;;  %v2516_v10 = vmul.f32 -1.442695, %v1695_v7 }
0x1de4   : > { %3086 = vpow2.f32 %v2516_v10 }
0x1dec   : > { %v3085_v9 = vpop.eup %3084 }
0x1ded   : > { %1709 = vrot.lane.b32.xlu0 %v3085_v9, %s3323_s22 }
0x1dee   : > { %v3087_v11 = vpop.eup %3086 }
0x1def   : > { %v1699_v12 = vadd.f32 1.0, %v3087_v11  ;;  %v1972_v11 = vld [vmem:[#allocation4 + $0x4] sm:$0x3] }
0x1df1   : > { %3088 = vrcp.f32 %v1699_v12 }
0x1dfb   : > { %v3089_v13 = vpop.eup %3088 }
0x1dfc   : > { %v1707_v21 = vmul.f32 %v3089_v13, %v1705_v20 }
0x1e5f   : > { %v1710_v14 = vpop.permute.xlu0 %1709 }
0x1e60   : > { %v1712_v19 = vmul.f32 %v3089_v13, %v1710_v14 }
0x1e62   : > { %1714 = vrot.lane.b32.xlu0 %v1712_v19, %s3323_s22 }
0x1ed4   : > { %v1715_v22 = vpop.permute.xlu0 %1714 }
0x1ed5   : > { %v1717_v1 = vadd.f32 %v1715_v22, %v1707_v21 }
0x1ed7   : > { %3090 = vtanh.f32 %v1717_v1 }
0x1ee1   : > { %v3091_v2 = vpop.eup %3090 }
0x1ee2   : > { %1720 = vrot.lane.b32.xlu1 %v3091_v2, %s3323_s22 }
0x1ee6   : > { %1730 = vrot.lane.b32.xlu1 %v1717_v1, %s3324_s27 }
0x1f54   : > { %v1721_v3 = vpop.permute.xlu1 %1720 }
0x1f55   : > { %v1723_v4 = vmul.f32 %v3089_v13, %v1721_v3 }
0x1f57   : > { %1725 = vrot.lane.b32.xlu0 %v1723_v4, %s3325_s8 }
0x1f58   : > { %v1731_v15 = vpop.permute.xlu1 %1730 }
0x1f59   : > { %1733 = vst.msk [vmem:[#allocation3] sm:$0x3] %vm336_vm0, %v1731_v15 }
0x1f60   : > { %v1737_v27 = vld [vmem:[#allocation3] sm:$0x3] }
0x1f61   : > { %1821 = vrot.lane.b32.xlu1 %v1737_v27, %s3323_s22 }
0x1fc9   : > { %v1726_v18 = vpop.permute.xlu0 %1725 }
0x1fca   : > { %1728 = vst.msk [vmem:[#allocation2] sm:$0x3] %vm336_vm0, %v1726_v18  ;;  %2517 = vst.msk [vmem:[%s3557_s6 + $0xa] sm:$0x3] %vm336_vm0, %v1726_v18 }
0x1fd1   : > { %v1736_v16 = vld [vmem:[#allocation2] sm:$0x3] }
0x1fd2   : > { %2761 = vmatmul.mubr.msk.f32.vlgmr.msra.gmra.mrb[2].mxu1 %vm1386_vm5, %v1736_v16 }
0x1fd3   : > { %2891 = vmatpush3.bf16.msra.mxu1 %v3707_v23  ;;  %2782 = vmatprep.mubr.msk.f32.mxu1 %vm3321_vm4, %v3322_v26  ;;  %v1822_v38 = vpop.permute.xlu1 %1821 }
0x1fd4   : > { %2892 = vmatprep.subr.bf16.mxu1 %v3320_v24 }
0x1fd7   : > { %2894 = vmatpush3.bf16.msra.mxu1 %v3714_v25 }
0x1fd8   : > { %2901 = vmatprep.subr.bf16.mxu1 %v3320_v24 }
0x20a5   : > { %v1808_v28 = vpop.f32.mrb[2].mxu1 }
0x20a6   : > { %v1812_v29 = vadd.f32 %v1808_v28, %v1738_v17  ;;  %v2762_v30 = vpop.f32.mrb[3].mxu1 }
0x20a8   : > { %3092 = vtanh.f32 %v1812_v29  ;;  %v2519_v32 = vmul.f32 -1.442695, %v1812_v29  ;;  %v2089_v29 = vld [vmem:[#allocation4 + $0x2] sm:$0x3] }
0x20aa   : > { %3094 = vpow2.f32 %v2519_v32 }
0x20b2   : > { %v3093_v31 = vpop.eup %3092 }
0x20b3   : > { %1826 = vrot.lane.b32.xlu0 %v3093_v31, %s3323_s22 }
0x20b4   : > { %v3095_v33 = vpop.eup %3094 }
0x20b5   : > { %v1816_v34 = vadd.f32 1.0, %v3095_v33 }
0x20b7   : > { %3096 = vrcp.f32 %v1816_v34 }
0x20c1   : > { %v3097_v35 = vpop.eup %3096 }
0x20c2   : > { %v1824_v39 = vmul.f32 %v3097_v35, %v1822_v38 }
0x2125   : > { %v1827_v36 = vpop.permute.xlu0 %1826 }
0x2126   : > { %v1829_v37 = vmul.f32 %v3097_v35, %v1827_v36 }
0x2128   : > { %1831 = vrot.lane.b32.xlu0 %v1829_v37, %s3323_s22 }
0x219a   : > { %v1832_v40 = vpop.permute.xlu0 %1831 }
0x219b   : > { %v1834_v41 = vadd.f32 %v1832_v40, %v1824_v39 }
0x219d   : > { %3098 = vtanh.f32 %v1834_v41 }
0x21a7   : > { %v3099_v42 = vpop.eup %3098 }
0x21a8   : > { %1837 = vrot.lane.b32.xlu1 %v3099_v42, %s3323_s22 }
0x21ac   : > { %1847 = vrot.lane.b32.xlu1 %v1834_v41, %s3324_s27 }
0x221a   : > { %v1838_v43 = vpop.permute.xlu1 %1837 }
0x221b   : > { %v1840_v44 = vmul.f32 %v3097_v35, %v1838_v43 }
0x221d   : > { %1842 = vrot.lane.b32.xlu0 %v1840_v44, %s3325_s8 }
0x221e   : > { %v1848_v45 = vpop.permute.xlu1 %1847 }
0x221f   : > { %1850 = vst.msk [vmem:[#allocation3] sm:$0x3] %vm336_vm0, %v1848_v45 }
0x2226   : > { %v1854_v46 = vld [vmem:[#allocation3] sm:$0x3] }
0x2227   : > { %1938 = vrot.lane.b32.xlu1 %v1854_v46, %s3323_s22 }
0x228f   : > { %v1843_v47 = vpop.permute.xlu0 %1842 }
0x2290   : > { %1845 = vst.msk [vmem:[#allocation2] sm:$0x3] %vm336_vm0, %v1843_v47  ;;  %2520 = vst.msk [vmem:[%s3557_s6 + $0x8] sm:$0x3] %vm336_vm0, %v1843_v47 }
0x2297   : > { %v1853_v48 = vld [vmem:[#allocation2] sm:$0x3] }
0x2298   : > { %2772 = vmatmul.mubr.msk.f32.vlgmr.msra.gmra.mrb[4].mxu0 %vm1386_vm5, %v1853_v48 }
0x2299   : > { %2897 = vmatpush3.bf16.msra.mxu0 %v3707_v23  ;;  %2793 = vmatprep.mubr.msk.f32.mxu0 %vm3321_vm4, %v3322_v26  ;;  %v1939_v60 = vpop.permute.xlu1 %1938 }
0x229a   : > { %2898 = vmatprep.subr.bf16.mxu0 %v3320_v24 }
0x229d   : > { %2900 = vmatpush3.bf16.msra.mxu0 %v3714_v25 }
0x236b   : > { %v1925_v50 = vpop.f32.mrb[4].mxu0 }
0x236c   : > { %v1929_v51 = vadd.f32 %v1925_v50, %v1855_v49  ;;  %v2773_v52 = vpop.f32.mrb[5].mxu0 }
0x236e   : > { %3100 = vtanh.f32 %v1929_v51  ;;  %v2522_v54 = vmul.f32 -1.442695, %v1929_v51  ;;  %v2206_v51 = vld [vmem:[#allocation4] sm:$0x3] }
0x2370   : > { %3102 = vpow2.f32 %v2522_v54 }
0x2378   : > { %v3101_v53 = vpop.eup %3100 }
0x2379   : > { %1943 = vrot.lane.b32.xlu0 %v3101_v53, %s3323_s22 }
0x237a   : > { %v3103_v55 = vpop.eup %3102 }
0x237b   : > { %v1933_v56 = vadd.f32 1.0, %v3103_v55 }
0x237d   : > { %3104 = vrcp.f32 %v1933_v56 }
0x2387   : > { %v3105_v57 = vpop.eup %3104 }
0x2388   : > { %v1941_v61 = vmul.f32 %v3105_v57, %v1939_v60 }
0x23eb   : > { %v1944_v58 = vpop.permute.xlu0 %1943 }
0x23ec   : > { %v1946_v59 = vmul.f32 %v3105_v57, %v1944_v58 }
0x23ee   : > { %1948 = vrot.lane.b32.xlu0 %v1946_v59, %s3323_s22 }
0x2460   : > { %v1949_v62 = vpop.permute.xlu0 %1948 }
0x2461   : > { %v1951_v63 = vadd.f32 %v1949_v62, %v1941_v61 }
0x2463   : > { %3106 = vtanh.f32 %v1951_v63 }
0x246d   : > { %v3107_v0 = vpop.eup %3106 }
0x246e   : > { %1954 = vrot.lane.b32.xlu1 %v3107_v0, %s3323_s22 }
0x2472   : > { %1964 = vrot.lane.b32.xlu1 %v1951_v63, %s3324_s27 }
0x24e0   : > { %v1955_v5 = vpop.permute.xlu1 %1954 }
0x24e1   : > { %v1957_v6 = vmul.f32 %v3105_v57, %v1955_v5 }
0x24e3   : > { %1959 = vrot.lane.b32.xlu0 %v1957_v6, %s3325_s8 }
0x24e4   : > { %v1965_v7 = vpop.permute.xlu1 %1964 }
0x24e5   : > { %1967 = vst.msk [vmem:[#allocation3] sm:$0x3] %vm336_vm0, %v1965_v7 }
0x24ec   : > { %v1971_v8 = vld [vmem:[#allocation3] sm:$0x3] }
0x24ed   : > { %2055 = vrot.lane.b32.xlu1 %v1971_v8, %s3323_s22 }
0x2555   : > { %v1960_v9 = vpop.permute.xlu0 %1959 }
0x2556   : > { %1962 = vst.msk [vmem:[#allocation2] sm:$0x3] %vm336_vm0, %v1960_v9  ;;  %2523 = vst.msk [vmem:[%s3557_s6 + $0x6] sm:$0x3] %vm336_vm0, %v1960_v9 }
0x255d   : > { %v1970_v10 = vld [vmem:[#allocation2] sm:$0x3] }
0x255e   : > { %2783 = vmatmul.mubr.msk.f32.vlgmr.msra.gmra.mrb[4].mxu1 %vm1386_vm5, %v1970_v10 }
0x255f   : > { %2903 = vmatpush3.bf16.msra.mxu1 %v3707_v23  ;;  %2804 = vmatprep.mubr.msk.f32.mxu1 %vm3321_vm4, %v3322_v26 }
0x2560   : > { %2904 = vmatprep.subr.bf16.mxu1 %v3320_v24  ;;  %v2056_v24 = vpop.permute.xlu1 %2055 }
0x2563   : > { %2906 = vmatpush3.bf16.msra.mxu1 %v3714_v25 }
0x2631   : > { %v2042_v12 = vpop.f32.mrb[4].mxu1 }
0x2632   : > { %v2046_v13 = vadd.f32 %v2042_v12, %v1972_v11  ;;  %v2784_v14 = vpop.f32.mrb[5].mxu1 }
0x2634   : > { %3108 = vtanh.f32 %v2046_v13  ;;  %v2525_v20 = vmul.f32 -1.442695, %v2046_v13 }
0x2636   : > { %3110 = vpow2.f32 %v2525_v20 }
0x263e   : > { %v3109_v19 = vpop.eup %3108 }
0x263f   : > { %2060 = vrot.lane.b32.xlu0 %v3109_v19, %s3323_s22 }
0x2640   : > { %v3111_v21 = vpop.eup %3110 }
0x2641   : > { %v2050_v22 = vadd.f32 1.0, %v3111_v21 }
0x2643   : > { %3112 = vrcp.f32 %v2050_v22 }
0x264d   : > { %v3113_v23 = vpop.eup %3112 }
0x264e   : > { %v2058_v25 = vmul.f32 %v3113_v23, %v2056_v24 }
0x26b1   : > { %v2061_v1 = vpop.permute.xlu0 %2060 }
0x26b2   : > { %v2063_v26 = vmul.f32 %v3113_v23, %v2061_v1 }
0x26b4   : > { %2065 = vrot.lane.b32.xlu0 %v2063_v26, %s3323_s22 }
0x2726   : > { %v2066_v2 = vpop.permute.xlu0 %2065 }
0x2727   : > { %v2068_v3 = vadd.f32 %v2066_v2, %v2058_v25 }
0x2729   : > { %3114 = vtanh.f32 %v2068_v3 }
0x2733   : > { %v3115_v4 = vpop.eup %3114 }
0x2734   : > { %2071 = vrot.lane.b32.xlu1 %v3115_v4, %s3323_s22 }
0x2738   : > { %2081 = vrot.lane.b32.xlu1 %v2068_v3, %s3324_s27 }
0x27a6   : > { %v2072_v15 = vpop.permute.xlu1 %2071 }
0x27a7   : > { %v2074_v27 = vmul.f32 %v3113_v23, %v2072_v15 }
0x27a9   : > { %2076 = vrot.lane.b32.xlu0 %v2074_v27, %s3325_s8 }
0x27aa   : > { %v2082_v18 = vpop.permute.xlu1 %2081 }
0x27ab   : > { %2084 = vst.msk [vmem:[#allocation3] sm:$0x3] %vm336_vm0, %v2082_v18 }
0x27b2   : > { %v2088_v16 = vld [vmem:[#allocation3] sm:$0x3] }
0x27b3   : > { %2172 = vrot.lane.b32.xlu1 %v2088_v16, %s3323_s22 }
0x281b   : > { %v2077_v17 = vpop.permute.xlu0 %2076 }
0x281c   : > { %2079 = vst.msk [vmem:[#allocation2] sm:$0x3] %vm336_vm0, %v2077_v17  ;;  %2526 = vst.msk [vmem:[%s3557_s6 + $0x4] sm:$0x3] %vm336_vm0, %v2077_v17 }
0x2823   : > { %v2087_v28 = vld [vmem:[#allocation2] sm:$0x3] }
0x2824   : > { %2794 = vmatmul.mubr.msk.f32.vlgmr.msra.gmra.mrb[6].mxu0 %vm1386_vm5, %v2087_v28 }
0x2825   : > { %v2173_v40 = vpop.permute.xlu1 %2172 }
0x28f7   : > { %v2159_v30 = vpop.f32.mrb[6].mxu0 }
0x28f8   : > { %v2163_v31 = vadd.f32 %v2159_v30, %v2089_v29  ;;  %v2795_v32 = vpop.f32.mrb[7].mxu0 }
0x28fa   : > { %3116 = vtanh.f32 %v2163_v31  ;;  %v2528_v34 = vmul.f32 -1.442695, %v2163_v31 }
0x28fc   : > { %3118 = vpow2.f32 %v2528_v34 }
0x2904   : > { %v3117_v33 = vpop.eup %3116 }
0x2905   : > { %2177 = vrot.lane.b32.xlu0 %v3117_v33, %s3323_s22 }
0x2906   : > { %v3119_v35 = vpop.eup %3118 }
0x2907   : > { %v2167_v36 = vadd.f32 1.0, %v3119_v35 }
0x2909   : > { %3120 = vrcp.f32 %v2167_v36 }
0x2913   : > { %v3121_v37 = vpop.eup %3120 }
0x2914   : > { %v2175_v41 = vmul.f32 %v3121_v37, %v2173_v40 }
0x2977   : > { %v2178_v38 = vpop.permute.xlu0 %2177 }
0x2978   : > { %v2180_v39 = vmul.f32 %v3121_v37, %v2178_v38 }
0x297a   : > { %2182 = vrot.lane.b32.xlu0 %v2180_v39, %s3323_s22 }
0x29ec   : > { %v2183_v42 = vpop.permute.xlu0 %2182 }
0x29ed   : > { %v2185_v43 = vadd.f32 %v2183_v42, %v2175_v41 }
0x29ef   : > { %3122 = vtanh.f32 %v2185_v43 }
0x29f9   : > { %v3123_v44 = vpop.eup %3122 }
0x29fa   : > { %2188 = vrot.lane.b32.xlu1 %v3123_v44, %s3323_s22 }
0x29fe   : > { %2198 = vrot.lane.b32.xlu1 %v2185_v43, %s3324_s27 }
0x2a6c   : > { %v2189_v45 = vpop.permute.xlu1 %2188 }
0x2a6d   : > { %v2191_v46 = vmul.f32 %v3121_v37, %v2189_v45 }
0x2a6f   : > { %2193 = vrot.lane.b32.xlu0 %v2191_v46, %s3325_s8 }
0x2a70   : > { %v2199_v47 = vpop.permute.xlu1 %2198 }
0x2a71   : > { %2201 = vst.msk [vmem:[#allocation3] sm:$0x3] %vm336_vm0, %v2199_v47 }
0x2a78   : > { %v2205_v48 = vld [vmem:[#allocation3] sm:$0x3] }
0x2a79   : > { %2289 = vrot.lane.b32.xlu1 %v2205_v48, %s3323_s22 }
0x2ae1   : > { %v2194_v49 = vpop.permute.xlu0 %2193 }
0x2ae2   : > { %2196 = vst.msk [vmem:[#allocation2] sm:$0x3] %vm336_vm0, %v2194_v49  ;;  %2529 = vst.msk [vmem:[%s3557_s6 + $0x2] sm:$0x3] %vm336_vm0, %v2194_v49 }
0x2ae9   : > { %v2204_v50 = vld [vmem:[#allocation2] sm:$0x3] }
0x2aea   : > { %2805 = vmatmul.mubr.msk.f32.vlgmr.msra.gmra.mrb[6].mxu1 %vm1386_vm5, %v2204_v50 }
0x2aeb   : > { %v2290_v62 = vpop.permute.xlu1 %2289 }
0x2bbd   : > { %v2276_v52 = vpop.f32.mrb[6].mxu1 }
0x2bbe   : > { %v2280_v53 = vadd.f32 %v2276_v52, %v2206_v51  ;;  %v2806_v54 = vpop.f32.mrb[7].mxu1 }
0x2bc0   : > { %3124 = vtanh.f32 %v2280_v53  ;;  %v2531_v56 = vmul.f32 -1.442695, %v2280_v53 }
0x2bc2   : > { %3126 = vpow2.f32 %v2531_v56 }
0x2bca   : > { %v3125_v55 = vpop.eup %3124 }
0x2bcb   : > { %2294 = vrot.lane.b32.xlu0 %v3125_v55, %s3323_s22 }
0x2bcc   : > { %v3127_v57 = vpop.eup %3126 }
0x2bcd   : > { %v2284_v58 = vadd.f32 1.0, %v3127_v57 }
0x2bcf   : > { %3128 = vrcp.f32 %v2284_v58 }
0x2bd9   : > { %v3129_v59 = vpop.eup %3128 }
0x2bda   : > { %v2292_v63 = vmul.f32 %v3129_v59, %v2290_v62 }
0x2c3d   : > { %v2295_v60 = vpop.permute.xlu0 %2294 }
0x2c3e   : > { %v2297_v61 = vmul.f32 %v3129_v59, %v2295_v60 }
0x2c40   : > { %2299 = vrot.lane.b32.xlu0 %v2297_v61, %s3323_s22 }
0x2cb2   : > { %v2300_v0 = vpop.permute.xlu0 %2299 }
0x2cb3   : > { %v2302_v5 = vadd.f32 %v2300_v0, %v2292_v63 }
0x2cb5   : > { %3130 = vtanh.f32 %v2302_v5 }
0x2cbf   : > { %v3131_v6 = vpop.eup %3130 }
0x2cc0   : > { %2305 = vrot.lane.b32.xlu1 %v3131_v6, %s3323_s22 }
0x2cc4   : > { %2315 = vrot.lane.b32.xlu1 %v2302_v5, %s3324_s27 }
0x2d32   : > { %v2306_v7 = vpop.permute.xlu1 %2305 }
0x2d33   : > { %v2308_v8 = vmul.f32 %v3129_v59, %v2306_v7 }
0x2d35   : > { %2310 = vrot.lane.b32.xlu0 %v2308_v8, %s3325_s8 }
0x2d36   : > { %v2316_v9 = vpop.permute.xlu1 %2315 }
0x2d37   : > { %2318 = vst.msk [vmem:[#allocation3] sm:$0x3] %vm336_vm0, %v2316_v9 }
0x2da7   : > { %v2311_v10 = vpop.permute.xlu0 %2310 }
0x2da8   : > { %2313 = vst.msk [vmem:[#allocation2] sm:$0x3] %vm336_vm0, %v2311_v10  ;;  %2319 = vst.msk [vmem:[%s3557_s6] sm:$0x3] %vm336_vm0, %v2311_v10 }
0x2da9 PF: > { %s3931_s11 = sshll.u32 %s3298_s18, 8  ;;  %s2341_s25 = sshll.u32 %s3557_s6, 4  ;;  %s3857_s25 = int_to_ptr.vmem [resolvable:$true] %s2341_s25 }
0x2daa   : > { %s3854_s9 = scalar_lea.hbm %s3912_s4, %s3931_s11  ;;  %s3861_s26 = scalar_lea.sflag [#allocation7], %s316_s7 }
0x2dab   : > { %s3220_s5 = scalar_lea.vmem %s3857_s25, 256  ;;  %p3932_p11 = scmp.ne.s32.totalorder %s3922_s28, 0 }
0x2dac   : > { %p3221_p10 = scmp.ne.s32.totalorder %s3857_s25, %s3220_s5  ;;  %s3326_s18 = smov [#allocation11]  }
0x2dad   : > { %s3224_s24 = sshll.u32 %s3326_s18, 4  ;;  %s3225_s24 = int_to_ptr.vmem [resolvable:$false] %s3224_s24 }
0x2dae   : > { %p3222_p4 = pnand %p3221_p10, %p3932_p11  ;;  %s3226_s13 = scalar_lea.vmem %s3225_s24, 512 }
0x2daf   : > { %p3227_p0 = scmp.lt.s32.totalorder %s3857_s25, %s3225_s24  ;;  %p3228_p12 = scmp.lt.s32.totalorder %s3226_s13, %s3220_s5 }
0x2db0   : > { %p3223_p8 = pneg %p3222_p4 }
0x2db1   : > { %p3229_p9 = por %p3228_p12, %p3227_p0 }
0x2db3   : > { %p3230_p5 = pnand %p3229_p9, %p3223_p8 }
0x2db5   : > { %3233 = shalt.err (!%p3230_p5)
}
0x2db6   : > { %s3234_s7 = scalar_lea.hbm %s3854_s9, 256  ;;  %s3238_s12 = scalar_lea.hbm %s3912_s4, 512 }
0x2db7   : > { %p3235_p2 = scmp.ne.s32.totalorder %s3854_s9, %s3234_s7  ;;  %p3239_p7 = scmp.lt.u32.totalorder %s3854_s9, %s3912_s4 }
0x2db8   : > { %p3240_p3 = scmp.lt.u32.totalorder %s3238_s12, %s3234_s7  ;;  %p3242_p10 = scmp.lt.u32.totalorder %s3234_s7, %s3854_s9 }
0x2db9   : > { %p3236_p1 = pnand %p3235_p2, %p3932_p11 }
0x2dba   : > { %p3241_p6 = por %p3240_p3, %p3239_p7 }
0x2dbb   : > { %p3237_p13 = pneg %p3236_p1 }
0x2dbc   : > { %p3243_p4 = por %p3242_p10, %p3241_p6 }
0x2dbe   : > { %p3244_p8 = pnand %p3243_p4, %p3237_p13 }
0x2dc0   : > { %3247 = shalt.err (!%p3244_p8)
}
0x2dc1   : > { %s3327_s8 = smov 32   ;;  %s3328_s11 = smov 2  }
0x2dc2   : > { %2915 = dma.vmem_to_hbm [thread:$0]  (%p3932_p11), %s3857_s25, 256, %s3854_s9, %s3861_s26, %s3327_s8, %s3327_s8, %s3328_s11  }
0x2dc3 PF: > { %s2356_s10 = sand.u32 1, %s3286_s15   ;;  %p3933_p0 = scmp.ne.s32.totalorder %s3923_s29, 0 }
0x2dc4   : > { %p3934_p12 = scmp.ge.s32.totalorder %s3306_s20, 2  ;;  %s2357_s14 = scalar_lea.sflag [#allocation7], %s2356_s10 }
0x2dc6   : > { %p2929_p9 = pnand %p3934_p12, %p3933_p0 }
0x2dc8   : > { %3281 = dma.done.wait (!%p2929_p9), %s2357_s14, 256  }
0x2dc9   : > { %3283 = vsyncadd (!%p2929_p9), %s2357_s14, 4294967040  ;;  %s21_s20 = sadd.s32 1, %s3306_s20   ;;  %s3935_s15 = smov %s3290_s16 }
0x2dca   : > { %p18_p5 = scmp.ge.s32.totalorder %s21_s20, 4   ;;  %s3936_s16 = smov %s3294_s17 }
0x2dcb   : > { %s3937_s17 = smov %s3416_s30  ;;  %s3938_s18 = smov %s3302_s19 }
0x2dcc   : > { %s3939_s19 = smov %s3941_s23  ;;  %20 = sbr.rel (!%p18_p5) target bundleno = 7 (0x7), region = 120 }
0x2dd3   :  { %2362 = vsyncpa [#allocation6], 1 }
0x2dd4   :  { %2364 = vsyncpa [#allocation6 + $0x1], 1 }
0x2dd5   :  { %2365 = vsyncpa [#allocation9], 1 }
0x2dd6   :  { %2366 = vsyncpa [#allocation7], 1 }
0x2dd7   :  { %2368 = vsyncpa [#allocation7 + $0x1], 1 }

// kernel: tpu_custom_call.1
= control target key start
LH: loop header
LB: loop body
LE: loop exit
PB: predicated region body
PF: predicated region fallthrough
CT: control target
= control target key end

     0   :  { %s3984_s0 = inlined_call_operand.hbm [shape: f32[1,16,16], index: 0, kind: input, shape index: {}]   ;;  %s3985_s1 = inlined_call_operand.hbm [shape: f32[2,16,128], index: 1, kind: input, shape index: {}]   ;;  %s3986_s2 = inlined_call_operand.hbm [shape: f32[2,32,128], index: 2, kind: input, shape index: {}]   ;;  %s3987_s3 = inlined_call_operand.vmem [shape: f32[2,1,128], index: 3, kind: input, shape index: {}]   ;;  %s3988_s4 = inlined_call_operand.hbm [shape: f32[2,8,2,32], index: 4, kind: output, shape index: {}]  }
   0x1   :  { %4002 = sst [smem:[#allocation17_spill]] %s3985_s1 }
   0x2   :  { %9 = vsyncpa [#allocation6], 0 }
   0x3   :  { %11 = vsyncpa [#allocation6 + $0x1], 0 }
   0x4   :  { %12 = vsyncpa [#allocation9], 0 }
   0x5   :  { %14 = vsyncpa [#allocation9 + $0x1], 0 }
   0x6   :  { %15 = vsyncpa [#allocation7], 0 }
   0x7   :  { %17 = vsyncpa [#allocation7 + $0x1], 0  ;;  %s3404_s15 = smov 0   ;;  %s3406_s16 = smov 0  }
   0x8   :  { %s3408_s17 = smov 0   ;;  %s3410_s18 = smov 0  }
   0x9   :  { %s3412_s19 = smov 0   ;;  %s3414_s20 = smov 0  }
   0xa LB: > { %s3435_s21 = sadd.s32 4294967295, %s3356_s20   ;;  %s2519_s22 = sadd.s32 4294967294, %s3356_s20   ;;  %s3356_s20 = sphi %s3414_s20, %s23_s20   ;;  %s3352_s19 = sphi %s3412_s19, %s4034_s19   ;;  %s3348_s18 = sphi %s3410_s18, %s4033_s18   ;;  %s3344_s17 = sphi %s3408_s17, %s4032_s17   ;;  %s3340_s16 = sphi %s3406_s16, %s4031_s16   ;;  %s3336_s15 = sphi %s3404_s15, %s4030_s15  }
   0xb   : > { %s42_s23 = sadd.s32 1, %s3352_s19  ;;  %s85_s24 = sadd.s32 1, %s3344_s17 }
   0xc   : > { %p44_p0 = scmp.ge.s32.totalorder %s42_s23, 2  ;;  %p92_p1 = scmp.ne.s32.totalorder %s3344_s17, %s3340_s16 }
   0xd   : > { %p3991_p2 = scmp.eq.s32.totalorder %s3356_s20, 0  ;;  %p98_p3 = scmp.ne.s32.totalorder %s3340_s16, %s3336_s15 }
   0xe   : > { %s4036_s23 = smov (%p44_p0, %s42_s23), 0  ;;  %p3989_p5 = scmp.eq.s32.totalorder %s3435_s21, 0 }
   0xf   : > { %4003 = sst [smem:[#allocation15_spill]] %s4036_s23  ;;  %p3449_p4 = por %p3991_p2, %p92_p1 }
  0x10   : > { %s82_s26 = ssub.s32 %s3352_s19, %s4036_s23  ;;  %p186_p6 = scmp.eq.s32.totalorder %s3435_s21, 1 }
  0x11   : > { %p83_p7 = scmp.eq.s32.totalorder %s82_s26, 0  ;;  %p3459_p8 = por %p3989_p5, %p98_p3 }
  0x12   : > { %p3463_p9 = por %p186_p6, %p92_p1  ;;  %p192_p10 = scmp.eq.s32.totalorder %s2519_s22, 1 }
  0x13   : > { %s4005_s27 = scalar_select %p3459_p8, 1, 0 }
  0x14   : > { %s4006_s28 = scalar_select %p3463_p9, 1, 0 }
  0x15   : > { %s3468_s29 = scalar_select %p83_p7, %s3344_s17, %s85_s24  }
  0x16   : > { %p3470_p11 = por %p192_p10, %p98_p3  ;;  %p3990_p13 = scmp.lt.s32.totalorder %s3356_s20, 2 }
  0x17   : > { %4007 = sst [smem:[#allocation16_spill]] %s3468_s29  ;;  %s239_s5 = sand.u32 1, %s3356_s20  }
  0x18   : > { %s4008_s30 = scalar_select %p3470_p11, 1, 0 }
  0x19   : > { %s241_s6 = sand.u32 1, %s3344_s17   ;;  %s2590_s8 = sshll.u32 %s3352_s19, 8 }
  0x1a   : > { %s2523_s7 = sshll.u32 %s241_s6, 4  ;;  %s4009_s1 = sld [smem:[#allocation17_spill]] }
  0x1b   : > { %s243_s12 = scalar_lea.vmem [#allocation8], %s2523_s7  ;;  %p3490_p0 = pnand %p3990_p13, %p3449_p4 }
  0x1c   : > { %s250_s13 = sshll.u32 %s243_s12, 4  ;;  %s3494_s22 = sshll.u32 %s241_s6, 5  ;;  %s3484_s13 = int_to_ptr.vmem [resolvable:$true] %s250_s13 }
  0x1d   : > { %s4010_s14 = scalar_select %p3490_p0, 1, 0 }
  0x1e   : > { %s3497_s24 = scalar_lea.sflag [#allocation9], %s239_s5  ;;  %p3998_p6 = pneg %p3490_p0 }
  0x20   : > { %s3482_s11 = scalar_lea.hbm %s4009_s1, %s2590_s8  ;;  %s3187_s8 = scalar_lea.hbm %s4009_s1, 512 }
  0x21   : > { %s3182_s26 = scalar_lea.hbm %s3482_s11, 256  ;;  %p3188_p4 = scmp.lt.u32.totalorder %s3482_s11, %s4009_s1 }
  0x22   : > { %p3183_p3 = scmp.ne.s32.totalorder %s3482_s11, %s3182_s26  ;;  %p3189_p12 = scmp.lt.u32.totalorder %s3187_s8, %s3182_s26 }
  0x23   : > { %p3191_p13 = scmp.lt.u32.totalorder %s3182_s26, %s3482_s11 }
  0x24   : > { %p3185_p7 = pnand %p3998_p6, %p3183_p3  ;;  %p3190_p5 = por %p3189_p12, %p3188_p4 }
  0x26   : > { %p3186_p10 = pneg %p3185_p7  ;;  %p3192_p2 = por %p3191_p13, %p3190_p5 }
  0x28   : > { %p3193_p1 = pnand %p3192_p2, %p3186_p10 }
  0x2a   : > { %3196 = shalt.err (!%p3193_p1)
}
  0x2b   : > { %s3197_s5 = scalar_lea.vmem %s3484_s13, 256  ;;  %s3358_s6 = smov [#allocation8]  }
  0x2c   : > { %p3198_p3 = scmp.ne.s32.totalorder %s3484_s13, %s3197_s5  ;;  %s3202_s12 = sshll.u32 %s3358_s6, 4  ;;  %s3203_s12 = int_to_ptr.vmem [resolvable:$false] %s3202_s12 }
  0x2d   : > { %s3204_s25 = scalar_lea.vmem %s3203_s12, 512  ;;  %p3205_p9 = scmp.lt.s32.totalorder %s3484_s13, %s3203_s12 }
  0x2e   : > { %p3200_p7 = pnand %p3198_p3, %p3998_p6  ;;  %p3206_p12 = scmp.lt.s32.totalorder %s3204_s25, %s3197_s5 }
  0x30   : > { %p3201_p11 = pneg %p3200_p7  ;;  %p3207_p4 = por %p3206_p12, %p3205_p9 }
  0x32   : > { %p3208_p5 = pnand %p3207_p4, %p3201_p11 }
  0x34   : > { %3211 = shalt.err (!%p3208_p5)
}
  0x35   : > { %s3993_s26 = smov 128   ;;  %s3995_s7 = smov 8  }
  0x36   : > { %2976 = dma.hbm_to_vmem [thread:$0]  (!%p3490_p0), %s3482_s11, 256, %s3484_s13, %s3497_s24, %s3993_s26, %s3993_s26, %s3995_s7  }
  0x37   : > { %s264_s8 = scalar_lea.vmem [#allocation10], %s3494_s22  ;;  %p285_p2 = scmp.lt.s32.totalorder %s3356_s20, 3 }
  0x38   : > { %s3529_s9 = sshll.u32 %s264_s8, 4  ;;  %p4011_p9 = scmp.ge.s32.totalorder %s3356_s20, 1  ;;  %s3572_s9 = int_to_ptr.vmem [resolvable:$true] %s3529_s9 }
  0x39   : > { %s3361_s5 = smov [#allocation5]   ;;  %p4013_p13 = scmp.eq.s32.totalorder %s3356_s20, 0 }
  0x3a   : > { %p3534_p11 = pnand %p4011_p9, %p285_p2  ;;  %s229_s6 = sshll.u32 %s3361_s5, 4  ;;  %s230_s6 = int_to_ptr.vmem [resolvable:$true] %s229_s6 }
  0x3b   : > { %p4014_p1 = scmp.lt.s32.totalorder %s3356_s20, 2  ;;  %s2591_s11 = sshll.u32 %s3352_s19, 9 }
  0x3c   : > { %s4012_s10 = scalar_select %p3534_p11, 1, 0 }
  0x3d   : > { %p3542_p10 = pnand %p4014_p1, %p4013_p13  ;;  %s3550_s25 = scalar_lea.hbm %s3986_s2, %s2591_s11 }
  0x3e   : > { %s3212_s7 = scalar_lea.hbm %s3984_s0, 256 }
  0x3f   : > { %p3213_p3 = scmp.ne.s32.totalorder %s3984_s0, %s3212_s7  ;;  %p3214_p7 = pneg %p3542_p10 }
  0x40   : > { %p3219_p5 = scmp.lt.u32.totalorder %s3212_s7, %s3984_s0 }
  0x41   : > { %p3215_p12 = pnand %p3214_p7, %p3213_p3 }
  0x43   : > { %p3216_p4 = pneg %p3215_p12 }
  0x45   : > { %p3221_p2 = pnand %p3219_p5, %p3216_p4 }
  0x47   : > { %3224 = shalt.err (!%p3221_p2)
}
  0x48   : > { %s3225_s11 = scalar_lea.vmem %s230_s6, 256  ;;  %s3232_s26 = scalar_lea.vmem %s230_s6, 512 }
  0x49   : > { %p3226_p9 = scmp.ne.s32.totalorder %s230_s6, %s3225_s11  ;;  %p3233_p6 = scmp.lt.s32.totalorder %s230_s6, %s230_s6 }
  0x4a   : > { %p3234_p8 = scmp.lt.s32.totalorder %s3232_s26, %s3225_s11 }
  0x4b   : > { %p3228_p13 = pnand %p3226_p9, %p3214_p7 }
  0x4c   : > { %p3235_p11 = por %p3234_p8, %p3233_p6 }
  0x4d   : > { %p3229_p1 = pneg %p3228_p13 }
  0x4f   : > { %p3236_p0 = pnand %p3235_p11, %p3229_p1 }
  0x51   : > { %3239 = shalt.err (!%p3236_p0)
}
  0x52   : > { %s4016_s1 = smov 8   ;;  %s4017_s13 = smov 128  }
  0x53   : > { %2973 = dma.hbm_to_vmem [thread:$0]  (!%p3542_p10), %s3984_s0, 256, %s230_s6, [#allocation6], %s4017_s13, %s4017_s13, %s4016_s1  }
  0x54   : > { %s3240_s29 = scalar_lea.hbm %s3550_s25, 512  ;;  %p4018_p0 = scmp.ne.s32.totalorder %s4010_s14, 0 }
  0x55   : > { %p3241_p8 = scmp.ne.s32.totalorder %s3550_s25, %s3240_s29  ;;  %s3245_s8 = scalar_lea.hbm %s3986_s2, 1024 }
  0x56   : > { %p4019_p6 = pneg %p4018_p0  ;;  %p3246_p7 = scmp.lt.u32.totalorder %s3550_s25, %s3986_s2 }
  0x57   : > { %p3247_p12 = scmp.lt.u32.totalorder %s3245_s8, %s3240_s29  ;;  %p3249_p5 = scmp.lt.u32.totalorder %s3240_s29, %s3550_s25 }
  0x58   : > { %p3243_p11 = pnand %p3241_p8, %p4019_p6 }
  0x59   : > { %p3248_p4 = por %p3247_p12, %p3246_p7 }
  0x5a   : > { %p3244_p3 = pneg %p3243_p11 }
  0x5b   : > { %p3250_p10 = por %p3249_p5, %p3248_p4 }
  0x5d   : > { %p3251_p2 = pnand %p3250_p10, %p3244_p3 }
  0x5f   : > { %3254 = shalt.err (!%p3251_p2)
}
  0x60   : > { %s3255_s6 = scalar_lea.vmem %s3572_s9, 512  ;;  %p4020_p13 = pmov %p4019_p6 }
  0x61   : > { %p3256_p9 = scmp.ne.s32.totalorder %s3572_s9, %s3255_s6  ;;  %s3362_s26 = smov [#allocation10]  }
  0x62   : > { %s3260_s22 = sshll.u32 %s3362_s26, 4  ;;  %s3261_s22 = int_to_ptr.vmem [resolvable:$false] %s3260_s22 }
  0x63   : > { %p3258_p1 = pnand %p3256_p9, %p4020_p13  ;;  %s3262_s23 = scalar_lea.vmem %s3261_s22, 1024 }
  0x64   : > { %p3263_p6 = scmp.lt.s32.totalorder %s3572_s9, %s3261_s22  ;;  %p3264_p11 = scmp.lt.s32.totalorder %s3262_s23, %s3255_s6 }
  0x65   : > { %p3259_p8 = pneg %p3258_p1 }
  0x66   : > { %p3265_p7 = por %p3264_p11, %p3263_p6 }
  0x68   : > { %p3266_p12 = pnand %p3265_p7, %p3259_p8 }
  0x6a   : > { %3269 = shalt.err (!%p3266_p12)
}
  0x6b   : > { %2979 = dma.hbm_to_vmem [thread:$0]  (!%p4018_p0), %s3550_s25, 512, %s3572_s9, %s3497_s24, %s4017_s13, %s4017_s13, %s4016_s1  }
  0x6c   : > { %p4021_p3 = scmp.ne.s32.totalorder %s4012_s10, 0 }
  0x6d   : > { %p4022_p4 = scmp.eq.s32.totalorder (!%p4021_p3), %s3435_s21, 0 }
  0x6e   : > { %289 = sbr.rel (%p4021_p3) target bundleno = 11725 (0x2dcd), region = 36 }
  0x75   : > { %3323 = dma.done.wait (%p4022_p4), [#allocation6], 256   ;;  %p4023_p5 = pmov %p4022_p4 }
  0x76   : > { %s300_s14 = sand.u32 1, %s3435_s21   ;;  %s3609_s29 = sand.u32 1, %s3340_s16  }
  0x77   : > { %3325 = vsyncadd (%p4023_p5), [#allocation6], 4294967040  ;;  %s2531_s7 = sshll.u32 %s3609_s29, 4  ;;  %s301_s12 = scalar_lea.sflag [#allocation9], %s300_s14 }
  0x78   : > { %s304_s24 = scalar_lea.vmem [#allocation8], %s2531_s7  ;;  %p4024_p0 = scmp.ne.s32.totalorder %s4005_s27, 0 }
  0x7a   : > { %3327 = dma.done.wait (%p4024_p0), %s301_s12, 768  }
  0x7b   : > { %3329 = vsyncadd (%p4024_p0), %s301_s12, 4294966528  ;;  %vm368_vm0 = vcmask 254976   ;;  %s2532_s9 = sshll.u32 %s3609_s29, 5  ;;  %v3363_v0 = vmov 0.0   ;;  %vm382_vm1 = vcmask 130048   ;;  %v373_v5 = vld [vmem:[%s304_s24] sm:$0xff] }
  0x7c   : > { %369 = vst.msk [vmem:[#allocation2] sm:$0x3] %vm368_vm0, %v3363_v0  ;;  %370 = vst.msk [vmem:[#allocation3] sm:$0x3] %vm368_vm0, %v3363_v0  ;;  %s313_s21 = scalar_lea.vmem [#allocation10], %s2532_s9  ;;  %v374_v6 = vld [vmem:[%s304_s24 + $0x8] sm:$0xff] }
  0x7d   : > { %v3621_v1 = vld [vmem:[%s313_s21] sm:$0xff]  ;;  %v3623_v2 = vld [vmem:[%s313_s21 + $0x8] sm:$0xff]  ;;  %v3625_v3 = vld [vmem:[%s313_s21 + $0x10] sm:$0xff]  ;;  %v2860_v7 = vpack.c.bf16 %v374_v6, %v373_v5  ;;  %p356_p10 = scmp.lt.s32.totalorder %s3348_s18, 1  ;;  %s3636_s13 = scalar_lea.vmem [#allocation11], %s2531_s7 }
  0x7e   : > { %v3627_v4 = vld [vmem:[%s313_s21 + $0x18] sm:$0xff]  ;;  %v371_v8 = vld [vmem:[#allocation5] sm:$0xff]  ;;  %v372_v9 = vld [vmem:[#allocation5 + $0x8] sm:$0xff]  ;;  %p2537_p2 = scmp.ne.s32.totalorder %s3348_s18, 0 }
  0x7f   : > { %2681 = vmatprep.mubr.msk.f32.mxu0 %vm382_vm1, %v371_v8  ;;  %2861 = vmatprep.subr.bf16.mxu0 %v2860_v7  ;;  %s357_s27 = scalar_select %p356_p10, %s3348_s18, 1 }
  0x80   : > { %2863 = vmatpush3.bf16.msra.mxu0 %v2860_v7  ;;  %v3641_v15 = vpack.c.bf16 (!%p2537_p2), %v3623_v2, %v3621_v1  ;;  %v3364_v16 = vmov (!%p2537_p2), 0.0|0.0   ;;  %v3648_v17 = vpack.c.bf16 (!%p2537_p2), %v3627_v4, %v3625_v3  ;;  %vm3365_vm2 = vmmov (!%p2537_p2), 0   ;;  %s3367_s8 = smov (!%p2537_p2), 32   ;;  %s3368_s5 = smov (!%p2537_p2), 96  }
  0x81   : > { %s358_s1 = scalar_lea.vmem %s3987_s3, %s357_s27  ;;  %2864 = vmatprep.subr.bf16.mxu0 (!%p2537_p2), %v3364_v16  ;;  %2870 = vmatprep.subr.bf16.mxu1 (!%p2537_p2), %v3364_v16  ;;  %v3366_v18 = vmov (!%p2537_p2), 0.0   ;;  %vm477_vm3 = vcmask (!%p2537_p2), 261120   ;;  %s3369_s11 = smov (!%p2537_p2), 64  }
  0x82   : > { %v2534_v10 = vld [vmem:[%s358_s1] ss:$0 sm:$0xff]  ;;  %2872 = vmatpush3.bf16.msra.mxu1 (!%p2537_p2), %v3641_v15  ;;  %2703 = vmatprep.mubr.msk.f32.mxu1 (!%p2537_p2), %vm3365_vm2, %v3366_v18 }
  0x83   : > { %2682 = vmatmul.mubr.msk.f32.vlgmr.msra.gmra.mrb[0].mxu0 %vm382_vm1, %v372_v9  ;;  %2873 = vmatprep.subr.bf16.mxu1 (!%p2537_p2), %v3364_v16  ;;  %v474_v19 = vld [vmem:[#allocation2] sm:$0x3] (!%p2537_p2)  ;;  %v475_v25 = vld [vmem:[#allocation3] sm:$0x3] (!%p2537_p2) }
  0x84   : > { %2866 = vmatpush3.bf16.msra.mxu0 (!%p2537_p2), %v3641_v15  ;;  %2692 = vmatprep.mubr.msk.f32.mxu0 (!%p2537_p2), %vm3365_vm2, %v3366_v18 }
  0x85   : > { %2867 = vmatprep.subr.bf16.mxu0 (!%p2537_p2), %v3364_v16 }
  0x86   : > { %2875 = vmatpush3.bf16.msra.mxu1 (!%p2537_p2), %v3648_v17 }
  0x87   : > { %2882 = vmatprep.subr.bf16.mxu1 (!%p2537_p2), %v3364_v16 }
  0x88   : > { %2869 = vmatpush3.bf16.msra.mxu0 (!%p2537_p2), %v3648_v17 }
  0x89   : > { %2876 = vmatprep.subr.bf16.mxu0 (!%p2537_p2), %v3364_v16 }
 0x154   : > { %473 = sbr.rel (%p2537_p2) target bundleno = 6016 (0x1780), region = 56 }
 0x156   : > { %v2683_v11 = vpop.f32.mrb[0].mxu0 }
 0x157   : > { %v461_v12 = vadd.f32 %v2683_v11, %v2534_v10  ;;  %v455_v13 = vpop.f32.mrb[1].mxu0  ;;  %2693 = vmatmul.mubr.msk.f32.vlgmr.msra.gmra.mrb[0].mxu0 (!%p2537_p2), %vm477_vm3, %v474_v19 }
 0x158   : > { %v456_v14 = vadd.f32 %v2534_v10, %v455_v13  ;;  %2878 = vmatpush3.bf16.msra.mxu0 (!%p2537_p2), %v3641_v15  ;;  %2714 = vmatprep.mubr.msk.f32.mxu0 (!%p2537_p2), %vm3365_vm2, %v3366_v18 }
 0x159   : > { %465 = vst [vmem:[#allocation4 + $0x8] sm:$0xff] %v461_v12  ;;  %2879 = vmatprep.subr.bf16.mxu0 (!%p2537_p2), %v3364_v16 }
 0x15a   : > { %464 = vst [vmem:[#allocation4] sm:$0xff] %v456_v14 }
 0x15c   : > { %2881 = vmatpush3.bf16.msra.mxu0 %v3648_v17 }
 0x15d   : > { %2888 = vmatprep.subr.bf16.mxu0 %v3364_v16 }
 0x161   : > { %v476_v20 = vld [vmem:[#allocation4] sm:$0x3]  ;;  %v594_v43 = vld [vmem:[#allocation4 + $0x2] sm:$0x3]  ;;  %v711_v5 = vld [vmem:[#allocation4 + $0x4] sm:$0x3] }
 0x22a   : > { %v547_v21 = vpop.f32.mrb[0].mxu0 }
 0x22b   : > { %v551_v22 = vadd.f32 %v547_v21, %v476_v20  ;;  %v2694_v23 = vpop.f32.mrb[1].mxu0 }
 0x22d   : > { %3054 = vtanh.f32 %v551_v22  ;;  %v2539_v26 = vmul.f32 -1.442695, %v551_v22 }
 0x22f   : > { %3056 = vpow2.f32 %v2539_v26 }
 0x237   : > { %v3055_v24 = vpop.eup %3054 }
 0x238   : > { %565 = vrot.lane.b32.xlu0 %v3055_v24, %s3367_s8 }
 0x239   : > { %v3057_v27 = vpop.eup %3056 }
 0x23a   : > { %v555_v28 = vadd.f32 1.0, %v3057_v27 }
 0x23c   : > { %560 = vrot.lane.b32.xlu0 %v475_v25, %s3367_s8  ;;  %3058 = vrcp.f32 %v555_v28 }
 0x246   : > { %v3059_v29 = vpop.eup %3058 }
 0x2aa   : > { %v566_v30 = vpop.permute.xlu0 %565 }
 0x2ab   : > { %v568_v31 = vmul.f32 %v3059_v29, %v566_v30 }
 0x2ad   : > { %570 = vrot.lane.b32.xlu1 %v568_v31, %s3367_s8  ;;  %v828_v31 = vld [vmem:[#allocation4 + $0x6] sm:$0x3] }
 0x2ae   : > { %v561_v32 = vpop.permute.xlu0 %560 }
 0x2af   : > { %v563_v33 = vmul.f32 %v3059_v29, %v561_v32 }
 0x31f   : > { %v571_v34 = vpop.permute.xlu1 %570 }
 0x320   : > { %v573_v35 = vadd.f32 %v571_v34, %v563_v33 }
 0x322   : > { %3060 = vtanh.f32 %v573_v35 }
 0x32c   : > { %v3061_v36 = vpop.eup %3060 }
 0x32d   : > { %576 = vrot.lane.b32.xlu1 %v3061_v36, %s3367_s8 }
 0x331   : > { %587 = vrot.lane.b32.xlu1 %v573_v35, %s3368_s5 }
 0x39f   : > { %v577_v37 = vpop.permute.xlu1 %576 }
 0x3a0   : > { %v579_v38 = vmul.f32 %v3059_v29, %v577_v37 }
 0x3a2   : > { %581 = vrot.lane.b32.xlu0 %v579_v38, %s3369_s11 }
 0x3a3   : > { %v588_v39 = vpop.permute.xlu1 %587 }
 0x3a4   : > { %590 = vst.msk [vmem:[#allocation3] sm:$0x3] %vm368_vm0, %v588_v39 }
 0x3ab   : > { %v593_v40 = vld [vmem:[#allocation3] sm:$0x3] }
 0x3ac   : > { %677 = vrot.lane.b32.xlu1 %v593_v40, %s3367_s8 }
 0x414   : > { %v582_v41 = vpop.permute.xlu0 %581 }
 0x415   : > { %585 = vst.msk [vmem:[#allocation2] sm:$0x3] %vm368_vm0, %v582_v41  ;;  %591 = vst.msk [vmem:[%s3636_s13] sm:$0x3] %vm368_vm0, %v582_v41 }
 0x41c   : > { %v592_v42 = vld [vmem:[#allocation2] sm:$0x3] }
 0x41d   : > { %2704 = vmatmul.mubr.msk.f32.vlgmr.msra.gmra.mrb[0].mxu1 %vm477_vm3, %v592_v42 }
 0x41e   : > { %2884 = vmatpush3.bf16.msra.mxu1 %v3641_v15  ;;  %2725 = vmatprep.mubr.msk.f32.mxu1 %vm3365_vm2, %v3366_v18  ;;  %v678_v54 = vpop.permute.xlu1 %677 }
 0x41f   : > { %2885 = vmatprep.subr.bf16.mxu1 %v3364_v16 }
 0x422   : > { %2887 = vmatpush3.bf16.msra.mxu1 %v3648_v17 }
 0x423   : > { %2894 = vmatprep.subr.bf16.mxu1 %v3364_v16 }
 0x4f0   : > { %v664_v44 = vpop.f32.mrb[0].mxu1 }
 0x4f1   : > { %v668_v45 = vadd.f32 %v664_v44, %v594_v43  ;;  %v2705_v46 = vpop.f32.mrb[1].mxu1 }
 0x4f3   : > { %3062 = vtanh.f32 %v668_v45  ;;  %v2541_v48 = vmul.f32 -1.442695, %v668_v45 }
 0x4f5   : > { %3064 = vpow2.f32 %v2541_v48 }
 0x4fd   : > { %v3063_v47 = vpop.eup %3062 }
 0x4fe   : > { %682 = vrot.lane.b32.xlu0 %v3063_v47, %s3367_s8 }
 0x4ff   : > { %v3065_v49 = vpop.eup %3064 }
 0x500   : > { %v672_v50 = vadd.f32 1.0, %v3065_v49 }
 0x502   : > { %3066 = vrcp.f32 %v672_v50 }
 0x50c   : > { %v3067_v51 = vpop.eup %3066 }
 0x50d   : > { %v680_v55 = vmul.f32 %v3067_v51, %v678_v54 }
 0x570   : > { %v683_v52 = vpop.permute.xlu0 %682 }
 0x571   : > { %v685_v53 = vmul.f32 %v3067_v51, %v683_v52 }
 0x573   : > { %687 = vrot.lane.b32.xlu0 %v685_v53, %s3367_s8  ;;  %v945_v53 = vld [vmem:[#allocation4 + $0x8] sm:$0x3] }
 0x5e5   : > { %v688_v56 = vpop.permute.xlu0 %687 }
 0x5e6   : > { %v690_v57 = vadd.f32 %v688_v56, %v680_v55 }
 0x5e8   : > { %3068 = vtanh.f32 %v690_v57 }
 0x5f2   : > { %v3069_v58 = vpop.eup %3068 }
 0x5f3   : > { %693 = vrot.lane.b32.xlu1 %v3069_v58, %s3367_s8 }
 0x5f7   : > { %703 = vrot.lane.b32.xlu1 %v690_v57, %s3368_s5 }
 0x665   : > { %v694_v59 = vpop.permute.xlu1 %693 }
 0x666   : > { %v696_v60 = vmul.f32 %v3067_v51, %v694_v59 }
 0x668   : > { %698 = vrot.lane.b32.xlu0 %v696_v60, %s3369_s11 }
 0x669   : > { %v704_v61 = vpop.permute.xlu1 %703 }
 0x66a   : > { %706 = vst.msk [vmem:[#allocation3] sm:$0x3] %vm368_vm0, %v704_v61 }
 0x671   : > { %v710_v62 = vld [vmem:[#allocation3] sm:$0x3] }
 0x672   : > { %794 = vrot.lane.b32.xlu1 %v710_v62, %s3367_s8 }
 0x6da   : > { %v699_v63 = vpop.permute.xlu0 %698 }
 0x6db   : > { %701 = vst.msk [vmem:[#allocation2] sm:$0x3] %vm368_vm0, %v699_v63  ;;  %2542 = vst.msk [vmem:[%s3636_s13 + $0x2] sm:$0x3] %vm368_vm0, %v699_v63 }
 0x6e2   : > { %v709_v0 = vld [vmem:[#allocation2] sm:$0x3] }
 0x6e3   : > { %2715 = vmatmul.mubr.msk.f32.vlgmr.msra.gmra.mrb[2].mxu0 %vm477_vm3, %v709_v0 }
 0x6e4   : > { %2890 = vmatpush3.bf16.msra.mxu0 %v3641_v15  ;;  %2736 = vmatprep.mubr.msk.f32.mxu0 %vm3365_vm2, %v3366_v18  ;;  %v795_v20 = vpop.permute.xlu1 %794 }
 0x6e5   : > { %2891 = vmatprep.subr.bf16.mxu0 %v3364_v16 }
 0x6e8   : > { %2893 = vmatpush3.bf16.msra.mxu0 %v3648_v17 }
 0x6e9   : > { %2900 = vmatprep.subr.bf16.mxu0 %v3364_v16 }
 0x7b6   : > { %v781_v6 = vpop.f32.mrb[2].mxu0 }
 0x7b7   : > { %v785_v7 = vadd.f32 %v781_v6, %v711_v5  ;;  %v2716_v8 = vpop.f32.mrb[3].mxu0 }
 0x7b9   : > { %3070 = vtanh.f32 %v785_v7  ;;  %v2544_v10 = vmul.f32 -1.442695, %v785_v7 }
 0x7bb   : > { %3072 = vpow2.f32 %v2544_v10 }
 0x7c3   : > { %v3071_v9 = vpop.eup %3070 }
 0x7c4   : > { %799 = vrot.lane.b32.xlu0 %v3071_v9, %s3367_s8 }
 0x7c5   : > { %v3073_v11 = vpop.eup %3072 }
 0x7c6   : > { %v789_v12 = vadd.f32 1.0, %v3073_v11 }
 0x7c8   : > { %3074 = vrcp.f32 %v789_v12 }
 0x7d2   : > { %v3075_v13 = vpop.eup %3074 }
 0x7d3   : > { %v797_v21 = vmul.f32 %v3075_v13, %v795_v20 }
 0x836   : > { %v800_v14 = vpop.permute.xlu0 %799 }
 0x837   : > { %v802_v19 = vmul.f32 %v3075_v13, %v800_v14 }
 0x839   : > { %804 = vrot.lane.b32.xlu0 %v802_v19, %s3367_s8  ;;  %v1062_v19 = vld [vmem:[#allocation4 + $0xa] sm:$0x3] }
 0x8ab   : > { %v805_v22 = vpop.permute.xlu0 %804 }
 0x8ac   : > { %v807_v23 = vadd.f32 %v805_v22, %v797_v21 }
 0x8ae   : > { %3076 = vtanh.f32 %v807_v23 }
 0x8b8   : > { %v3077_v24 = vpop.eup %3076 }
 0x8b9   : > { %810 = vrot.lane.b32.xlu1 %v3077_v24, %s3367_s8 }
 0x8bd   : > { %820 = vrot.lane.b32.xlu1 %v807_v23, %s3368_s5 }
 0x92b   : > { %v811_v25 = vpop.permute.xlu1 %810 }
 0x92c   : > { %v813_v26 = vmul.f32 %v3075_v13, %v811_v25 }
 0x92e   : > { %815 = vrot.lane.b32.xlu0 %v813_v26, %s3369_s11 }
 0x92f   : > { %v821_v27 = vpop.permute.xlu1 %820 }
 0x930   : > { %823 = vst.msk [vmem:[#allocation3] sm:$0x3] %vm368_vm0, %v821_v27 }
 0x937   : > { %v827_v28 = vld [vmem:[#allocation3] sm:$0x3] }
 0x938   : > { %911 = vrot.lane.b32.xlu1 %v827_v28, %s3367_s8 }
 0x9a0   : > { %v816_v29 = vpop.permute.xlu0 %815 }
 0x9a1   : > { %818 = vst.msk [vmem:[#allocation2] sm:$0x3] %vm368_vm0, %v816_v29  ;;  %2545 = vst.msk [vmem:[%s3636_s13 + $0x4] sm:$0x3] %vm368_vm0, %v816_v29 }
 0x9a8   : > { %v826_v30 = vld [vmem:[#allocation2] sm:$0x3] }
 0x9a9   : > { %2726 = vmatmul.mubr.msk.f32.vlgmr.msra.gmra.mrb[2].mxu1 %vm477_vm3, %v826_v30 }
 0x9aa   : > { %2896 = vmatpush3.bf16.msra.mxu1 %v3641_v15  ;;  %2747 = vmatprep.mubr.msk.f32.mxu1 %vm3365_vm2, %v3366_v18  ;;  %v912_v42 = vpop.permute.xlu1 %911 }
 0x9ab   : > { %2897 = vmatprep.subr.bf16.mxu1 %v3364_v16 }
 0x9ae   : > { %2899 = vmatpush3.bf16.msra.mxu1 %v3648_v17 }
 0x9af   : > { %2906 = vmatprep.subr.bf16.mxu1 %v3364_v16 }
 0xa7c   : > { %v898_v32 = vpop.f32.mrb[2].mxu1 }
 0xa7d   : > { %v902_v33 = vadd.f32 %v898_v32, %v828_v31  ;;  %v2727_v34 = vpop.f32.mrb[3].mxu1 }
 0xa7f   : > { %3078 = vtanh.f32 %v902_v33  ;;  %v2547_v36 = vmul.f32 -1.442695, %v902_v33 }
 0xa81   : > { %3080 = vpow2.f32 %v2547_v36 }
 0xa89   : > { %v3079_v35 = vpop.eup %3078 }
 0xa8a   : > { %916 = vrot.lane.b32.xlu0 %v3079_v35, %s3367_s8 }
 0xa8b   : > { %v3081_v37 = vpop.eup %3080 }
 0xa8c   : > { %v906_v38 = vadd.f32 1.0, %v3081_v37  ;;  %v1179_v37 = vld [vmem:[#allocation4 + $0xc] sm:$0x3] }
 0xa8e   : > { %3082 = vrcp.f32 %v906_v38 }
 0xa98   : > { %v3083_v39 = vpop.eup %3082 }
 0xa99   : > { %v914_v43 = vmul.f32 %v3083_v39, %v912_v42 }
 0xafc   : > { %v917_v40 = vpop.permute.xlu0 %916 }
 0xafd   : > { %v919_v41 = vmul.f32 %v3083_v39, %v917_v40 }
 0xaff   : > { %921 = vrot.lane.b32.xlu0 %v919_v41, %s3367_s8 }
 0xb71   : > { %v922_v44 = vpop.permute.xlu0 %921 }
 0xb72   : > { %v924_v45 = vadd.f32 %v922_v44, %v914_v43 }
 0xb74   : > { %3084 = vtanh.f32 %v924_v45 }
 0xb7e   : > { %v3085_v46 = vpop.eup %3084 }
 0xb7f   : > { %927 = vrot.lane.b32.xlu1 %v3085_v46, %s3367_s8 }
 0xb83   : > { %937 = vrot.lane.b32.xlu1 %v924_v45, %s3368_s5 }
 0xbf1   : > { %v928_v47 = vpop.permute.xlu1 %927 }
 0xbf2   : > { %v930_v48 = vmul.f32 %v3083_v39, %v928_v47 }
 0xbf4   : > { %932 = vrot.lane.b32.xlu0 %v930_v48, %s3369_s11 }
 0xbf5   : > { %v938_v49 = vpop.permute.xlu1 %937 }
 0xbf6   : > { %940 = vst.msk [vmem:[#allocation3] sm:$0x3] %vm368_vm0, %v938_v49 }
 0xbfd   : > { %v944_v50 = vld [vmem:[#allocation3] sm:$0x3] }
 0xbfe   : > { %1028 = vrot.lane.b32.xlu1 %v944_v50, %s3367_s8 }
 0xc66   : > { %v933_v51 = vpop.permute.xlu0 %932 }
 0xc67   : > { %935 = vst.msk [vmem:[#allocation2] sm:$0x3] %vm368_vm0, %v933_v51  ;;  %2548 = vst.msk [vmem:[%s3636_s13 + $0x6] sm:$0x3] %vm368_vm0, %v933_v51 }
 0xc6e   : > { %v943_v52 = vld [vmem:[#allocation2] sm:$0x3] }
 0xc6f   : > { %2737 = vmatmul.mubr.msk.f32.vlgmr.msra.gmra.mrb[4].mxu0 %vm477_vm3, %v943_v52 }
 0xc70   : > { %2902 = vmatpush3.bf16.msra.mxu0 %v3641_v15  ;;  %2758 = vmatprep.mubr.msk.f32.mxu0 %vm3365_vm2, %v3366_v18  ;;  %v1029_v0 = vpop.permute.xlu1 %1028 }
 0xc71   : > { %2903 = vmatprep.subr.bf16.mxu0 %v3364_v16 }
 0xc74   : > { %2905 = vmatpush3.bf16.msra.mxu0 %v3648_v17 }
 0xd42   : > { %v1015_v54 = vpop.f32.mrb[4].mxu0 }
 0xd43   : > { %v1019_v55 = vadd.f32 %v1015_v54, %v945_v53  ;;  %v2738_v56 = vpop.f32.mrb[5].mxu0 }
 0xd45   : > { %3086 = vtanh.f32 %v1019_v55  ;;  %v2550_v58 = vmul.f32 -1.442695, %v1019_v55 }
 0xd47   : > { %3088 = vpow2.f32 %v2550_v58 }
 0xd4f   : > { %v3087_v57 = vpop.eup %3086 }
 0xd50   : > { %1033 = vrot.lane.b32.xlu0 %v3087_v57, %s3367_s8 }
 0xd51   : > { %v3089_v59 = vpop.eup %3088 }
 0xd52   : > { %v1023_v60 = vadd.f32 1.0, %v3089_v59  ;;  %v1296_v59 = vld [vmem:[#allocation4 + $0xe] sm:$0x3] }
 0xd54   : > { %3090 = vrcp.f32 %v1023_v60 }
 0xd5e   : > { %v3091_v61 = vpop.eup %3090 }
 0xd5f   : > { %v1031_v5 = vmul.f32 %v3091_v61, %v1029_v0 }
 0xdc2   : > { %v1034_v62 = vpop.permute.xlu0 %1033 }
 0xdc3   : > { %v1036_v63 = vmul.f32 %v3091_v61, %v1034_v62 }
 0xdc5   : > { %1038 = vrot.lane.b32.xlu0 %v1036_v63, %s3367_s8 }
 0xe37   : > { %v1039_v6 = vpop.permute.xlu0 %1038 }
 0xe38   : > { %v1041_v7 = vadd.f32 %v1039_v6, %v1031_v5 }
 0xe3a   : > { %3092 = vtanh.f32 %v1041_v7 }
 0xe44   : > { %v3093_v8 = vpop.eup %3092 }
 0xe45   : > { %1044 = vrot.lane.b32.xlu1 %v3093_v8, %s3367_s8 }
 0xe49   : > { %1054 = vrot.lane.b32.xlu1 %v1041_v7, %s3368_s5 }
 0xeb7   : > { %v1045_v9 = vpop.permute.xlu1 %1044 }
 0xeb8   : > { %v1047_v10 = vmul.f32 %v3091_v61, %v1045_v9 }
 0xeba   : > { %1049 = vrot.lane.b32.xlu0 %v1047_v10, %s3369_s11 }
 0xebb   : > { %v1055_v11 = vpop.permute.xlu1 %1054 }
 0xebc   : > { %1057 = vst.msk [vmem:[#allocation3] sm:$0x3] %vm368_vm0, %v1055_v11 }
 0xec3   : > { %v1061_v12 = vld [vmem:[#allocation3] sm:$0x3] }
 0xec4   : > { %1145 = vrot.lane.b32.xlu1 %v1061_v12, %s3367_s8 }
 0xf2c   : > { %v1050_v13 = vpop.permute.xlu0 %1049 }
 0xf2d   : > { %1052 = vst.msk [vmem:[#allocation2] sm:$0x3] %vm368_vm0, %v1050_v13  ;;  %2551 = vst.msk [vmem:[%s3636_s13 + $0x8] sm:$0x3] %vm368_vm0, %v1050_v13 }
 0xf34   : > { %v1060_v14 = vld [vmem:[#allocation2] sm:$0x3] }
 0xf35   : > { %2748 = vmatmul.mubr.msk.f32.vlgmr.msra.gmra.mrb[4].mxu1 %vm477_vm3, %v1060_v14 }
 0xf36   : > { %2908 = vmatpush3.bf16.msra.mxu1 %v3641_v15  ;;  %2769 = vmatprep.mubr.msk.f32.mxu1 %vm3365_vm2, %v3366_v18 }
 0xf37   : > { %2909 = vmatprep.subr.bf16.mxu1 %v3364_v16  ;;  %v1146_v16 = vpop.permute.xlu1 %1145 }
 0xf3a   : > { %2911 = vmatpush3.bf16.msra.mxu1 %v3648_v17 }
0x1008   : > { %v1132_v20 = vpop.f32.mrb[4].mxu1 }
0x1009   : > { %v1136_v21 = vadd.f32 %v1132_v20, %v1062_v19  ;;  %v2749_v22 = vpop.f32.mrb[5].mxu1 }
0x100b   : > { %3094 = vtanh.f32 %v1136_v21  ;;  %v2553_v24 = vmul.f32 -1.442695, %v1136_v21 }
0x100d   : > { %3096 = vpow2.f32 %v2553_v24 }
0x1015   : > { %v3095_v23 = vpop.eup %3094 }
0x1016   : > { %1150 = vrot.lane.b32.xlu0 %v3095_v23, %s3367_s8 }
0x1017   : > { %v3097_v25 = vpop.eup %3096 }
0x1018   : > { %v1140_v26 = vadd.f32 1.0, %v3097_v25 }
0x101a   : > { %3098 = vrcp.f32 %v1140_v26 }
0x1024   : > { %v3099_v15 = vpop.eup %3098 }
0x1025   : > { %v1148_v17 = vmul.f32 %v3099_v15, %v1146_v16 }
0x1088   : > { %v1151_v27 = vpop.permute.xlu0 %1150 }
0x1089   : > { %v1153_v18 = vmul.f32 %v3099_v15, %v1151_v27 }
0x108b   : > { %1155 = vrot.lane.b32.xlu0 %v1153_v18, %s3367_s8 }
0x10fd   : > { %v1156_v28 = vpop.permute.xlu0 %1155 }
0x10fe   : > { %v1158_v29 = vadd.f32 %v1156_v28, %v1148_v17 }
0x1100   : > { %3100 = vtanh.f32 %v1158_v29 }
0x110a   : > { %v3101_v30 = vpop.eup %3100 }
0x110b   : > { %1161 = vrot.lane.b32.xlu1 %v3101_v30, %s3367_s8 }
0x110f   : > { %1171 = vrot.lane.b32.xlu1 %v1158_v29, %s3368_s5 }
0x117d   : > { %v1162_v31 = vpop.permute.xlu1 %1161 }
0x117e   : > { %v1164_v32 = vmul.f32 %v3099_v15, %v1162_v31 }
0x1180   : > { %1166 = vrot.lane.b32.xlu0 %v1164_v32, %s3369_s11 }
0x1181   : > { %v1172_v33 = vpop.permute.xlu1 %1171 }
0x1182   : > { %1174 = vst.msk [vmem:[#allocation3] sm:$0x3] %vm368_vm0, %v1172_v33 }
0x1189   : > { %v1178_v34 = vld [vmem:[#allocation3] sm:$0x3] }
0x118a   : > { %1262 = vrot.lane.b32.xlu1 %v1178_v34, %s3367_s8 }
0x11f2   : > { %v1167_v35 = vpop.permute.xlu0 %1166 }
0x11f3   : > { %1169 = vst.msk [vmem:[#allocation2] sm:$0x3] %vm368_vm0, %v1167_v35  ;;  %2554 = vst.msk [vmem:[%s3636_s13 + $0xa] sm:$0x3] %vm368_vm0, %v1167_v35 }
0x11fa   : > { %v1177_v36 = vld [vmem:[#allocation2] sm:$0x3] }
0x11fb   : > { %2759 = vmatmul.mubr.msk.f32.vlgmr.msra.gmra.mrb[6].mxu0 %vm477_vm3, %v1177_v36 }
0x11fc   : > { %v1263_v48 = vpop.permute.xlu1 %1262 }
0x12ce   : > { %v1249_v38 = vpop.f32.mrb[6].mxu0 }
0x12cf   : > { %v1253_v39 = vadd.f32 %v1249_v38, %v1179_v37  ;;  %v2760_v40 = vpop.f32.mrb[7].mxu0 }
0x12d1   : > { %3102 = vtanh.f32 %v1253_v39  ;;  %v2556_v42 = vmul.f32 -1.442695, %v1253_v39 }
0x12d3   : > { %3104 = vpow2.f32 %v2556_v42 }
0x12db   : > { %v3103_v41 = vpop.eup %3102 }
0x12dc   : > { %1267 = vrot.lane.b32.xlu0 %v3103_v41, %s3367_s8 }
0x12dd   : > { %v3105_v43 = vpop.eup %3104 }
0x12de   : > { %v1257_v44 = vadd.f32 1.0, %v3105_v43 }
0x12e0   : > { %3106 = vrcp.f32 %v1257_v44 }
0x12ea   : > { %v3107_v45 = vpop.eup %3106 }
0x12eb   : > { %v1265_v49 = vmul.f32 %v3107_v45, %v1263_v48 }
0x134e   : > { %v1268_v46 = vpop.permute.xlu0 %1267 }
0x134f   : > { %v1270_v47 = vmul.f32 %v3107_v45, %v1268_v46 }
0x1351   : > { %1272 = vrot.lane.b32.xlu0 %v1270_v47, %s3367_s8 }
0x13c3   : > { %v1273_v50 = vpop.permute.xlu0 %1272 }
0x13c4   : > { %v1275_v51 = vadd.f32 %v1273_v50, %v1265_v49 }
0x13c6   : > { %3108 = vtanh.f32 %v1275_v51 }
0x13d0   : > { %v3109_v52 = vpop.eup %3108 }
0x13d1   : > { %1278 = vrot.lane.b32.xlu1 %v3109_v52, %s3367_s8 }
0x13d5   : > { %1288 = vrot.lane.b32.xlu1 %v1275_v51, %s3368_s5 }
0x1443   : > { %v1279_v53 = vpop.permute.xlu1 %1278 }
0x1444   : > { %v1281_v54 = vmul.f32 %v3107_v45, %v1279_v53 }
0x1446   : > { %1283 = vrot.lane.b32.xlu0 %v1281_v54, %s3369_s11 }
0x1447   : > { %v1289_v55 = vpop.permute.xlu1 %1288 }
0x1448   : > { %1291 = vst.msk [vmem:[#allocation3] sm:$0x3] %vm368_vm0, %v1289_v55 }
0x144f   : > { %v1295_v56 = vld [vmem:[#allocation3] sm:$0x3] }
0x1450   : > { %1379 = vrot.lane.b32.xlu1 %v1295_v56, %s3367_s8 }
0x14b8   : > { %v1284_v57 = vpop.permute.xlu0 %1283 }
0x14b9   : > { %1286 = vst.msk [vmem:[#allocation2] sm:$0x3] %vm368_vm0, %v1284_v57  ;;  %2557 = vst.msk [vmem:[%s3636_s13 + $0xc] sm:$0x3] %vm368_vm0, %v1284_v57 }
0x14c0   : > { %v1294_v58 = vld [vmem:[#allocation2] sm:$0x3] }
0x14c1   : > { %2770 = vmatmul.mubr.msk.f32.vlgmr.msra.gmra.mrb[6].mxu1 %vm477_vm3, %v1294_v58 }
0x14c2   : > { %v1380_v10 = vpop.permute.xlu1 %1379 }
0x1594   : > { %v1366_v60 = vpop.f32.mrb[6].mxu1 }
0x1595   : > { %v1370_v61 = vadd.f32 %v1366_v60, %v1296_v59  ;;  %v2771_v62 = vpop.f32.mrb[7].mxu1 }
0x1597   : > { %3110 = vtanh.f32 %v1370_v61  ;;  %v2559_v0 = vmul.f32 -1.442695, %v1370_v61 }
0x1599   : > { %3112 = vpow2.f32 %v2559_v0 }
0x15a1   : > { %v3111_v63 = vpop.eup %3110 }
0x15a2   : > { %1384 = vrot.lane.b32.xlu0 %v3111_v63, %s3367_s8 }
0x15a3   : > { %v3113_v5 = vpop.eup %3112 }
0x15a4   : > { %v1374_v6 = vadd.f32 1.0, %v3113_v5 }
0x15a6   : > { %3114 = vrcp.f32 %v1374_v6 }
0x15b0   : > { %v3115_v7 = vpop.eup %3114 }
0x15b1   : > { %v1382_v11 = vmul.f32 %v3115_v7, %v1380_v10 }
0x1614   : > { %v1385_v8 = vpop.permute.xlu0 %1384 }
0x1615   : > { %v1387_v9 = vmul.f32 %v3115_v7, %v1385_v8 }
0x1617   : > { %1389 = vrot.lane.b32.xlu0 %v1387_v9, %s3367_s8 }
0x1689   : > { %v1390_v12 = vpop.permute.xlu0 %1389 }
0x168a   : > { %v1392_v13 = vadd.f32 %v1390_v12, %v1382_v11 }
0x168c   : > { %3116 = vtanh.f32 %v1392_v13 }
0x1696   : > { %v3117_v14 = vpop.eup %3116 }
0x1697   : > { %1395 = vrot.lane.b32.xlu1 %v3117_v14, %s3367_s8 }
0x169b   : > { %1405 = vrot.lane.b32.xlu1 %v1392_v13, %s3368_s5 }
0x1709   : > { %v1396_v19 = vpop.permute.xlu1 %1395 }
0x170a   : > { %v1398_v20 = vmul.f32 %v3115_v7, %v1396_v19 }
0x170c   : > { %1400 = vrot.lane.b32.xlu0 %v1398_v20, %s3369_s11 }
0x170d   : > { %v1406_v21 = vpop.permute.xlu1 %1405 }
0x170e   : > { %1408 = vst.msk [vmem:[#allocation3] sm:$0x3] %vm368_vm0, %v1406_v21 }
0x177e   : > { %v1401_v22 = vpop.permute.xlu0 %1400 }
0x177f   : > { %1403 = vst.msk [vmem:[#allocation2] sm:$0x3] %vm368_vm0, %v1401_v22  ;;  %2560 = vst.msk [vmem:[%s3636_s13 + $0xe] sm:$0x3] %vm368_vm0, %v1401_v22 }
0x1780 PF: > { %p2561_p9 = scmp.ne.s32.totalorder %s3348_s18, 1 }
0x1781   : > { %v3786_v23 = vpack.c.bf16 (!%p2561_p9), %v3623_v2, %v3621_v1  ;;  %v3370_v24 = vmov (!%p2561_p9), 0.0|0.0   ;;  %v3793_v25 = vpack.c.bf16 (!%p2561_p9), %v3627_v4, %v3625_v3  ;;  %vm3371_vm4 = vmmov (!%p2561_p9), 0   ;;  %s3373_s6 = smov (!%p2561_p9), 32   ;;  %v1416_v18 = vld [vmem:[#allocation3] sm:$0x3] (!%p2561_p9)  ;;  %s3374_s26 = smov (!%p2561_p9), 96  }
0x1782   : > { %1414 = sbr.rel (%p2561_p9) target bundleno = 11699 (0x2db3), region = 60  ;;  %2912 = vmatprep.subr.bf16.mxu0 (!%p2561_p9), %v3370_v24  ;;  %2918 = vmatprep.subr.bf16.mxu1 (!%p2561_p9), %v3370_v24  ;;  %v3372_v26 = vmov (!%p2561_p9), 0.0   ;;  %vm1418_vm5 = vcmask (!%p2561_p9), 261120   ;;  %s3375_s22 = smov (!%p2561_p9), 64  }
0x1783   : > { %2914 = vmatpush3.bf16.msra.mxu0 (!%p2561_p9), %v3786_v23  ;;  %2780 = vmatprep.mubr.msk.f32.mxu0 (!%p2561_p9), %vm3371_vm4, %v3372_v26 }
0x1784   : > { %2915 = vmatprep.subr.bf16.mxu0 (!%p2561_p9), %v3370_v24  ;;  %2920 = vmatpush3.bf16.msra.mxu1 (!%p2561_p9), %v3786_v23 }
0x1785   : > { %2921 = vmatprep.subr.bf16.mxu1 (!%p2561_p9), %v3370_v24  ;;  %2791 = vmatprep.mubr.msk.f32.mxu1 (!%p2561_p9), %vm3371_vm4, %v3372_v26  ;;  %v1417_v2 = vld [vmem:[#allocation4 + $0xe] sm:$0x3] (!%p2561_p9)  ;;  %v1536_v43 = vld [vmem:[#allocation4 + $0xc] sm:$0x3] (!%p2561_p9)  ;;  %v1653_v5 = vld [vmem:[#allocation4 + $0xa] sm:$0x3] (!%p2561_p9) }
0x1786   : > { %v1415_v1 = vld [vmem:[#allocation2] sm:$0x3] (!%p2561_p9) }
0x1787   : > { %2917 = vmatpush3.bf16.msra.mxu0 (!%p2561_p9), %v3793_v25 }
0x1788   : > { %2923 = vmatpush3.bf16.msra.mxu1 (!%p2561_p9), %v3793_v25  ;;  %2924 = vmatprep.subr.bf16.mxu0 (!%p2561_p9), %v3370_v24 }
0x1789   : > { %2930 = vmatprep.subr.bf16.mxu1 %v3370_v24 }
0x178a   : > { %2781 = vmatmul.mubr.msk.f32.vlgmr.msra.gmra.mrb[0].mxu0 %vm1418_vm5, %v1415_v1 }
0x178b   : > { %2926 = vmatpush3.bf16.msra.mxu0 %v3786_v23  ;;  %2802 = vmatprep.mubr.msk.f32.mxu0 %vm3371_vm4, %v3372_v26 }
0x178c   : > { %2927 = vmatprep.subr.bf16.mxu0 %v3370_v24 }
0x178f   : > { %2929 = vmatpush3.bf16.msra.mxu0 %v3793_v25 }
0x1790   : > { %2936 = vmatprep.subr.bf16.mxu0 %v3370_v24 }
0x185d   : > { %v1488_v3 = vpop.f32.mrb[0].mxu0 }
0x185e   : > { %v1492_v4 = vadd.f32 %v1488_v3, %v1417_v2  ;;  %v2782_v15 = vpop.f32.mrb[1].mxu0 }
0x1860   : > { %3118 = vtanh.f32 %v1492_v4  ;;  %v2563_v16 = vmul.f32 -1.442695, %v1492_v4 }
0x1862   : > { %3120 = vpow2.f32 %v2563_v16 }
0x186a   : > { %v3119_v27 = vpop.eup %3118 }
0x186b   : > { %1506 = vrot.lane.b32.xlu0 %v3119_v27, %s3373_s6 }
0x186c   : > { %v3121_v17 = vpop.eup %3120 }
0x186d   : > { %v1496_v28 = vadd.f32 1.0, %v3121_v17  ;;  %v1770_v17 = vld [vmem:[#allocation4 + $0x8] sm:$0x3] }
0x186f   : > { %1501 = vrot.lane.b32.xlu0 %v1416_v18, %s3373_s6  ;;  %3122 = vrcp.f32 %v1496_v28 }
0x1879   : > { %v3123_v29 = vpop.eup %3122 }
0x18dd   : > { %v1507_v30 = vpop.permute.xlu0 %1506 }
0x18de   : > { %v1509_v31 = vmul.f32 %v3123_v29, %v1507_v30 }
0x18e0   : > { %1511 = vrot.lane.b32.xlu1 %v1509_v31, %s3373_s6 }
0x18e1   : > { %v1502_v32 = vpop.permute.xlu0 %1501 }
0x18e2   : > { %v1504_v33 = vmul.f32 %v3123_v29, %v1502_v32 }
0x1952   : > { %v1512_v34 = vpop.permute.xlu1 %1511 }
0x1953   : > { %v1514_v35 = vadd.f32 %v1512_v34, %v1504_v33 }
0x1955   : > { %3124 = vtanh.f32 %v1514_v35 }
0x195f   : > { %v3125_v36 = vpop.eup %3124 }
0x1960   : > { %1517 = vrot.lane.b32.xlu1 %v3125_v36, %s3373_s6 }
0x1964   : > { %1528 = vrot.lane.b32.xlu1 %v1514_v35, %s3374_s26 }
0x19d2   : > { %v1518_v37 = vpop.permute.xlu1 %1517 }
0x19d3   : > { %v1520_v38 = vmul.f32 %v3123_v29, %v1518_v37 }
0x19d5   : > { %1522 = vrot.lane.b32.xlu0 %v1520_v38, %s3375_s22 }
0x19d6   : > { %v1529_v39 = vpop.permute.xlu1 %1528 }
0x19d7   : > { %1531 = vst.msk [vmem:[#allocation3] sm:$0x3] %vm368_vm0, %v1529_v39 }
0x19de   : > { %v1535_v40 = vld [vmem:[#allocation3] sm:$0x3] }
0x19df   : > { %1619 = vrot.lane.b32.xlu1 %v1535_v40, %s3373_s6 }
0x1a47   : > { %v1523_v41 = vpop.permute.xlu0 %1522 }
0x1a48   : > { %1526 = vst.msk [vmem:[#allocation2] sm:$0x3] %vm368_vm0, %v1523_v41  ;;  %2564 = vst.msk [vmem:[%s3636_s13 + $0xe] sm:$0x3] %vm368_vm0, %v1523_v41 }
0x1a4f   : > { %v1534_v42 = vld [vmem:[#allocation2] sm:$0x3] }
0x1a50   : > { %2792 = vmatmul.mubr.msk.f32.vlgmr.msra.gmra.mrb[0].mxu1 %vm1418_vm5, %v1534_v42 }
0x1a51   : > { %2932 = vmatpush3.bf16.msra.mxu1 %v3786_v23  ;;  %2813 = vmatprep.mubr.msk.f32.mxu1 %vm3371_vm4, %v3372_v26  ;;  %v1620_v54 = vpop.permute.xlu1 %1619 }
0x1a52   : > { %2933 = vmatprep.subr.bf16.mxu1 %v3370_v24 }
0x1a55   : > { %2935 = vmatpush3.bf16.msra.mxu1 %v3793_v25 }
0x1a56   : > { %2942 = vmatprep.subr.bf16.mxu1 %v3370_v24 }
0x1b23   : > { %v1606_v44 = vpop.f32.mrb[0].mxu1 }
0x1b24   : > { %v1610_v45 = vadd.f32 %v1606_v44, %v1536_v43  ;;  %v2793_v46 = vpop.f32.mrb[1].mxu1 }
0x1b26   : > { %3126 = vtanh.f32 %v1610_v45  ;;  %v2566_v48 = vmul.f32 -1.442695, %v1610_v45 }
0x1b28   : > { %3128 = vpow2.f32 %v2566_v48 }
0x1b30   : > { %v3127_v47 = vpop.eup %3126 }
0x1b31   : > { %1624 = vrot.lane.b32.xlu0 %v3127_v47, %s3373_s6 }
0x1b32   : > { %v3129_v49 = vpop.eup %3128 }
0x1b33   : > { %v1614_v50 = vadd.f32 1.0, %v3129_v49  ;;  %v1887_v49 = vld [vmem:[#allocation4 + $0x6] sm:$0x3] }
0x1b35   : > { %3130 = vrcp.f32 %v1614_v50 }
0x1b3f   : > { %v3131_v51 = vpop.eup %3130 }
0x1b40   : > { %v1622_v55 = vmul.f32 %v3131_v51, %v1620_v54 }
0x1ba3   : > { %v1625_v52 = vpop.permute.xlu0 %1624 }
0x1ba4   : > { %v1627_v53 = vmul.f32 %v3131_v51, %v1625_v52 }
0x1ba6   : > { %1629 = vrot.lane.b32.xlu0 %v1627_v53, %s3373_s6 }
0x1c18   : > { %v1630_v56 = vpop.permute.xlu0 %1629 }
0x1c19   : > { %v1632_v57 = vadd.f32 %v1630_v56, %v1622_v55 }
0x1c1b   : > { %3132 = vtanh.f32 %v1632_v57 }
0x1c25   : > { %v3133_v58 = vpop.eup %3132 }
0x1c26   : > { %1635 = vrot.lane.b32.xlu1 %v3133_v58, %s3373_s6 }
0x1c2a   : > { %1645 = vrot.lane.b32.xlu1 %v1632_v57, %s3374_s26 }
0x1c98   : > { %v1636_v59 = vpop.permute.xlu1 %1635 }
0x1c99   : > { %v1638_v60 = vmul.f32 %v3131_v51, %v1636_v59 }
0x1c9b   : > { %1640 = vrot.lane.b32.xlu0 %v1638_v60, %s3375_s22 }
0x1c9c   : > { %v1646_v61 = vpop.permute.xlu1 %1645 }
0x1c9d   : > { %1648 = vst.msk [vmem:[#allocation3] sm:$0x3] %vm368_vm0, %v1646_v61 }
0x1ca4   : > { %v1652_v62 = vld [vmem:[#allocation3] sm:$0x3] }
0x1ca5   : > { %1736 = vrot.lane.b32.xlu1 %v1652_v62, %s3373_s6 }
0x1d0d   : > { %v1641_v63 = vpop.permute.xlu0 %1640 }
0x1d0e   : > { %1643 = vst.msk [vmem:[#allocation2] sm:$0x3] %vm368_vm0, %v1641_v63  ;;  %2567 = vst.msk [vmem:[%s3636_s13 + $0xc] sm:$0x3] %vm368_vm0, %v1641_v63 }
0x1d15   : > { %v1651_v0 = vld [vmem:[#allocation2] sm:$0x3] }
0x1d16   : > { %2803 = vmatmul.mubr.msk.f32.vlgmr.msra.gmra.mrb[2].mxu0 %vm1418_vm5, %v1651_v0 }
0x1d17   : > { %2938 = vmatpush3.bf16.msra.mxu0 %v3786_v23  ;;  %2824 = vmatprep.mubr.msk.f32.mxu0 %vm3371_vm4, %v3372_v26  ;;  %v1737_v20 = vpop.permute.xlu1 %1736 }
0x1d18   : > { %2939 = vmatprep.subr.bf16.mxu0 %v3370_v24 }
0x1d1b   : > { %2941 = vmatpush3.bf16.msra.mxu0 %v3793_v25 }
0x1d1c   : > { %2948 = vmatprep.subr.bf16.mxu0 %v3370_v24 }
0x1de9   : > { %v1723_v6 = vpop.f32.mrb[2].mxu0 }
0x1dea   : > { %v1727_v7 = vadd.f32 %v1723_v6, %v1653_v5  ;;  %v2804_v8 = vpop.f32.mrb[3].mxu0 }
0x1dec   : > { %3134 = vtanh.f32 %v1727_v7  ;;  %v2569_v10 = vmul.f32 -1.442695, %v1727_v7 }
0x1dee   : > { %3136 = vpow2.f32 %v2569_v10 }
0x1df6   : > { %v3135_v9 = vpop.eup %3134 }
0x1df7   : > { %1741 = vrot.lane.b32.xlu0 %v3135_v9, %s3373_s6 }
0x1df8   : > { %v3137_v11 = vpop.eup %3136 }
0x1df9   : > { %v1731_v12 = vadd.f32 1.0, %v3137_v11  ;;  %v2004_v11 = vld [vmem:[#allocation4 + $0x4] sm:$0x3] }
0x1dfb   : > { %3138 = vrcp.f32 %v1731_v12 }
0x1e05   : > { %v3139_v13 = vpop.eup %3138 }
0x1e06   : > { %v1739_v21 = vmul.f32 %v3139_v13, %v1737_v20 }
0x1e69   : > { %v1742_v14 = vpop.permute.xlu0 %1741 }
0x1e6a   : > { %v1744_v19 = vmul.f32 %v3139_v13, %v1742_v14 }
0x1e6c   : > { %1746 = vrot.lane.b32.xlu0 %v1744_v19, %s3373_s6 }
0x1ede   : > { %v1747_v22 = vpop.permute.xlu0 %1746 }
0x1edf   : > { %v1749_v1 = vadd.f32 %v1747_v22, %v1739_v21 }
0x1ee1   : > { %3140 = vtanh.f32 %v1749_v1 }
0x1eeb   : > { %v3141_v2 = vpop.eup %3140 }
0x1eec   : > { %1752 = vrot.lane.b32.xlu1 %v3141_v2, %s3373_s6 }
0x1ef0   : > { %1762 = vrot.lane.b32.xlu1 %v1749_v1, %s3374_s26 }
0x1f5e   : > { %v1753_v3 = vpop.permute.xlu1 %1752 }
0x1f5f   : > { %v1755_v4 = vmul.f32 %v3139_v13, %v1753_v3 }
0x1f61   : > { %1757 = vrot.lane.b32.xlu0 %v1755_v4, %s3375_s22 }
0x1f62   : > { %v1763_v15 = vpop.permute.xlu1 %1762 }
0x1f63   : > { %1765 = vst.msk [vmem:[#allocation3] sm:$0x3] %vm368_vm0, %v1763_v15 }
0x1f6a   : > { %v1769_v27 = vld [vmem:[#allocation3] sm:$0x3] }
0x1f6b   : > { %1853 = vrot.lane.b32.xlu1 %v1769_v27, %s3373_s6 }
0x1fd3   : > { %v1758_v18 = vpop.permute.xlu0 %1757 }
0x1fd4   : > { %1760 = vst.msk [vmem:[#allocation2] sm:$0x3] %vm368_vm0, %v1758_v18  ;;  %2570 = vst.msk [vmem:[%s3636_s13 + $0xa] sm:$0x3] %vm368_vm0, %v1758_v18 }
0x1fdb   : > { %v1768_v16 = vld [vmem:[#allocation2] sm:$0x3] }
0x1fdc   : > { %2814 = vmatmul.mubr.msk.f32.vlgmr.msra.gmra.mrb[2].mxu1 %vm1418_vm5, %v1768_v16 }
0x1fdd   : > { %2944 = vmatpush3.bf16.msra.mxu1 %v3786_v23  ;;  %2835 = vmatprep.mubr.msk.f32.mxu1 %vm3371_vm4, %v3372_v26  ;;  %v1854_v38 = vpop.permute.xlu1 %1853 }
0x1fde   : > { %2945 = vmatprep.subr.bf16.mxu1 %v3370_v24 }
0x1fe1   : > { %2947 = vmatpush3.bf16.msra.mxu1 %v3793_v25 }
0x1fe2   : > { %2954 = vmatprep.subr.bf16.mxu1 %v3370_v24 }
0x20af   : > { %v1840_v28 = vpop.f32.mrb[2].mxu1 }
0x20b0   : > { %v1844_v29 = vadd.f32 %v1840_v28, %v1770_v17  ;;  %v2815_v30 = vpop.f32.mrb[3].mxu1 }
0x20b2   : > { %3142 = vtanh.f32 %v1844_v29  ;;  %v2572_v32 = vmul.f32 -1.442695, %v1844_v29  ;;  %v2121_v29 = vld [vmem:[#allocation4 + $0x2] sm:$0x3] }
0x20b4   : > { %3144 = vpow2.f32 %v2572_v32 }
0x20bc   : > { %v3143_v31 = vpop.eup %3142 }
0x20bd   : > { %1858 = vrot.lane.b32.xlu0 %v3143_v31, %s3373_s6 }
0x20be   : > { %v3145_v33 = vpop.eup %3144 }
0x20bf   : > { %v1848_v34 = vadd.f32 1.0, %v3145_v33 }
0x20c1   : > { %3146 = vrcp.f32 %v1848_v34 }
0x20cb   : > { %v3147_v35 = vpop.eup %3146 }
0x20cc   : > { %v1856_v39 = vmul.f32 %v3147_v35, %v1854_v38 }
0x212f   : > { %v1859_v36 = vpop.permute.xlu0 %1858 }
0x2130   : > { %v1861_v37 = vmul.f32 %v3147_v35, %v1859_v36 }
0x2132   : > { %1863 = vrot.lane.b32.xlu0 %v1861_v37, %s3373_s6 }
0x21a4   : > { %v1864_v40 = vpop.permute.xlu0 %1863 }
0x21a5   : > { %v1866_v41 = vadd.f32 %v1864_v40, %v1856_v39 }
0x21a7   : > { %3148 = vtanh.f32 %v1866_v41 }
0x21b1   : > { %v3149_v42 = vpop.eup %3148 }
0x21b2   : > { %1869 = vrot.lane.b32.xlu1 %v3149_v42, %s3373_s6 }
0x21b6   : > { %1879 = vrot.lane.b32.xlu1 %v1866_v41, %s3374_s26 }
0x2224   : > { %v1870_v43 = vpop.permute.xlu1 %1869 }
0x2225   : > { %v1872_v44 = vmul.f32 %v3147_v35, %v1870_v43 }
0x2227   : > { %1874 = vrot.lane.b32.xlu0 %v1872_v44, %s3375_s22 }
0x2228   : > { %v1880_v45 = vpop.permute.xlu1 %1879 }
0x2229   : > { %1882 = vst.msk [vmem:[#allocation3] sm:$0x3] %vm368_vm0, %v1880_v45 }
0x2230   : > { %v1886_v46 = vld [vmem:[#allocation3] sm:$0x3] }
0x2231   : > { %1970 = vrot.lane.b32.xlu1 %v1886_v46, %s3373_s6 }
0x2299   : > { %v1875_v47 = vpop.permute.xlu0 %1874 }
0x229a   : > { %1877 = vst.msk [vmem:[#allocation2] sm:$0x3] %vm368_vm0, %v1875_v47  ;;  %2573 = vst.msk [vmem:[%s3636_s13 + $0x8] sm:$0x3] %vm368_vm0, %v1875_v47 }
0x22a1   : > { %v1885_v48 = vld [vmem:[#allocation2] sm:$0x3] }
0x22a2   : > { %2825 = vmatmul.mubr.msk.f32.vlgmr.msra.gmra.mrb[4].mxu0 %vm1418_vm5, %v1885_v48 }
0x22a3   : > { %2950 = vmatpush3.bf16.msra.mxu0 %v3786_v23  ;;  %2846 = vmatprep.mubr.msk.f32.mxu0 %vm3371_vm4, %v3372_v26  ;;  %v1971_v60 = vpop.permute.xlu1 %1970 }
0x22a4   : > { %2951 = vmatprep.subr.bf16.mxu0 %v3370_v24 }
0x22a7   : > { %2953 = vmatpush3.bf16.msra.mxu0 %v3793_v25 }
0x2375   : > { %v1957_v50 = vpop.f32.mrb[4].mxu0 }
0x2376   : > { %v1961_v51 = vadd.f32 %v1957_v50, %v1887_v49  ;;  %v2826_v52 = vpop.f32.mrb[5].mxu0 }
0x2378   : > { %3150 = vtanh.f32 %v1961_v51  ;;  %v2575_v54 = vmul.f32 -1.442695, %v1961_v51  ;;  %v2238_v51 = vld [vmem:[#allocation4] sm:$0x3] }
0x237a   : > { %3152 = vpow2.f32 %v2575_v54 }
0x2382   : > { %v3151_v53 = vpop.eup %3150 }
0x2383   : > { %1975 = vrot.lane.b32.xlu0 %v3151_v53, %s3373_s6 }
0x2384   : > { %v3153_v55 = vpop.eup %3152 }
0x2385   : > { %v1965_v56 = vadd.f32 1.0, %v3153_v55 }
0x2387   : > { %3154 = vrcp.f32 %v1965_v56 }
0x2391   : > { %v3155_v57 = vpop.eup %3154 }
0x2392   : > { %v1973_v61 = vmul.f32 %v3155_v57, %v1971_v60 }
0x23f5   : > { %v1976_v58 = vpop.permute.xlu0 %1975 }
0x23f6   : > { %v1978_v59 = vmul.f32 %v3155_v57, %v1976_v58 }
0x23f8   : > { %1980 = vrot.lane.b32.xlu0 %v1978_v59, %s3373_s6 }
0x246a   : > { %v1981_v62 = vpop.permute.xlu0 %1980 }
0x246b   : > { %v1983_v63 = vadd.f32 %v1981_v62, %v1973_v61 }
0x246d   : > { %3156 = vtanh.f32 %v1983_v63 }
0x2477   : > { %v3157_v0 = vpop.eup %3156 }
0x2478   : > { %1986 = vrot.lane.b32.xlu1 %v3157_v0, %s3373_s6 }
0x247c   : > { %1996 = vrot.lane.b32.xlu1 %v1983_v63, %s3374_s26 }
0x24ea   : > { %v1987_v5 = vpop.permute.xlu1 %1986 }
0x24eb   : > { %v1989_v6 = vmul.f32 %v3155_v57, %v1987_v5 }
0x24ed   : > { %1991 = vrot.lane.b32.xlu0 %v1989_v6, %s3375_s22 }
0x24ee   : > { %v1997_v7 = vpop.permute.xlu1 %1996 }
0x24ef   : > { %1999 = vst.msk [vmem:[#allocation3] sm:$0x3] %vm368_vm0, %v1997_v7 }
0x24f6   : > { %v2003_v8 = vld [vmem:[#allocation3] sm:$0x3] }
0x24f7   : > { %2087 = vrot.lane.b32.xlu1 %v2003_v8, %s3373_s6 }
0x255f   : > { %v1992_v9 = vpop.permute.xlu0 %1991 }
0x2560   : > { %1994 = vst.msk [vmem:[#allocation2] sm:$0x3] %vm368_vm0, %v1992_v9  ;;  %2576 = vst.msk [vmem:[%s3636_s13 + $0x6] sm:$0x3] %vm368_vm0, %v1992_v9 }
0x2567   : > { %v2002_v10 = vld [vmem:[#allocation2] sm:$0x3] }
0x2568   : > { %2836 = vmatmul.mubr.msk.f32.vlgmr.msra.gmra.mrb[4].mxu1 %vm1418_vm5, %v2002_v10 }
0x2569   : > { %2956 = vmatpush3.bf16.msra.mxu1 %v3786_v23  ;;  %2857 = vmatprep.mubr.msk.f32.mxu1 %vm3371_vm4, %v3372_v26 }
0x256a   : > { %2957 = vmatprep.subr.bf16.mxu1 %v3370_v24  ;;  %v2088_v24 = vpop.permute.xlu1 %2087 }
0x256d   : > { %2959 = vmatpush3.bf16.msra.mxu1 %v3793_v25 }
0x263b   : > { %v2074_v12 = vpop.f32.mrb[4].mxu1 }
0x263c   : > { %v2078_v13 = vadd.f32 %v2074_v12, %v2004_v11  ;;  %v2837_v14 = vpop.f32.mrb[5].mxu1 }
0x263e   : > { %3158 = vtanh.f32 %v2078_v13  ;;  %v2578_v20 = vmul.f32 -1.442695, %v2078_v13 }
0x2640   : > { %3160 = vpow2.f32 %v2578_v20 }
0x2648   : > { %v3159_v19 = vpop.eup %3158 }
0x2649   : > { %2092 = vrot.lane.b32.xlu0 %v3159_v19, %s3373_s6 }
0x264a   : > { %v3161_v21 = vpop.eup %3160 }
0x264b   : > { %v2082_v22 = vadd.f32 1.0, %v3161_v21 }
0x264d   : > { %3162 = vrcp.f32 %v2082_v22 }
0x2657   : > { %v3163_v23 = vpop.eup %3162 }
0x2658   : > { %v2090_v25 = vmul.f32 %v3163_v23, %v2088_v24 }
0x26bb   : > { %v2093_v1 = vpop.permute.xlu0 %2092 }
0x26bc   : > { %v2095_v26 = vmul.f32 %v3163_v23, %v2093_v1 }
0x26be   : > { %2097 = vrot.lane.b32.xlu0 %v2095_v26, %s3373_s6 }
0x2730   : > { %v2098_v2 = vpop.permute.xlu0 %2097 }
0x2731   : > { %v2100_v3 = vadd.f32 %v2098_v2, %v2090_v25 }
0x2733   : > { %3164 = vtanh.f32 %v2100_v3 }
0x273d   : > { %v3165_v4 = vpop.eup %3164 }
0x273e   : > { %2103 = vrot.lane.b32.xlu1 %v3165_v4, %s3373_s6 }
0x2742   : > { %2113 = vrot.lane.b32.xlu1 %v2100_v3, %s3374_s26 }
0x27b0   : > { %v2104_v15 = vpop.permute.xlu1 %2103 }
0x27b1   : > { %v2106_v27 = vmul.f32 %v3163_v23, %v2104_v15 }
0x27b3   : > { %2108 = vrot.lane.b32.xlu0 %v2106_v27, %s3375_s22 }
0x27b4   : > { %v2114_v18 = vpop.permute.xlu1 %2113 }
0x27b5   : > { %2116 = vst.msk [vmem:[#allocation3] sm:$0x3] %vm368_vm0, %v2114_v18 }
0x27bc   : > { %v2120_v16 = vld [vmem:[#allocation3] sm:$0x3] }
0x27bd   : > { %2204 = vrot.lane.b32.xlu1 %v2120_v16, %s3373_s6 }
0x2825   : > { %v2109_v17 = vpop.permute.xlu0 %2108 }
0x2826   : > { %2111 = vst.msk [vmem:[#allocation2] sm:$0x3] %vm368_vm0, %v2109_v17  ;;  %2579 = vst.msk [vmem:[%s3636_s13 + $0x4] sm:$0x3] %vm368_vm0, %v2109_v17 }
0x282d   : > { %v2119_v28 = vld [vmem:[#allocation2] sm:$0x3] }
0x282e   : > { %2847 = vmatmul.mubr.msk.f32.vlgmr.msra.gmra.mrb[6].mxu0 %vm1418_vm5, %v2119_v28 }
0x282f   : > { %v2205_v40 = vpop.permute.xlu1 %2204 }
0x2901   : > { %v2191_v30 = vpop.f32.mrb[6].mxu0 }
0x2902   : > { %v2195_v31 = vadd.f32 %v2191_v30, %v2121_v29  ;;  %v2848_v32 = vpop.f32.mrb[7].mxu0 }
0x2904   : > { %3166 = vtanh.f32 %v2195_v31  ;;  %v2581_v34 = vmul.f32 -1.442695, %v2195_v31 }
0x2906   : > { %3168 = vpow2.f32 %v2581_v34 }
0x290e   : > { %v3167_v33 = vpop.eup %3166 }
0x290f   : > { %2209 = vrot.lane.b32.xlu0 %v3167_v33, %s3373_s6 }
0x2910   : > { %v3169_v35 = vpop.eup %3168 }
0x2911   : > { %v2199_v36 = vadd.f32 1.0, %v3169_v35 }
0x2913   : > { %3170 = vrcp.f32 %v2199_v36 }
0x291d   : > { %v3171_v37 = vpop.eup %3170 }
0x291e   : > { %v2207_v41 = vmul.f32 %v3171_v37, %v2205_v40 }
0x2981   : > { %v2210_v38 = vpop.permute.xlu0 %2209 }
0x2982   : > { %v2212_v39 = vmul.f32 %v3171_v37, %v2210_v38 }
0x2984   : > { %2214 = vrot.lane.b32.xlu0 %v2212_v39, %s3373_s6 }
0x29f6   : > { %v2215_v42 = vpop.permute.xlu0 %2214 }
0x29f7   : > { %v2217_v43 = vadd.f32 %v2215_v42, %v2207_v41 }
0x29f9   : > { %3172 = vtanh.f32 %v2217_v43 }
0x2a03   : > { %v3173_v44 = vpop.eup %3172 }
0x2a04   : > { %2220 = vrot.lane.b32.xlu1 %v3173_v44, %s3373_s6 }
0x2a08   : > { %2230 = vrot.lane.b32.xlu1 %v2217_v43, %s3374_s26 }
0x2a76   : > { %v2221_v45 = vpop.permute.xlu1 %2220 }
0x2a77   : > { %v2223_v46 = vmul.f32 %v3171_v37, %v2221_v45 }
0x2a79   : > { %2225 = vrot.lane.b32.xlu0 %v2223_v46, %s3375_s22 }
0x2a7a   : > { %v2231_v47 = vpop.permute.xlu1 %2230 }
0x2a7b   : > { %2233 = vst.msk [vmem:[#allocation3] sm:$0x3] %vm368_vm0, %v2231_v47 }
0x2a82   : > { %v2237_v48 = vld [vmem:[#allocation3] sm:$0x3] }
0x2a83   : > { %2321 = vrot.lane.b32.xlu1 %v2237_v48, %s3373_s6 }
0x2aeb   : > { %v2226_v49 = vpop.permute.xlu0 %2225 }
0x2aec   : > { %2228 = vst.msk [vmem:[#allocation2] sm:$0x3] %vm368_vm0, %v2226_v49  ;;  %2582 = vst.msk [vmem:[%s3636_s13 + $0x2] sm:$0x3] %vm368_vm0, %v2226_v49 }
0x2af3   : > { %v2236_v50 = vld [vmem:[#allocation2] sm:$0x3] }
0x2af4   : > { %2858 = vmatmul.mubr.msk.f32.vlgmr.msra.gmra.mrb[6].mxu1 %vm1418_vm5, %v2236_v50 }
0x2af5   : > { %v2322_v62 = vpop.permute.xlu1 %2321 }
0x2bc7   : > { %v2308_v52 = vpop.f32.mrb[6].mxu1 }
0x2bc8   : > { %v2312_v53 = vadd.f32 %v2308_v52, %v2238_v51  ;;  %v2859_v54 = vpop.f32.mrb[7].mxu1 }
0x2bca   : > { %3174 = vtanh.f32 %v2312_v53  ;;  %v2584_v56 = vmul.f32 -1.442695, %v2312_v53 }
0x2bcc   : > { %3176 = vpow2.f32 %v2584_v56 }
0x2bd4   : > { %v3175_v55 = vpop.eup %3174 }
0x2bd5   : > { %2326 = vrot.lane.b32.xlu0 %v3175_v55, %s3373_s6 }
0x2bd6   : > { %v3177_v57 = vpop.eup %3176 }
0x2bd7   : > { %v2316_v58 = vadd.f32 1.0, %v3177_v57 }
0x2bd9   : > { %3178 = vrcp.f32 %v2316_v58 }
0x2be3   : > { %v3179_v59 = vpop.eup %3178 }
0x2be4   : > { %v2324_v63 = vmul.f32 %v3179_v59, %v2322_v62 }
0x2c47   : > { %v2327_v60 = vpop.permute.xlu0 %2326 }
0x2c48   : > { %v2329_v61 = vmul.f32 %v3179_v59, %v2327_v60 }
0x2c4a   : > { %2331 = vrot.lane.b32.xlu0 %v2329_v61, %s3373_s6 }
0x2cbc   : > { %v2332_v0 = vpop.permute.xlu0 %2331 }
0x2cbd   : > { %v2334_v5 = vadd.f32 %v2332_v0, %v2324_v63 }
0x2cbf   : > { %3180 = vtanh.f32 %v2334_v5 }
0x2cc9   : > { %v3181_v6 = vpop.eup %3180 }
0x2cca   : > { %2337 = vrot.lane.b32.xlu1 %v3181_v6, %s3373_s6 }
0x2cce   : > { %2347 = vrot.lane.b32.xlu1 %v2334_v5, %s3374_s26 }
0x2d3c   : > { %v2338_v7 = vpop.permute.xlu1 %2337 }
0x2d3d   : > { %v2340_v8 = vmul.f32 %v3179_v59, %v2338_v7 }
0x2d3f   : > { %2342 = vrot.lane.b32.xlu0 %v2340_v8, %s3375_s22 }
0x2d40   : > { %v2348_v9 = vpop.permute.xlu1 %2347 }
0x2d41   : > { %2350 = vst.msk [vmem:[#allocation3] sm:$0x3] %vm368_vm0, %v2348_v9 }
0x2db1   : > { %v2343_v10 = vpop.permute.xlu0 %2342 }
0x2db2   : > { %2345 = vst.msk [vmem:[#allocation2] sm:$0x3] %vm368_vm0, %v2343_v10  ;;  %2351 = vst.msk [vmem:[%s3636_s13] sm:$0x3] %vm368_vm0, %v2343_v10 }
0x2db3 PF: > { %s2592_s23 = sshll.u32 %s3348_s18, 8  ;;  %s2373_s24 = sshll.u32 %s3636_s13, 4  ;;  %s3935_s24 = int_to_ptr.vmem [resolvable:$true] %s2373_s24 }
0x2db4   : > { %s3932_s12 = scalar_lea.hbm %s3988_s4, %s2592_s23  ;;  %s2353_s9 = scalar_lea.sflag [#allocation7], %s3609_s29 }
0x2db5   : > { %s3270_s21 = scalar_lea.vmem %s3935_s24, 256  ;;  %p4025_p1 = scmp.ne.s32.totalorder %s4006_s28, 0 }
0x2db6   : > { %p3271_p13 = scmp.ne.s32.totalorder %s3935_s24, %s3270_s21  ;;  %s3376_s27 = smov [#allocation11]  }
0x2db7   : > { %s3274_s10 = sshll.u32 %s3376_s27, 4  ;;  %s3275_s10 = int_to_ptr.vmem [resolvable:$false] %s3274_s10 }
0x2db8   : > { %p3272_p8 = pnand %p3271_p13, %p4025_p1  ;;  %s3276_s18 = scalar_lea.vmem %s3275_s10, 512 }
0x2db9   : > { %p3277_p11 = scmp.lt.s32.totalorder %s3935_s24, %s3275_s10  ;;  %p3278_p7 = scmp.lt.s32.totalorder %s3276_s18, %s3270_s21 }
0x2dba   : > { %p3273_p6 = pneg %p3272_p8 }
0x2dbb   : > { %p3279_p12 = por %p3278_p7, %p3277_p11 }
0x2dbd   : > { %p3280_p3 = pnand %p3279_p12, %p3273_p6 }
0x2dbf   : > { %3283 = shalt.err (!%p3280_p3)
}
0x2dc0   : > { %s3284_s25 = scalar_lea.hbm %s3932_s12, 256  ;;  %s3288_s8 = scalar_lea.hbm %s3988_s4, 512 }
0x2dc1   : > { %p3285_p4 = scmp.ne.s32.totalorder %s3932_s12, %s3284_s25  ;;  %p3289_p10 = scmp.lt.u32.totalorder %s3932_s12, %s3988_s4 }
0x2dc2   : > { %p3290_p2 = scmp.lt.u32.totalorder %s3288_s8, %s3284_s25  ;;  %p3292_p13 = scmp.lt.u32.totalorder %s3284_s25, %s3932_s12 }
0x2dc3   : > { %p3286_p5 = pnand %p3285_p4, %p4025_p1 }
0x2dc4   : > { %p3291_p9 = por %p3290_p2, %p3289_p10 }
0x2dc5   : > { %p3287_p0 = pneg %p3286_p5 }
0x2dc6   : > { %p3293_p8 = por %p3292_p13, %p3291_p9 }
0x2dc8   : > { %p3294_p6 = pnand %p3293_p8, %p3287_p0 }
0x2dca   : > { %3297 = shalt.err (!%p3294_p6)
}
0x2dcb   : > { %s3377_s6 = smov 32   ;;  %s3378_s26 = smov 2  }
0x2dcc   : > { %2968 = dma.vmem_to_hbm [thread:$0]  (%p4025_p1), %s3935_s24, 256, %s3932_s12, %s2353_s9, %s3377_s6, %s3377_s6, %s3378_s26  }
0x2dcd PF: > { %s2388_s22 = sand.u32 1, %s3336_s15   ;;  %p4026_p11 = scmp.ne.s32.totalorder %s4008_s30, 0 }
0x2dce   : > { %p4027_p7 = scmp.ge.s32.totalorder %s3356_s20, 2  ;;  %s2389_s23 = scalar_lea.sflag [#allocation7], %s2388_s22 }
0x2dd0   : > { %p2981_p12 = pnand %p4027_p7, %p4026_p11 }
0x2dd2   : > { %3331 = dma.done.wait (!%p2981_p12), %s2389_s23, 256  }
0x2dd3   : > { %3333 = vsyncadd (!%p2981_p12), %s2389_s23, 4294967040  ;;  %s23_s20 = sadd.s32 1, %s3356_s20   ;;  %s4028_s14 = sld [smem:[#allocation16_spill]] }
0x2dd4   : > { %p20_p3 = scmp.ge.s32.totalorder %s23_s20, 4   ;;  %s4029_s28 = sld [smem:[#allocation15_spill]] }
0x2dd5   : > { %s4030_s15 = smov %s3340_s16  ;;  %s4031_s16 = smov %s3344_s17 }
0x2dd6   : > { %s4033_s18 = smov %s3352_s19  ;;  %22 = sbr.rel (!%p20_p3) target bundleno = 10 (0xa), region = 134 }
0x2dd9   : > { %s4032_s17 = smov %s4028_s14 }
0x2dda   : > { %s4034_s19 = smov %s4029_s28 }
0x2ddd   :  { %2394 = vsyncpa [#allocation6], 1 }
0x2dde   :  { %2396 = vsyncpa [#allocation6 + $0x1], 1 }
0x2ddf   :  { %2397 = vsyncpa [#allocation9], 1 }
0x2de0   :  { %2399 = vsyncpa [#allocation9 + $0x1], 1 }
0x2de1   :  { %2400 = vsyncpa [#allocation7], 1 }
0x2de2   :  { %2402 = vsyncpa [#allocation7 + $0x1], 1 }

</bundles_post_ra>
